<compile_context>
chip_gen: v6e
topology: v6e:2x2x1
jax: 0.10.0
libtpu: 0.0.40
codegen_flags: <defaults>
</compile_context>

<pallas_src>
import functools

import jax
import jax.numpy as jnp
from jax.experimental import pallas as pl
from jax.experimental.pallas import tpu as pltpu

CPAD = 128   # lane-dense channel padding for weights / activations / outputs


def _ru8(n):
    return ((n + 7) // 8) * 8


# ----------------------------- Pallas kernel -------------------------------

def _encoder_kernel(ph_ref, w1_ref, b1_ref, w2_ref, b2_ref, w3_ref, b3_ref,
                    o_ref, z1_ref, z2_ref, *,
                    taps1, taps2, taps3, mo1, mo2, mo3,
                    wh1, wo1, w2p, wo2, w3p, ho1, ho2):
    """Fused 3-layer conv-BN-ReLU backbone for one batch element.

    ph_ref : (1, 4, Mph, Cin) bf16  polyphase-flattened, padded RGB input
    w*_ref : (9, Cin*, CPAD)  bf16  per-tap weights (BN scale folded in)
    b*_ref : (1, CPAD)        f32   folded-BN bias
    o_ref  : (1, mo3, CPAD)   bf16  last layer's full stride-1 conv map
                                    (caller subsamples rows/cols by 2)
    z1/z2  : VMEM f32 scratch holding the zero-padded intermediate maps,
             flattened row-major with widths w2p / w3p.
    """
    # ---- stem: stride-2 conv as 9 shifted tap-GEMMs on the polyphase input
    acc = jnp.zeros((mo1, CPAD), jnp.float32)
    for t, (p, off) in enumerate(taps1):
        acc += jnp.dot(ph_ref[0, p, pl.ds(off, mo1), :], w1_ref[t],
                       preferred_element_type=jnp.float32)
    # bf16 rounding at the layer boundary (matches reference), kept in f32.
    y1 = jnp.maximum(acc + b1_ref[...], 0.0).astype(jnp.bfloat16).astype(jnp.float32)

    # scatter the valid (ho1 x wo1) region into the zero-padded z1 map
    z1_ref[...] = jnp.zeros_like(z1_ref)
    for r in range(ho1):
        z1_ref[pl.ds((r + 1) * w2p + 1, wo1), :] = y1[r * wh1:r * wh1 + wo1, :]

    # ---- block 1: stride-1 conv, reads the padded map directly from VMEM
    acc = jnp.zeros((mo2, CPAD), jnp.float32)
    for t, off in enumerate(taps2):
        acc += jnp.dot(z1_ref[pl.ds(off, mo2), :].astype(jnp.bfloat16),
                       w2_ref[t], preferred_element_type=jnp.float32)
    y2 = jnp.maximum(acc + b2_ref[...], 0.0).astype(jnp.bfloat16).astype(jnp.float32)

    z2_ref[...] = jnp.zeros_like(z2_ref)
    for r in range(ho2):
        z2_ref[pl.ds((r + 1) * w3p + 1, wo2), :] = y2[r * w2p:r * w2p + wo2, :]

    # ---- block 2: stride-2 conv computed at stride 1 (caller subsamples)
    acc = jnp.zeros((mo3, CPAD), jnp.float32)
    for t, off in enumerate(taps3):
        acc += jnp.dot(z2_ref[pl.ds(off, mo3), :].astype(jnp.bfloat16),
                       w3_ref[t], preferred_element_type=jnp.float32)
    y3 = jnp.maximum(acc + b3_ref[...], 0.0)
    o_ref[0] = y3.astype(o_ref.dtype)


# -------------------------- parameters & forward ---------------------------

def _init_conv_bn(key, cin, cout, cin_pad, k=3):
    k1, k2, k3, k4, k5 = jax.random.split(key, 5)
    w = jax.random.normal(k1, (cout, cin, k, k), jnp.float32) / jnp.sqrt(cin * k * k)
    gamma = 1.0 + 0.1 * jax.random.normal(k2, (cout,), jnp.float32)
    beta = 0.1 * jax.random.normal(k3, (cout,), jnp.float32)
    mean = 0.1 * jax.random.normal(k4, (cout,), jnp.float32)
    var = jnp.abs(jax.random.normal(k5, (cout,), jnp.float32)) + 1.0
    scale = gamma / jnp.sqrt(var + 1e-5)           # fold BN into affine
    bias = beta - mean * scale
    w_fold = w * scale[:, None, None, None]        # scale folded into weights

    # Kernel layout: tap-major (KH*KW, Cin_pad, Cout_pad), bf16, lane-dense.
    w_taps = jnp.transpose(w_fold, (2, 3, 1, 0)).reshape(k * k, cin, cout)
    w_taps = jnp.pad(w_taps, ((0, 0), (0, cin_pad - cin), (0, CPAD - cout)))
    return {
        "w_taps": w_taps.astype(jnp.bfloat16),
        "bias": jnp.pad(bias, (0, CPAD - cout)).reshape(1, CPAD).astype(jnp.float32),
        # reference-path copies (same bf16 rounding as the kernel weights)
        "w_hwio": jnp.transpose(w_fold, (2, 3, 1, 0)).astype(jnp.bfloat16),
        "bias_ref": bias,
    }


def init_encoder_params(key, cin=3, c_stem=16, c_feat=32):
    k1, k2, k3 = jax.random.split(key, 3)
    return {
        "stem": _init_conv_bn(k1, cin, c_stem, cin_pad=cin),     # stride 2
        "b1": _init_conv_bn(k2, c_stem, c_feat, cin_pad=CPAD),   # stride 1
        "b2": _init_conv_bn(k3, c_feat, c_feat, cin_pad=CPAD),   # stride 2
    }


def encoder_forward(params, x_nchw):
    """Equivalent of Encoder.forward: returns the CNN feature map (NCHW)."""
    x = jnp.transpose(x_nchw, (0, 2, 3, 1)).astype(jnp.bfloat16)   # NCHW -> NHWC
    b, h, w, cin = x.shape

    # ---- static geometry (H, W assumed even) ----
    ho1, wo1 = h // 2, w // 2                  # stem output (stride 2, pad 1)
    hp1, wp1 = h + 4, w + 2                    # stem padding: (1, 3), (1, 1)
    hh1, wh1 = hp1 // 2, wp1 // 2              # polyphase half-sizes
    mph = hh1 * wh1
    mo1 = ho1 * wh1                            # stem row-extended flat length

    ho2, wo2 = ho1, wo1                        # block1 (stride 1) keeps size
    w2p = wo1 + 2                              # padded width of z1 map
    mo2 = ho2 * w2p

    w3p = wo2 + 2                              # padded width of z2 map
    mo3 = ho2 * w3p                            # block2 full stride-1 conv rows

    z1_rows = _ru8((ho1 + 3) * w2p)            # covers padded map + shifted reads
    z2_rows = _ru8((ho2 + 3) * w3p)

    taps1 = tuple(((i % 2) * 2 + (j % 2), (i // 2) * wh1 + (j // 2))
                  for i in range(3) for j in range(3))
    taps2 = tuple(i * w2p + j for i in range(3) for j in range(3))
    taps3 = tuple(i * w3p + j for i in range(3) for j in range(3))

    # ---- stem input: pad + polyphase split so every tap is a stride-1 shift
    xp = jnp.pad(x, ((0, 0), (1, 3), (1, 1), (0, 0)))
    phases = (xp.reshape(b, hh1, 2, wh1, 2, cin)
                .transpose(0, 2, 4, 1, 3, 5)
                .reshape(b, 4, mph, cin))

    p1, p2, p3 = params["stem"], params["b1"], params["b2"]

    out = pl.pallas_call(
        functools.partial(
            _encoder_kernel,
            taps1=taps1, taps2=taps2, taps3=taps3,
            mo1=mo1, mo2=mo2, mo3=mo3,
            wh1=wh1, wo1=wo1, w2p=w2p, wo2=wo2, w3p=w3p, ho1=ho1, ho2=ho2),
        out_shape=jax.ShapeDtypeStruct((b, mo3, CPAD), jnp.bfloat16),
        grid=(b,),
        in_specs=[
            pl.BlockSpec((1, 4, mph, cin), lambda i: (i, 0, 0, 0)),   # image
            pl.BlockSpec((9, cin, CPAD), lambda i: (0, 0, 0)),        # stem W
            pl.BlockSpec((1, CPAD), lambda i: (0, 0)),                # stem b
            pl.BlockSpec((9, CPAD, CPAD), lambda i: (0, 0, 0)),       # b1 W
            pl.BlockSpec((1, CPAD), lambda i: (0, 0)),                # b1 b
            pl.BlockSpec((9, CPAD, CPAD), lambda i: (0, 0, 0)),       # b2 W
            pl.BlockSpec((1, CPAD), lambda i: (0, 0)),                # b2 b
        ],
        out_specs=pl.BlockSpec((1, mo3, CPAD), lambda i: (i, 0, 0)),
        scratch_shapes=[
            pltpu.VMEM((z1_rows, CPAD), jnp.float32),
            pltpu.VMEM((z2_rows, CPAD), jnp.float32),
        ],
        compiler_params=pltpu.CompilerParams(
            dimension_semantics=("parallel",)),
    )(phases, p1["w_taps"], p1["bias"], p2["w_taps"], p2["bias"],
      p3["w_taps"], p3["bias"])

    # Last layer was computed at stride 1 over the padded map: subsample the
    # even rows/cols and drop the lane/garbage padding.
    c_feat = p3["w_hwio"].shape[-1]                                   # static
    full = out.reshape(b, ho2, w3p, CPAD)
    feat = full[:, 0::2, 0:wo2:2, :c_feat].astype(jnp.float32)        # (B,4,4,C)
    return jnp.transpose(feat, (0, 3, 1, 2))                          # NHWC -> NCHW


# ----------------------------- pure-JAX reference ---------------------------

def encoder_reference(params, x_nchw):
    def layer(x, p, stride):
        y = jax.lax.conv_general_dilated(
            x.astype(jnp.bfloat16), p["w_hwio"], (stride, stride),
            ((1, 1), (1, 1)), dimension_numbers=("NHWC", "HWIO", "NHWC"),
            preferred_element_type=jnp.float32)
        y = jnp.maximum(y + p["bias_ref"], 0.0)
        return y.astype(jnp.bfloat16)                # mirror bf16 activations
    x = jnp.transpose(x_nchw, (0, 2, 3, 1))
    x = layer(x, params["stem"], 2)
    x = layer(x, params["b1"], 1)
    x = layer(x, params["b2"], 2)
    return jnp.transpose(x.astype(jnp.float32), (0, 3, 1, 2))


if __name__ == "__main__":
    key = jax.random.PRNGKey(0)
    kp, kx = jax.random.split(key)
    params = init_encoder_params(kp)

    x = jax.random.normal(kx, (2, 3, 16, 16), jnp.float32)   # B=2, C=3, H=W=16

    feats = jax.jit(encoder_forward)(params, x)
    feats = jax.block_until_ready(feats)

    ref = encoder_reference(params, x)
    assert feats.shape == (2, 32, 4, 4), feats.shape
    assert jnp.allclose(feats, ref, atol=5e-2, rtol=5e-2), (
        "mismatch vs JAX reference, max|diff|=%f"
        % float(jnp.max(jnp.abs(feats - ref))))

    print("KERNEL_OK")
</pallas_src>

<mosaic_0001>
module attributes {stable_mosaic.version = 11 : i64} {
  func.func @_encoder_kernel(%arg0: i32, %arg1: memref<1x4x90x3xbf16, #tpu.memory_space<vmem>>, %arg2: memref<9x3x128xbf16, #tpu.memory_space<vmem>>, %arg3: memref<1x128xf32, #tpu.memory_space<vmem>>, %arg4: memref<9x128x128xbf16, #tpu.memory_space<vmem>>, %arg5: memref<1x128xf32, #tpu.memory_space<vmem>>, %arg6: memref<9x128x128xbf16, #tpu.memory_space<vmem>>, %arg7: memref<1x128xf32, #tpu.memory_space<vmem>>, %arg8: memref<1x80x128xbf16, #tpu.memory_space<vmem>>, %arg9: memref<112x128xf32, #tpu.memory_space<vmem>>, %arg10: memref<112x128xf32, #tpu.memory_space<vmem>>) attributes {dimension_semantics = [#tpu.dimension_semantics<parallel>], iteration_bounds = array<i64: 2>, scalar_prefetch = 0 : i64, scratch_operands = 2 : i64, tpu.core_type = #tpu.core_type<tc>, window_params = [{transform_indices = @transform_0, window_bounds = array<i64: 1, 4, 90, 3>}, {pipeline_mode = #tpu.pipeline_mode<synchronous>, transform_indices = @transform_1, window_bounds = array<i64: 9, 3, 128>}, {pipeline_mode = #tpu.pipeline_mode<synchronous>, transform_indices = @transform_2, window_bounds = array<i64: 1, 128>}, {pipeline_mode = #tpu.pipeline_mode<synchronous>, transform_indices = @transform_3, window_bounds = array<i64: 9, 128, 128>}, {pipeline_mode = #tpu.pipeline_mode<synchronous>, transform_indices = @transform_4, window_bounds = array<i64: 1, 128>}, {pipeline_mode = #tpu.pipeline_mode<synchronous>, transform_indices = @transform_5, window_bounds = array<i64: 9, 128, 128>}, {pipeline_mode = #tpu.pipeline_mode<synchronous>, transform_indices = @transform_6, window_bounds = array<i64: 1, 128>}, {transform_indices = @transform_7, window_bounds = array<i64: 1, 80, 128>}]} {
    %cst = arith.constant 0.000000e+00 : f32
    %0 = vector.broadcast %cst : f32 to vector<72x128xf32>
    %c0 = arith.constant 0 : index
    %c0_0 = arith.constant 0 : index
    %c0_1 = arith.constant 0 : index
    %c0_2 = arith.constant 0 : index
    %1 = vector.load %arg1[%c0, %c0_0, %c0_1, %c0_2] : memref<1x4x90x3xbf16, #tpu.memory_space<vmem>>, vector<1x1x72x3xbf16>
    %2 = vector.shape_cast %1 : vector<1x1x72x3xbf16> to vector<72x3xbf16>
    %c0_3 = arith.constant 0 : index
    %c0_4 = arith.constant 0 : index
    %c0_5 = arith.constant 0 : index
    %3 = vector.load %arg2[%c0_3, %c0_4, %c0_5] : memref<9x3x128xbf16, #tpu.memory_space<vmem>>, vector<1x3x128xbf16>
    %4 = vector.shape_cast %3 : vector<1x3x128xbf16> to vector<3x128xbf16>
    %cst_6 = arith.constant dense<0.000000e+00> : vector<72x128xf32>
    %5 = tpu.matmul %2, %4, %cst_6 {dimension_numbers = #tpu.dot_dimension_numbers<[1], [0], [0], [1], [0, 0, 1, 1], [], []>} : vector<72x3xbf16>, vector<3x128xbf16>, vector<72x128xf32> -> vector<72x128xf32>
    %6 = arith.addf %0, %5 : vector<72x128xf32>
    %c0_7 = arith.constant 0 : index
    %c1 = arith.constant 1 : index
    %c0_8 = arith.constant 0 : index
    %c0_9 = arith.constant 0 : index
    %7 = vector.load %arg1[%c0_7, %c1, %c0_8, %c0_9] : memref<1x4x90x3xbf16, #tpu.memory_space<vmem>>, vector<1x1x72x3xbf16>
    %8 = vector.shape_cast %7 : vector<1x1x72x3xbf16> to vector<72x3xbf16>
    %c1_10 = arith.constant 1 : index
    %c0_11 = arith.constant 0 : index
    %c0_12 = arith.constant 0 : index
    %9 = vector.load %arg2[%c1_10, %c0_11, %c0_12] : memref<9x3x128xbf16, #tpu.memory_space<vmem>>, vector<1x3x128xbf16>
    %10 = vector.shape_cast %9 : vector<1x3x128xbf16> to vector<3x128xbf16>
    %cst_13 = arith.constant dense<0.000000e+00> : vector<72x128xf32>
    %11 = tpu.matmul %8, %10, %cst_13 {dimension_numbers = #tpu.dot_dimension_numbers<[1], [0], [0], [1], [0, 0, 1, 1], [], []>} : vector<72x3xbf16>, vector<3x128xbf16>, vector<72x128xf32> -> vector<72x128xf32>
    %12 = arith.addf %6, %11 : vector<72x128xf32>
    %c0_14 = arith.constant 0 : index
    %c0_15 = arith.constant 0 : index
    %c1_16 = arith.constant 1 : index
    %c0_17 = arith.constant 0 : index
    %13 = vector.load %arg1[%c0_14, %c0_15, %c1_16, %c0_17] : memref<1x4x90x3xbf16, #tpu.memory_space<vmem>>, vector<1x1x72x3xbf16>
    %14 = vector.shape_cast %13 : vector<1x1x72x3xbf16> to vector<72x3xbf16>
    %c2 = arith.constant 2 : index
    %c0_18 = arith.constant 0 : index
    %c0_19 = arith.constant 0 : index
    %15 = vector.load %arg2[%c2, %c0_18, %c0_19] : memref<9x3x128xbf16, #tpu.memory_space<vmem>>, vector<1x3x128xbf16>
    %16 = vector.shape_cast %15 : vector<1x3x128xbf16> to vector<3x128xbf16>
    %cst_20 = arith.constant dense<0.000000e+00> : vector<72x128xf32>
    %17 = tpu.matmul %14, %16, %cst_20 {dimension_numbers = #tpu.dot_dimension_numbers<[1], [0], [0], [1], [0, 0, 1, 1], [], []>} : vector<72x3xbf16>, vector<3x128xbf16>, vector<72x128xf32> -> vector<72x128xf32>
    %18 = arith.addf %12, %17 : vector<72x128xf32>
    %c0_21 = arith.constant 0 : index
    %c2_22 = arith.constant 2 : index
    %c0_23 = arith.constant 0 : index
    %c0_24 = arith.constant 0 : index
    %19 = vector.load %arg1[%c0_21, %c2_22, %c0_23, %c0_24] : memref<1x4x90x3xbf16, #tpu.memory_space<vmem>>, vector<1x1x72x3xbf16>
    %20 = vector.shape_cast %19 : vector<1x1x72x3xbf16> to vector<72x3xbf16>
    %c3 = arith.constant 3 : index
    %c0_25 = arith.constant 0 : index
    %c0_26 = arith.constant 0 : index
    %21 = vector.load %arg2[%c3, %c0_25, %c0_26] : memref<9x3x128xbf16, #tpu.memory_space<vmem>>, vector<1x3x128xbf16>
    %22 = vector.shape_cast %21 : vector<1x3x128xbf16> to vector<3x128xbf16>
    %cst_27 = arith.constant dense<0.000000e+00> : vector<72x128xf32>
    %23 = tpu.matmul %20, %22, %cst_27 {dimension_numbers = #tpu.dot_dimension_numbers<[1], [0], [0], [1], [0, 0, 1, 1], [], []>} : vector<72x3xbf16>, vector<3x128xbf16>, vector<72x128xf32> -> vector<72x128xf32>
    %24 = arith.addf %18, %23 : vector<72x128xf32>
    %c0_28 = arith.constant 0 : index
    %c3_29 = arith.constant 3 : index
    %c0_30 = arith.constant 0 : index
    %c0_31 = arith.constant 0 : index
    %25 = vector.load %arg1[%c0_28, %c3_29, %c0_30, %c0_31] : memref<1x4x90x3xbf16, #tpu.memory_space<vmem>>, vector<1x1x72x3xbf16>
    %26 = vector.shape_cast %25 : vector<1x1x72x3xbf16> to vector<72x3xbf16>
    %c4 = arith.constant 4 : index
    %c0_32 = arith.constant 0 : index
    %c0_33 = arith.constant 0 : index
    %27 = vector.load %arg2[%c4, %c0_32, %c0_33] : memref<9x3x128xbf16, #tpu.memory_space<vmem>>, vector<1x3x128xbf16>
    %28 = vector.shape_cast %27 : vector<1x3x128xbf16> to vector<3x128xbf16>
    %cst_34 = arith.constant dense<0.000000e+00> : vector<72x128xf32>
    %29 = tpu.matmul %26, %28, %cst_34 {dimension_numbers = #tpu.dot_dimension_numbers<[1], [0], [0], [1], [0, 0, 1, 1], [], []>} : vector<72x3xbf16>, vector<3x128xbf16>, vector<72x128xf32> -> vector<72x128xf32>
    %30 = arith.addf %24, %29 : vector<72x128xf32>
    %c0_35 = arith.constant 0 : index
    %c2_36 = arith.constant 2 : index
    %c1_37 = arith.constant 1 : index
    %c0_38 = arith.constant 0 : index
    %31 = vector.load %arg1[%c0_35, %c2_36, %c1_37, %c0_38] : memref<1x4x90x3xbf16, #tpu.memory_space<vmem>>, vector<1x1x72x3xbf16>
    %32 = vector.shape_cast %31 : vector<1x1x72x3xbf16> to vector<72x3xbf16>
    %c5 = arith.constant 5 : index
    %c0_39 = arith.constant 0 : index
    %c0_40 = arith.constant 0 : index
    %33 = vector.load %arg2[%c5, %c0_39, %c0_40] : memref<9x3x128xbf16, #tpu.memory_space<vmem>>, vector<1x3x128xbf16>
    %34 = vector.shape_cast %33 : vector<1x3x128xbf16> to vector<3x128xbf16>
    %cst_41 = arith.constant dense<0.000000e+00> : vector<72x128xf32>
    %35 = tpu.matmul %32, %34, %cst_41 {dimension_numbers = #tpu.dot_dimension_numbers<[1], [0], [0], [1], [0, 0, 1, 1], [], []>} : vector<72x3xbf16>, vector<3x128xbf16>, vector<72x128xf32> -> vector<72x128xf32>
    %36 = arith.addf %30, %35 : vector<72x128xf32>
    %c0_42 = arith.constant 0 : index
    %c0_43 = arith.constant 0 : index
    %c9 = arith.constant 9 : index
    %c0_44 = arith.constant 0 : index
    %37 = vector.load %arg1[%c0_42, %c0_43, %c9, %c0_44] : memref<1x4x90x3xbf16, #tpu.memory_space<vmem>>, vector<1x1x72x3xbf16>
    %38 = vector.shape_cast %37 : vector<1x1x72x3xbf16> to vector<72x3xbf16>
    %c6 = arith.constant 6 : index
    %c0_45 = arith.constant 0 : index
    %c0_46 = arith.constant 0 : index
    %39 = vector.load %arg2[%c6, %c0_45, %c0_46] : memref<9x3x128xbf16, #tpu.memory_space<vmem>>, vector<1x3x128xbf16>
    %40 = vector.shape_cast %39 : vector<1x3x128xbf16> to vector<3x128xbf16>
    %cst_47 = arith.constant dense<0.000000e+00> : vector<72x128xf32>
    %41 = tpu.matmul %38, %40, %cst_47 {dimension_numbers = #tpu.dot_dimension_numbers<[1], [0], [0], [1], [0, 0, 1, 1], [], []>} : vector<72x3xbf16>, vector<3x128xbf16>, vector<72x128xf32> -> vector<72x128xf32>
    %42 = arith.addf %36, %41 : vector<72x128xf32>
    %c0_48 = arith.constant 0 : index
    %c1_49 = arith.constant 1 : index
    %c9_50 = arith.constant 9 : index
    %c0_51 = arith.constant 0 : index
    %43 = vector.load %arg1[%c0_48, %c1_49, %c9_50, %c0_51] : memref<1x4x90x3xbf16, #tpu.memory_space<vmem>>, vector<1x1x72x3xbf16>
    %44 = vector.shape_cast %43 : vector<1x1x72x3xbf16> to vector<72x3xbf16>
    %c7 = arith.constant 7 : index
    %c0_52 = arith.constant 0 : index
    %c0_53 = arith.constant 0 : index
    %45 = vector.load %arg2[%c7, %c0_52, %c0_53] : memref<9x3x128xbf16, #tpu.memory_space<vmem>>, vector<1x3x128xbf16>
    %46 = vector.shape_cast %45 : vector<1x3x128xbf16> to vector<3x128xbf16>
    %cst_54 = arith.constant dense<0.000000e+00> : vector<72x128xf32>
    %47 = tpu.matmul %44, %46, %cst_54 {dimension_numbers = #tpu.dot_dimension_numbers<[1], [0], [0], [1], [0, 0, 1, 1], [], []>} : vector<72x3xbf16>, vector<3x128xbf16>, vector<72x128xf32> -> vector<72x128xf32>
    %48 = arith.addf %42, %47 : vector<72x128xf32>
    %c0_55 = arith.constant 0 : index
    %c0_56 = arith.constant 0 : index
    %c10 = arith.constant 10 : index
    %c0_57 = arith.constant 0 : index
    %49 = vector.load %arg1[%c0_55, %c0_56, %c10, %c0_57] : memref<1x4x90x3xbf16, #tpu.memory_space<vmem>>, vector<1x1x72x3xbf16>
    %50 = vector.shape_cast %49 : vector<1x1x72x3xbf16> to vector<72x3xbf16>
    %c8 = arith.constant 8 : index
    %c0_58 = arith.constant 0 : index
    %c0_59 = arith.constant 0 : index
    %51 = vector.load %arg2[%c8, %c0_58, %c0_59] : memref<9x3x128xbf16, #tpu.memory_space<vmem>>, vector<1x3x128xbf16>
    %52 = vector.shape_cast %51 : vector<1x3x128xbf16> to vector<3x128xbf16>
    %cst_60 = arith.constant dense<0.000000e+00> : vector<72x128xf32>
    %53 = tpu.matmul %50, %52, %cst_60 {dimension_numbers = #tpu.dot_dimension_numbers<[1], [0], [0], [1], [0, 0, 1, 1], [], []>} : vector<72x3xbf16>, vector<3x128xbf16>, vector<72x128xf32> -> vector<72x128xf32>
    %54 = arith.addf %48, %53 : vector<72x128xf32>
    %c0_61 = arith.constant 0 : index
    %c0_62 = arith.constant 0 : index
    %55 = vector.load %arg3[%c0_61, %c0_62] : memref<1x128xf32, #tpu.memory_space<vmem>>, vector<1x128xf32>
    %56 = vector.broadcast %55 : vector<1x128xf32> to vector<72x128xf32>
    %57 = arith.addf %54, %56 : vector<72x128xf32>
    %cst_63 = arith.constant 0.000000e+00 : f32
    %58 = vector.broadcast %cst_63 : f32 to vector<72x128xf32>
    %59 = arith.maximumf %57, %58 : vector<72x128xf32>
    %60 = arith.truncf %59 : vector<72x128xf32> to vector<72x128xbf16>
    %61 = arith.extf %60 : vector<72x128xbf16> to vector<72x128xf32>
    %cst_64 = arith.constant 0.000000e+00 : f32
    %62 = vector.broadcast %cst_64 : f32 to vector<112x128xf32>
    %c0_65 = arith.constant 0 : index
    %c0_66 = arith.constant 0 : index
    %63 = vector.load %arg9[%c0_65, %c0_66] : memref<112x128xf32, #tpu.memory_space<vmem>>, vector<112x128xf32>
    tpu.vector_store %arg9[%c0_65, %c0_66], %62 {strides = array<i32>} : memref<112x128xf32, #tpu.memory_space<vmem>>, vector<112x128xf32>,
    %64 = vector.extract_strided_slice %61 {offsets = [0, 0], sizes = [8, 128], strides = [1, 1]} : vector<72x128xf32> to vector<8x128xf32>
    %c11 = arith.constant 11 : index
    %c0_67 = arith.constant 0 : index
    %65 = vector.load %arg9[%c11, %c0_67] : memref<112x128xf32, #tpu.memory_space<vmem>>, vector<8x128xf32>
    tpu.vector_store %arg9[%c11, %c0_67], %64 {strides = array<i32>} : memref<112x128xf32, #tpu.memory_space<vmem>>, vector<8x128xf32>,
    %66 = vector.extract_strided_slice %61 {offsets = [9, 0], sizes = [8, 128], strides = [1, 1]} : vector<72x128xf32> to vector<8x128xf32>
    %c21 = arith.constant 21 : index
    %c0_68 = arith.constant 0 : index
    %67 = vector.load %arg9[%c21, %c0_68] : memref<112x128xf32, #tpu.memory_space<vmem>>, vector<8x128xf32>
    tpu.vector_store %arg9[%c21, %c0_68], %66 {strides = array<i32>} : memref<112x128xf32, #tpu.memory_space<vmem>>, vector<8x128xf32>,
    %68 = vector.extract_strided_slice %61 {offsets = [18, 0], sizes = [8, 128], strides = [1, 1]} : vector<72x128xf32> to vector<8x128xf32>
    %c31 = arith.constant 31 : index
    %c0_69 = arith.constant 0 : index
    %69 = vector.load %arg9[%c31, %c0_69] : memref<112x128xf32, #tpu.memory_space<vmem>>, vector<8x128xf32>
    tpu.vector_store %arg9[%c31, %c0_69], %68 {strides = array<i32>} : memref<112x128xf32, #tpu.memory_space<vmem>>, vector<8x128xf32>,
    %70 = vector.extract_strided_slice %61 {offsets = [27, 0], sizes = [8, 128], strides = [1, 1]} : vector<72x128xf32> to vector<8x128xf32>
    %c41 = arith.constant 41 : index
    %c0_70 = arith.constant 0 : index
    %71 = vector.load %arg9[%c41, %c0_70] : memref<112x128xf32, #tpu.memory_space<vmem>>, vector<8x128xf32>
    tpu.vector_store %arg9[%c41, %c0_70], %70 {strides = array<i32>} : memref<112x128xf32, #tpu.memory_space<vmem>>, vector<8x128xf32>,
    %72 = vector.extract_strided_slice %61 {offsets = [36, 0], sizes = [8, 128], strides = [1, 1]} : vector<72x128xf32> to vector<8x128xf32>
    %c51 = arith.constant 51 : index
    %c0_71 = arith.constant 0 : index
    %73 = vector.load %arg9[%c51, %c0_71] : memref<112x128xf32, #tpu.memory_space<vmem>>, vector<8x128xf32>
    tpu.vector_store %arg9[%c51, %c0_71], %72 {strides = array<i32>} : memref<112x128xf32, #tpu.memory_space<vmem>>, vector<8x128xf32>,
    %74 = vector.extract_strided_slice %61 {offsets = [45, 0], sizes = [8, 128], strides = [1, 1]} : vector<72x128xf32> to vector<8x128xf32>
    %c61 = arith.constant 61 : index
    %c0_72 = arith.constant 0 : index
    %75 = vector.load %arg9[%c61, %c0_72] : memref<112x128xf32, #tpu.memory_space<vmem>>, vector<8x128xf32>
    tpu.vector_store %arg9[%c61, %c0_72], %74 {strides = array<i32>} : memref<112x128xf32, #tpu.memory_space<vmem>>, vector<8x128xf32>,
    %76 = vector.extract_strided_slice %61 {offsets = [54, 0], sizes = [8, 128], strides = [1, 1]} : vector<72x128xf32> to vector<8x128xf32>
    %c71 = arith.constant 71 : index
    %c0_73 = arith.constant 0 : index
    %77 = vector.load %arg9[%c71, %c0_73] : memref<112x128xf32, #tpu.memory_space<vmem>>, vector<8x128xf32>
    tpu.vector_store %arg9[%c71, %c0_73], %76 {strides = array<i32>} : memref<112x128xf32, #tpu.memory_space<vmem>>, vector<8x128xf32>,
    %78 = vector.extract_strided_slice %61 {offsets = [63, 0], sizes = [8, 128], strides = [1, 1]} : vector<72x128xf32> to vector<8x128xf32>
    %c81 = arith.constant 81 : index
    %c0_74 = arith.constant 0 : index
    %79 = vector.load %arg9[%c81, %c0_74] : memref<112x128xf32, #tpu.memory_space<vmem>>, vector<8x128xf32>
    tpu.vector_store %arg9[%c81, %c0_74], %78 {strides = array<i32>} : memref<112x128xf32, #tpu.memory_space<vmem>>, vector<8x128xf32>,
    %cst_75 = arith.constant 0.000000e+00 : f32
    %80 = vector.broadcast %cst_75 : f32 to vector<80x128xf32>
    %c0_76 = arith.constant 0 : index
    %c0_77 = arith.constant 0 : index
    %81 = vector.load %arg9[%c0_76, %c0_77] : memref<112x128xf32, #tpu.memory_space<vmem>>, vector<80x128xf32>
    %82 = arith.truncf %81 : vector<80x128xf32> to vector<80x128xbf16>
    %c0_78 = arith.constant 0 : index
    %c0_79 = arith.constant 0 : index
    %c0_80 = arith.constant 0 : index
    %83 = vector.load %arg4[%c0_78, %c0_79, %c0_80] : memref<9x128x128xbf16, #tpu.memory_space<vmem>>, vector<1x128x128xbf16>
    %84 = vector.shape_cast %83 : vector<1x128x128xbf16> to vector<128x128xbf16>
    %cst_81 = arith.constant dense<0.000000e+00> : vector<80x128xf32>
    %85 = tpu.matmul %82, %84, %cst_81 {dimension_numbers = #tpu.dot_dimension_numbers<[1], [0], [0], [1], [0, 0, 1, 1], [], []>} : vector<80x128xbf16>, vector<128x128xbf16>, vector<80x128xf32> -> vector<80x128xf32>
    %86 = arith.addf %80, %85 : vector<80x128xf32>
    %c1_82 = arith.constant 1 : index
    %c0_83 = arith.constant 0 : index
    %87 = vector.load %arg9[%c1_82, %c0_83] : memref<112x128xf32, #tpu.memory_space<vmem>>, vector<80x128xf32>
    %88 = arith.truncf %87 : vector<80x128xf32> to vector<80x128xbf16>
    %c1_84 = arith.constant 1 : index
    %c0_85 = arith.constant 0 : index
    %c0_86 = arith.constant 0 : index
    %89 = vector.load %arg4[%c1_84, %c0_85, %c0_86] : memref<9x128x128xbf16, #tpu.memory_space<vmem>>, vector<1x128x128xbf16>
    %90 = vector.shape_cast %89 : vector<1x128x128xbf16> to vector<128x128xbf16>
    %cst_87 = arith.constant dense<0.000000e+00> : vector<80x128xf32>
    %91 = tpu.matmul %88, %90, %cst_87 {dimension_numbers = #tpu.dot_dimension_numbers<[1], [0], [0], [1], [0, 0, 1, 1], [], []>} : vector<80x128xbf16>, vector<128x128xbf16>, vector<80x128xf32> -> vector<80x128xf32>
    %92 = arith.addf %86, %91 : vector<80x128xf32>
    %c2_88 = arith.constant 2 : index
    %c0_89 = arith.constant 0 : index
    %93 = vector.load %arg9[%c2_88, %c0_89] : memref<112x128xf32, #tpu.memory_space<vmem>>, vector<80x128xf32>
    %94 = arith.truncf %93 : vector<80x128xf32> to vector<80x128xbf16>
    %c2_90 = arith.constant 2 : index
    %c0_91 = arith.constant 0 : index
    %c0_92 = arith.constant 0 : index
    %95 = vector.load %arg4[%c2_90, %c0_91, %c0_92] : memref<9x128x128xbf16, #tpu.memory_space<vmem>>, vector<1x128x128xbf16>
    %96 = vector.shape_cast %95 : vector<1x128x128xbf16> to vector<128x128xbf16>
    %cst_93 = arith.constant dense<0.000000e+00> : vector<80x128xf32>
    %97 = tpu.matmul %94, %96, %cst_93 {dimension_numbers = #tpu.dot_dimension_numbers<[1], [0], [0], [1], [0, 0, 1, 1], [], []>} : vector<80x128xbf16>, vector<128x128xbf16>, vector<80x128xf32> -> vector<80x128xf32>
    %98 = arith.addf %92, %97 : vector<80x128xf32>
    %c10_94 = arith.constant 10 : index
    %c0_95 = arith.constant 0 : index
    %99 = vector.load %arg9[%c10_94, %c0_95] : memref<112x128xf32, #tpu.memory_space<vmem>>, vector<80x128xf32>
    %100 = arith.truncf %99 : vector<80x128xf32> to vector<80x128xbf16>
    %c3_96 = arith.constant 3 : index
    %c0_97 = arith.constant 0 : index
    %c0_98 = arith.constant 0 : index
    %101 = vector.load %arg4[%c3_96, %c0_97, %c0_98] : memref<9x128x128xbf16, #tpu.memory_space<vmem>>, vector<1x128x128xbf16>
    %102 = vector.shape_cast %101 : vector<1x128x128xbf16> to vector<128x128xbf16>
    %cst_99 = arith.constant dense<0.000000e+00> : vector<80x128xf32>
    %103 = tpu.matmul %100, %102, %cst_99 {dimension_numbers = #tpu.dot_dimension_numbers<[1], [0], [0], [1], [0, 0, 1, 1], [], []>} : vector<80x128xbf16>, vector<128x128xbf16>, vector<80x128xf32> -> vector<80x128xf32>
    %104 = arith.addf %98, %103 : vector<80x128xf32>
    %c11_100 = arith.constant 11 : index
    %c0_101 = arith.constant 0 : index
    %105 = vector.load %arg9[%c11_100, %c0_101] : memref<112x128xf32, #tpu.memory_space<vmem>>, vector<80x128xf32>
    %106 = arith.truncf %105 : vector<80x128xf32> to vector<80x128xbf16>
    %c4_102 = arith.constant 4 : index
    %c0_103 = arith.constant 0 : index
    %c0_104 = arith.constant 0 : index
    %107 = vector.load %arg4[%c4_102, %c0_103, %c0_104] : memref<9x128x128xbf16, #tpu.memory_space<vmem>>, vector<1x128x128xbf16>
    %108 = vector.shape_cast %107 : vector<1x128x128xbf16> to vector<128x128xbf16>
    %cst_105 = arith.constant dense<0.000000e+00> : vector<80x128xf32>
    %109 = tpu.matmul %106, %108, %cst_105 {dimension_numbers = #tpu.dot_dimension_numbers<[1], [0], [0], [1], [0, 0, 1, 1], [], []>} : vector<80x128xbf16>, vector<128x128xbf16>, vector<80x128xf32> -> vector<80x128xf32>
    %110 = arith.addf %104, %109 : vector<80x128xf32>
    %c12 = arith.constant 12 : index
    %c0_106 = arith.constant 0 : index
    %111 = vector.load %arg9[%c12, %c0_106] : memref<112x128xf32, #tpu.memory_space<vmem>>, vector<80x128xf32>
    %112 = arith.truncf %111 : vector<80x128xf32> to vector<80x128xbf16>
    %c5_107 = arith.constant 5 : index
    %c0_108 = arith.constant 0 : index
    %c0_109 = arith.constant 0 : index
    %113 = vector.load %arg4[%c5_107, %c0_108, %c0_109] : memref<9x128x128xbf16, #tpu.memory_space<vmem>>, vector<1x128x128xbf16>
    %114 = vector.shape_cast %113 : vector<1x128x128xbf16> to vector<128x128xbf16>
    %cst_110 = arith.constant dense<0.000000e+00> : vector<80x128xf32>
    %115 = tpu.matmul %112, %114, %cst_110 {dimension_numbers = #tpu.dot_dimension_numbers<[1], [0], [0], [1], [0, 0, 1, 1], [], []>} : vector<80x128xbf16>, vector<128x128xbf16>, vector<80x128xf32> -> vector<80x128xf32>
    %116 = arith.addf %110, %115 : vector<80x128xf32>
    %c20 = arith.constant 20 : index
    %c0_111 = arith.constant 0 : index
    %117 = vector.load %arg9[%c20, %c0_111] : memref<112x128xf32, #tpu.memory_space<vmem>>, vector<80x128xf32>
    %118 = arith.truncf %117 : vector<80x128xf32> to vector<80x128xbf16>
    %c6_112 = arith.constant 6 : index
    %c0_113 = arith.constant 0 : index
    %c0_114 = arith.constant 0 : index
    %119 = vector.load %arg4[%c6_112, %c0_113, %c0_114] : memref<9x128x128xbf16, #tpu.memory_space<vmem>>, vector<1x128x128xbf16>
    %120 = vector.shape_cast %119 : vector<1x128x128xbf16> to vector<128x128xbf16>
    %cst_115 = arith.constant dense<0.000000e+00> : vector<80x128xf32>
    %121 = tpu.matmul %118, %120, %cst_115 {dimension_numbers = #tpu.dot_dimension_numbers<[1], [0], [0], [1], [0, 0, 1, 1], [], []>} : vector<80x128xbf16>, vector<128x128xbf16>, vector<80x128xf32> -> vector<80x128xf32>
    %122 = arith.addf %116, %121 : vector<80x128xf32>
    %c21_116 = arith.constant 21 : index
    %c0_117 = arith.constant 0 : index
    %123 = vector.load %arg9[%c21_116, %c0_117] : memref<112x128xf32, #tpu.memory_space<vmem>>, vector<80x128xf32>
    %124 = arith.truncf %123 : vector<80x128xf32> to vector<80x128xbf16>
    %c7_118 = arith.constant 7 : index
    %c0_119 = arith.constant 0 : index
    %c0_120 = arith.constant 0 : index
    %125 = vector.load %arg4[%c7_118, %c0_119, %c0_120] : memref<9x128x128xbf16, #tpu.memory_space<vmem>>, vector<1x128x128xbf16>
    %126 = vector.shape_cast %125 : vector<1x128x128xbf16> to vector<128x128xbf16>
    %cst_121 = arith.constant dense<0.000000e+00> : vector<80x128xf32>
    %127 = tpu.matmul %124, %126, %cst_121 {dimension_numbers = #tpu.dot_dimension_numbers<[1], [0], [0], [1], [0, 0, 1, 1], [], []>} : vector<80x128xbf16>, vector<128x128xbf16>, vector<80x128xf32> -> vector<80x128xf32>
    %128 = arith.addf %122, %127 : vector<80x128xf32>
    %c22 = arith.constant 22 : index
    %c0_122 = arith.constant 0 : index
    %129 = vector.load %arg9[%c22, %c0_122] : memref<112x128xf32, #tpu.memory_space<vmem>>, vector<80x128xf32>
    %130 = arith.truncf %129 : vector<80x128xf32> to vector<80x128xbf16>
    %c8_123 = arith.constant 8 : index
    %c0_124 = arith.constant 0 : index
    %c0_125 = arith.constant 0 : index
    %131 = vector.load %arg4[%c8_123, %c0_124, %c0_125] : memref<9x128x128xbf16, #tpu.memory_space<vmem>>, vector<1x128x128xbf16>
    %132 = vector.shape_cast %131 : vector<1x128x128xbf16> to vector<128x128xbf16>
    %cst_126 = arith.constant dense<0.000000e+00> : vector<80x128xf32>
    %133 = tpu.matmul %130, %132, %cst_126 {dimension_numbers = #tpu.dot_dimension_numbers<[1], [0], [0], [1], [0, 0, 1, 1], [], []>} : vector<80x128xbf16>, vector<128x128xbf16>, vector<80x128xf32> -> vector<80x128xf32>
    %134 = arith.addf %128, %133 : vector<80x128xf32>
    %c0_127 = arith.constant 0 : index
    %c0_128 = arith.constant 0 : index
    %135 = vector.load %arg5[%c0_127, %c0_128] : memref<1x128xf32, #tpu.memory_space<vmem>>, vector<1x128xf32>
    %136 = vector.broadcast %135 : vector<1x128xf32> to vector<80x128xf32>
    %137 = arith.addf %134, %136 : vector<80x128xf32>
    %cst_129 = arith.constant 0.000000e+00 : f32
    %138 = vector.broadcast %cst_129 : f32 to vector<80x128xf32>
    %139 = arith.maximumf %137, %138 : vector<80x128xf32>
    %140 = arith.truncf %139 : vector<80x128xf32> to vector<80x128xbf16>
    %141 = arith.extf %140 : vector<80x128xbf16> to vector<80x128xf32>
    %cst_130 = arith.constant 0.000000e+00 : f32
    %142 = vector.broadcast %cst_130 : f32 to vector<112x128xf32>
    %c0_131 = arith.constant 0 : index
    %c0_132 = arith.constant 0 : index
    %143 = vector.load %arg10[%c0_131, %c0_132] : memref<112x128xf32, #tpu.memory_space<vmem>>, vector<112x128xf32>
    tpu.vector_store %arg10[%c0_131, %c0_132], %142 {strides = array<i32>} : memref<112x128xf32, #tpu.memory_space<vmem>>, vector<112x128xf32>,
    %144 = vector.extract_strided_slice %141 {offsets = [0, 0], sizes = [8, 128], strides = [1, 1]} : vector<80x128xf32> to vector<8x128xf32>
    %c11_133 = arith.constant 11 : index
    %c0_134 = arith.constant 0 : index
    %145 = vector.load %arg10[%c11_133, %c0_134] : memref<112x128xf32, #tpu.memory_space<vmem>>, vector<8x128xf32>
    tpu.vector_store %arg10[%c11_133, %c0_134], %144 {strides = array<i32>} : memref<112x128xf32, #tpu.memory_space<vmem>>, vector<8x128xf32>,
    %146 = vector.extract_strided_slice %141 {offsets = [10, 0], sizes = [8, 128], strides = [1, 1]} : vector<80x128xf32> to vector<8x128xf32>
    %c21_135 = arith.constant 21 : index
    %c0_136 = arith.constant 0 : index
    %147 = vector.load %arg10[%c21_135, %c0_136] : memref<112x128xf32, #tpu.memory_space<vmem>>, vector<8x128xf32>
    tpu.vector_store %arg10[%c21_135, %c0_136], %146 {strides = array<i32>} : memref<112x128xf32, #tpu.memory_space<vmem>>, vector<8x128xf32>,
    %148 = vector.extract_strided_slice %141 {offsets = [20, 0], sizes = [8, 128], strides = [1, 1]} : vector<80x128xf32> to vector<8x128xf32>
    %c31_137 = arith.constant 31 : index
    %c0_138 = arith.constant 0 : index
    %149 = vector.load %arg10[%c31_137, %c0_138] : memref<112x128xf32, #tpu.memory_space<vmem>>, vector<8x128xf32>
    tpu.vector_store %arg10[%c31_137, %c0_138], %148 {strides = array<i32>} : memref<112x128xf32, #tpu.memory_space<vmem>>, vector<8x128xf32>,
    %150 = vector.extract_strided_slice %141 {offsets = [30, 0], sizes = [8, 128], strides = [1, 1]} : vector<80x128xf32> to vector<8x128xf32>
    %c41_139 = arith.constant 41 : index
    %c0_140 = arith.constant 0 : index
    %151 = vector.load %arg10[%c41_139, %c0_140] : memref<112x128xf32, #tpu.memory_space<vmem>>, vector<8x128xf32>
    tpu.vector_store %arg10[%c41_139, %c0_140], %150 {strides = array<i32>} : memref<112x128xf32, #tpu.memory_space<vmem>>, vector<8x128xf32>,
    %152 = vector.extract_strided_slice %141 {offsets = [40, 0], sizes = [8, 128], strides = [1, 1]} : vector<80x128xf32> to vector<8x128xf32>
    %c51_141 = arith.constant 51 : index
    %c0_142 = arith.constant 0 : index
    %153 = vector.load %arg10[%c51_141, %c0_142] : memref<112x128xf32, #tpu.memory_space<vmem>>, vector<8x128xf32>
    tpu.vector_store %arg10[%c51_141, %c0_142], %152 {strides = array<i32>} : memref<112x128xf32, #tpu.memory_space<vmem>>, vector<8x128xf32>,
    %154 = vector.extract_strided_slice %141 {offsets = [50, 0], sizes = [8, 128], strides = [1, 1]} : vector<80x128xf32> to vector<8x128xf32>
    %c61_143 = arith.constant 61 : index
    %c0_144 = arith.constant 0 : index
    %155 = vector.load %arg10[%c61_143, %c0_144] : memref<112x128xf32, #tpu.memory_space<vmem>>, vector<8x128xf32>
    tpu.vector_store %arg10[%c61_143, %c0_144], %154 {strides = array<i32>} : memref<112x128xf32, #tpu.memory_space<vmem>>, vector<8x128xf32>,
    %156 = vector.extract_strided_slice %141 {offsets = [60, 0], sizes = [8, 128], strides = [1, 1]} : vector<80x128xf32> to vector<8x128xf32>
    %c71_145 = arith.constant 71 : index
    %c0_146 = arith.constant 0 : index
    %157 = vector.load %arg10[%c71_145, %c0_146] : memref<112x128xf32, #tpu.memory_space<vmem>>, vector<8x128xf32>
    tpu.vector_store %arg10[%c71_145, %c0_146], %156 {strides = array<i32>} : memref<112x128xf32, #tpu.memory_space<vmem>>, vector<8x128xf32>,
    %158 = vector.extract_strided_slice %141 {offsets = [70, 0], sizes = [8, 128], strides = [1, 1]} : vector<80x128xf32> to vector<8x128xf32>
    %c81_147 = arith.constant 81 : index
    %c0_148 = arith.constant 0 : index
    %159 = vector.load %arg10[%c81_147, %c0_148] : memref<112x128xf32, #tpu.memory_space<vmem>>, vector<8x128xf32>
    tpu.vector_store %arg10[%c81_147, %c0_148], %158 {strides = array<i32>} : memref<112x128xf32, #tpu.memory_space<vmem>>, vector<8x128xf32>,
    %cst_149 = arith.constant 0.000000e+00 : f32
    %160 = vector.broadcast %cst_149 : f32 to vector<80x128xf32>
    %c0_150 = arith.constant 0 : index
    %c0_151 = arith.constant 0 : index
    %161 = vector.load %arg10[%c0_150, %c0_151] : memref<112x128xf32, #tpu.memory_space<vmem>>, vector<80x128xf32>
    %162 = arith.truncf %161 : vector<80x128xf32> to vector<80x128xbf16>
    %c0_152 = arith.constant 0 : index
    %c0_153 = arith.constant 0 : index
    %c0_154 = arith.constant 0 : index
    %163 = vector.load %arg6[%c0_152, %c0_153, %c0_154] : memref<9x128x128xbf16, #tpu.memory_space<vmem>>, vector<1x128x128xbf16>
    %164 = vector.shape_cast %163 : vector<1x128x128xbf16> to vector<128x128xbf16>
    %cst_155 = arith.constant dense<0.000000e+00> : vector<80x128xf32>
    %165 = tpu.matmul %162, %164, %cst_155 {dimension_numbers = #tpu.dot_dimension_numbers<[1], [0], [0], [1], [0, 0, 1, 1], [], []>} : vector<80x128xbf16>, vector<128x128xbf16>, vector<80x128xf32> -> vector<80x128xf32>
    %166 = arith.addf %160, %165 : vector<80x128xf32>
    %c1_156 = arith.constant 1 : index
    %c0_157 = arith.constant 0 : index
    %167 = vector.load %arg10[%c1_156, %c0_157] : memref<112x128xf32, #tpu.memory_space<vmem>>, vector<80x128xf32>
    %168 = arith.truncf %167 : vector<80x128xf32> to vector<80x128xbf16>
    %c1_158 = arith.constant 1 : index
    %c0_159 = arith.constant 0 : index
    %c0_160 = arith.constant 0 : index
    %169 = vector.load %arg6[%c1_158, %c0_159, %c0_160] : memref<9x128x128xbf16, #tpu.memory_space<vmem>>, vector<1x128x128xbf16>
    %170 = vector.shape_cast %169 : vector<1x128x128xbf16> to vector<128x128xbf16>
    %cst_161 = arith.constant dense<0.000000e+00> : vector<80x128xf32>
    %171 = tpu.matmul %168, %170, %cst_161 {dimension_numbers = #tpu.dot_dimension_numbers<[1], [0], [0], [1], [0, 0, 1, 1], [], []>} : vector<80x128xbf16>, vector<128x128xbf16>, vector<80x128xf32> -> vector<80x128xf32>
    %172 = arith.addf %166, %171 : vector<80x128xf32>
    %c2_162 = arith.constant 2 : index
    %c0_163 = arith.constant 0 : index
    %173 = vector.load %arg10[%c2_162, %c0_163] : memref<112x128xf32, #tpu.memory_space<vmem>>, vector<80x128xf32>
    %174 = arith.truncf %173 : vector<80x128xf32> to vector<80x128xbf16>
    %c2_164 = arith.constant 2 : index
    %c0_165 = arith.constant 0 : index
    %c0_166 = arith.constant 0 : index
    %175 = vector.load %arg6[%c2_164, %c0_165, %c0_166] : memref<9x128x128xbf16, #tpu.memory_space<vmem>>, vector<1x128x128xbf16>
    %176 = vector.shape_cast %175 : vector<1x128x128xbf16> to vector<128x128xbf16>
    %cst_167 = arith.constant dense<0.000000e+00> : vector<80x128xf32>
    %177 = tpu.matmul %174, %176, %cst_167 {dimension_numbers = #tpu.dot_dimension_numbers<[1], [0], [0], [1], [0, 0, 1, 1], [], []>} : vector<80x128xbf16>, vector<128x128xbf16>, vector<80x128xf32> -> vector<80x128xf32>
    %178 = arith.addf %172, %177 : vector<80x128xf32>
    %c10_168 = arith.constant 10 : index
    %c0_169 = arith.constant 0 : index
    %179 = vector.load %arg10[%c10_168, %c0_169] : memref<112x128xf32, #tpu.memory_space<vmem>>, vector<80x128xf32>
    %180 = arith.truncf %179 : vector<80x128xf32> to vector<80x128xbf16>
    %c3_170 = arith.constant 3 : index
    %c0_171 = arith.constant 0 : index
    %c0_172 = arith.constant 0 : index
    %181 = vector.load %arg6[%c3_170, %c0_171, %c0_172] : memref<9x128x128xbf16, #tpu.memory_space<vmem>>, vector<1x128x128xbf16>
    %182 = vector.shape_cast %181 : vector<1x128x128xbf16> to vector<128x128xbf16>
    %cst_173 = arith.constant dense<0.000000e+00> : vector<80x128xf32>
    %183 = tpu.matmul %180, %182, %cst_173 {dimension_numbers = #tpu.dot_dimension_numbers<[1], [0], [0], [1], [0, 0, 1, 1], [], []>} : vector<80x128xbf16>, vector<128x128xbf16>, vector<80x128xf32> -> vector<80x128xf32>
    %184 = arith.addf %178, %183 : vector<80x128xf32>
    %c11_174 = arith.constant 11 : index
    %c0_175 = arith.constant 0 : index
    %185 = vector.load %arg10[%c11_174, %c0_175] : memref<112x128xf32, #tpu.memory_space<vmem>>, vector<80x128xf32>
    %186 = arith.truncf %185 : vector<80x128xf32> to vector<80x128xbf16>
    %c4_176 = arith.constant 4 : index
    %c0_177 = arith.constant 0 : index
    %c0_178 = arith.constant 0 : index
    %187 = vector.load %arg6[%c4_176, %c0_177, %c0_178] : memref<9x128x128xbf16, #tpu.memory_space<vmem>>, vector<1x128x128xbf16>
    %188 = vector.shape_cast %187 : vector<1x128x128xbf16> to vector<128x128xbf16>
    %cst_179 = arith.constant dense<0.000000e+00> : vector<80x128xf32>
    %189 = tpu.matmul %186, %188, %cst_179 {dimension_numbers = #tpu.dot_dimension_numbers<[1], [0], [0], [1], [0, 0, 1, 1], [], []>} : vector<80x128xbf16>, vector<128x128xbf16>, vector<80x128xf32> -> vector<80x128xf32>
    %190 = arith.addf %184, %189 : vector<80x128xf32>
    %c12_180 = arith.constant 12 : index
    %c0_181 = arith.constant 0 : index
    %191 = vector.load %arg10[%c12_180, %c0_181] : memref<112x128xf32, #tpu.memory_space<vmem>>, vector<80x128xf32>
    %192 = arith.truncf %191 : vector<80x128xf32> to vector<80x128xbf16>
    %c5_182 = arith.constant 5 : index
    %c0_183 = arith.constant 0 : index
    %c0_184 = arith.constant 0 : index
    %193 = vector.load %arg6[%c5_182, %c0_183, %c0_184] : memref<9x128x128xbf16, #tpu.memory_space<vmem>>, vector<1x128x128xbf16>
    %194 = vector.shape_cast %193 : vector<1x128x128xbf16> to vector<128x128xbf16>
    %cst_185 = arith.constant dense<0.000000e+00> : vector<80x128xf32>
    %195 = tpu.matmul %192, %194, %cst_185 {dimension_numbers = #tpu.dot_dimension_numbers<[1], [0], [0], [1], [0, 0, 1, 1], [], []>} : vector<80x128xbf16>, vector<128x128xbf16>, vector<80x128xf32> -> vector<80x128xf32>
    %196 = arith.addf %190, %195 : vector<80x128xf32>
    %c20_186 = arith.constant 20 : index
    %c0_187 = arith.constant 0 : index
    %197 = vector.load %arg10[%c20_186, %c0_187] : memref<112x128xf32, #tpu.memory_space<vmem>>, vector<80x128xf32>
    %198 = arith.truncf %197 : vector<80x128xf32> to vector<80x128xbf16>
    %c6_188 = arith.constant 6 : index
    %c0_189 = arith.constant 0 : index
    %c0_190 = arith.constant 0 : index
    %199 = vector.load %arg6[%c6_188, %c0_189, %c0_190] : memref<9x128x128xbf16, #tpu.memory_space<vmem>>, vector<1x128x128xbf16>
    %200 = vector.shape_cast %199 : vector<1x128x128xbf16> to vector<128x128xbf16>
    %cst_191 = arith.constant dense<0.000000e+00> : vector<80x128xf32>
    %201 = tpu.matmul %198, %200, %cst_191 {dimension_numbers = #tpu.dot_dimension_numbers<[1], [0], [0], [1], [0, 0, 1, 1], [], []>} : vector<80x128xbf16>, vector<128x128xbf16>, vector<80x128xf32> -> vector<80x128xf32>
    %202 = arith.addf %196, %201 : vector<80x128xf32>
    %c21_192 = arith.constant 21 : index
    %c0_193 = arith.constant 0 : index
    %203 = vector.load %arg10[%c21_192, %c0_193] : memref<112x128xf32, #tpu.memory_space<vmem>>, vector<80x128xf32>
    %204 = arith.truncf %203 : vector<80x128xf32> to vector<80x128xbf16>
    %c7_194 = arith.constant 7 : index
    %c0_195 = arith.constant 0 : index
    %c0_196 = arith.constant 0 : index
    %205 = vector.load %arg6[%c7_194, %c0_195, %c0_196] : memref<9x128x128xbf16, #tpu.memory_space<vmem>>, vector<1x128x128xbf16>
    %206 = vector.shape_cast %205 : vector<1x128x128xbf16> to vector<128x128xbf16>
    %cst_197 = arith.constant dense<0.000000e+00> : vector<80x128xf32>
    %207 = tpu.matmul %204, %206, %cst_197 {dimension_numbers = #tpu.dot_dimension_numbers<[1], [0], [0], [1], [0, 0, 1, 1], [], []>} : vector<80x128xbf16>, vector<128x128xbf16>, vector<80x128xf32> -> vector<80x128xf32>
    %208 = arith.addf %202, %207 : vector<80x128xf32>
    %c22_198 = arith.constant 22 : index
    %c0_199 = arith.constant 0 : index
    %209 = vector.load %arg10[%c22_198, %c0_199] : memref<112x128xf32, #tpu.memory_space<vmem>>, vector<80x128xf32>
    %210 = arith.truncf %209 : vector<80x128xf32> to vector<80x128xbf16>
    %c8_200 = arith.constant 8 : index
    %c0_201 = arith.constant 0 : index
    %c0_202 = arith.constant 0 : index
    %211 = vector.load %arg6[%c8_200, %c0_201, %c0_202] : memref<9x128x128xbf16, #tpu.memory_space<vmem>>, vector<1x128x128xbf16>
    %212 = vector.shape_cast %211 : vector<1x128x128xbf16> to vector<128x128xbf16>
    %cst_203 = arith.constant dense<0.000000e+00> : vector<80x128xf32>
    %213 = tpu.matmul %210, %212, %cst_203 {dimension_numbers = #tpu.dot_dimension_numbers<[1], [0], [0], [1], [0, 0, 1, 1], [], []>} : vector<80x128xbf16>, vector<128x128xbf16>, vector<80x128xf32> -> vector<80x128xf32>
    %214 = arith.addf %208, %213 : vector<80x128xf32>
    %c0_204 = arith.constant 0 : index
    %c0_205 = arith.constant 0 : index
    %215 = vector.load %arg7[%c0_204, %c0_205] : memref<1x128xf32, #tpu.memory_space<vmem>>, vector<1x128xf32>
    %216 = vector.broadcast %215 : vector<1x128xf32> to vector<80x128xf32>
    %217 = arith.addf %214, %216 : vector<80x128xf32>
    %cst_206 = arith.constant 0.000000e+00 : f32
    %218 = vector.broadcast %cst_206 : f32 to vector<80x128xf32>
    %219 = arith.maximumf %217, %218 : vector<80x128xf32>
    %220 = arith.truncf %219 : vector<80x128xf32> to vector<80x128xbf16>
    %c0_207 = arith.constant 0 : index
    %c0_208 = arith.constant 0 : index
    %c0_209 = arith.constant 0 : index
    %221 = vector.load %arg8[%c0_207, %c0_208, %c0_209] : memref<1x80x128xbf16, #tpu.memory_space<vmem>>, vector<1x80x128xbf16>
    %222 = vector.shape_cast %221 : vector<1x80x128xbf16> to vector<80x128xbf16>
    %223 = vector.shape_cast %220 : vector<80x128xbf16> to vector<1x80x128xbf16>
    tpu.vector_store %arg8[%c0_207, %c0_208, %c0_209], %223 {strides = array<i32>} : memref<1x80x128xbf16, #tpu.memory_space<vmem>>, vector<1x80x128xbf16>,
    return
  }
  func.func @transform_0(%arg0: i32) -> (i32, i32, i32, i32) {
    %c0_i32 = arith.constant 0 : i32
    %c0_i32_0 = arith.constant 0 : i32
    %c0_i32_1 = arith.constant 0 : i32
    %c0_i32_2 = arith.constant 0 : i32
    return %arg0, %c0_i32, %c0_i32_0, %c0_i32_1 : i32, i32, i32, i32
  }
  func.func @transform_1(%arg0: i32) -> (i32, i32, i32) {
    %c0_i32 = arith.constant 0 : i32
    %c0_i32_0 = arith.constant 0 : i32
    %c0_i32_1 = arith.constant 0 : i32
    %c0_i32_2 = arith.constant 0 : i32
    return %c0_i32, %c0_i32_0, %c0_i32_1 : i32, i32, i32
  }
  func.func @transform_2(%arg0: i32) -> (i32, i32) {
    %c0_i32 = arith.constant 0 : i32
    %c0_i32_0 = arith.constant 0 : i32
    %c0_i32_1 = arith.constant 0 : i32
    return %c0_i32, %c0_i32_0 : i32, i32
  }
  func.func @transform_3(%arg0: i32) -> (i32, i32, i32) {
    %c0_i32 = arith.constant 0 : i32
    %c0_i32_0 = arith.constant 0 : i32
    %c0_i32_1 = arith.constant 0 : i32
    %c0_i32_2 = arith.constant 0 : i32
    return %c0_i32, %c0_i32_0, %c0_i32_1 : i32, i32, i32
  }
  func.func @transform_4(%arg0: i32) -> (i32, i32) {
    %c0_i32 = arith.constant 0 : i32
    %c0_i32_0 = arith.constant 0 : i32
    %c0_i32_1 = arith.constant 0 : i32
    return %c0_i32, %c0_i32_0 : i32, i32
  }
  func.func @transform_5(%arg0: i32) -> (i32, i32, i32) {
    %c0_i32 = arith.constant 0 : i32
    %c0_i32_0 = arith.constant 0 : i32
    %c0_i32_1 = arith.constant 0 : i32
    %c0_i32_2 = arith.constant 0 : i32
    return %c0_i32, %c0_i32_0, %c0_i32_1 : i32, i32, i32
  }
  func.func @transform_6(%arg0: i32) -> (i32, i32) {
    %c0_i32 = arith.constant 0 : i32
    %c0_i32_0 = arith.constant 0 : i32
    %c0_i32_1 = arith.constant 0 : i32
    return %c0_i32, %c0_i32_0 : i32, i32
  }
  func.func @transform_7(%arg0: i32) -> (i32, i32, i32) {
    %c0_i32 = arith.constant 0 : i32
    %c0_i32_0 = arith.constant 0 : i32
    %c0_i32_1 = arith.constant 0 : i32
    return %arg0, %c0_i32, %c0_i32_0 : i32, i32, i32
  }
}

</mosaic_0001>

<bundles_post_ra>
// kernel: encoder_forward.1
= control target key start
LH: loop header
LB: loop body
LE: loop exit
PB: predicated region body
PF: predicated region fallthrough
CT: control target
= control target key end

     0   :  { %s6769_s24 = smov 0   ;;  %s8296_s0 = inlined_call_operand.vmem [shape: bf16[2,4,90,3], index: 0, kind: input, shape index: {}]   ;;  %s8297_s1 = inlined_call_operand.vmem [shape: bf16[9,3,128], index: 1, kind: input, shape index: {}]   ;;  %s8298_s2 = inlined_call_operand.vmem [shape: f32[1,128], index: 2, kind: input, shape index: {}]   ;;  %s8299_s3 = inlined_call_operand.vmem [shape: bf16[9,128,128], index: 3, kind: input, shape index: {}]   ;;  %s8300_s4 = inlined_call_operand.vmem [shape: f32[1,128], index: 4, kind: input, shape index: {}]   ;;  %s8301_s5 = inlined_call_operand.vmem [shape: bf16[9,128,128], index: 5, kind: input, shape index: {}]   ;;  %s8302_s6 = inlined_call_operand.vmem [shape: f32[1,128], index: 6, kind: input, shape index: {}]   ;;  %s8303_s7 = inlined_call_operand.vmem [shape: bf16[2,80,128], index: 7, kind: output, shape index: {}]  }
   0x1 LB: > { %s4779_s25 = sadd.s32 4294967295, %s6724_s24   ;;  %p4783_p0 = scmp.ge.s32.totalorder %s6724_s24, 1  ;;  %s6724_s24 = sphi %s6769_s24, %s17_s24  }
   0x2   : > { %p237_p1 = scmp.lt.s32.totalorder %s6724_s24, 3 }
   0x4   : > { %p238_p2 = pnand %p4783_p0, %p237_p1 }
   0x5   : > { %p269_p3 = scmp.lt.s32.totalorder (!%p238_p2), %s4779_s25, 1 }
   0x6   : > { %241 = sbr.rel (%p238_p2) target bundleno = 1155 (0x483), region = 48 }
   0xb   : > { %v4795_v0 = vld [vmem:[%s8297_s1 + $0x2] sm:$0x3]  ;;  %vm341_vm0 = vcmask 1040384   ;;  %vm342_vm1 = vcmask 1041408   ;;  %v6726_v1 = vmov 0.0   ;;  %v6727_v2 = vmov 65535  }
   0xc   : > { %5669 = vmatprep.subr.bf16.mxu0 %v6726_v1  ;;  %1656 = vst [vmem:[#allocation2] sm:$0xff] %v6726_v1  ;;  %1657 = vst [vmem:[#allocation2 + $0x8] sm:$0xff] %v6726_v1  ;;  %6515 = vmatprep.subr.bf16.mxu1 %v6726_v1  ;;  %v343_v3 = vsel %vm341_vm0, 4294967295, %v6727_v2  ;;  %vm6728_vm2 = vmmov 0   ;;  %s8305_s25 = smov (!%p269_p3, %s4779_s25), 1  ;;  %vm325_vm3 = vcmask 23552  }
   0xd   : > { %1658 = vst [vmem:[#allocation2 + $0x10] sm:$0xff] %v6726_v1  ;;  %1659 = vst [vmem:[#allocation2 + $0x18] sm:$0xff] %v6726_v1  ;;  %v6812_v4 = vsel %vm342_vm1, %v343_v3, 0  ;;  %5671 = vmatprep.mubr.msk.bf16.mxu0 %vm6728_vm2, %v6726_v1  ;;  %5683 = vmatprep.mubr.msk.bf16.mxu1 %vm6728_vm2, %v6726_v1  ;;  %v4816_v6 = vld [vmem:[%s8297_s1 + $0x4] sm:$0x3]  ;;  %s6517_s30 = smul.u32 192, %s8305_s25 }
   0xe   : > { %1660 = vst [vmem:[#allocation2 + $0x20] sm:$0xff] %v6726_v1  ;;  %1661 = vst [vmem:[#allocation2 + $0x28] sm:$0xff] %v6726_v1  ;;  %v346_v5 = vand.u32 %v4795_v0, %v6812_v4  ;;  %v289_v7 = vld [vmem:[%s8297_s1] sm:$0x3]  ;;  %v626_v8 = vand.u32 %v4816_v6, %v6812_v4  ;;  %v4836_v17 = vld [vmem:[%s8297_s1 + $0x6] sm:$0x3] }
   0xf   : > { %1662 = vst [vmem:[#allocation2 + $0x30] sm:$0xff] %v6726_v1  ;;  %1663 = vst [vmem:[#allocation2 + $0x38] sm:$0xff] %v6726_v1  ;;  %s6835_s12 = scalar_lea.vmem %s8296_s0, %s6517_s30  ;;  %v459_v10 = vand.u32 %v6812_v4, %v289_v7  ;;  %v760_v23 = vand.u32 %v4836_v17, %v6812_v4  ;;  %v4856_v25 = vld [vmem:[%s8297_s1 + $0x8] sm:$0x3]  ;;  %vm570_vm4 = vsmask.f32 7424 }
  0x10   : > { %1664 = vst [vmem:[#allocation2 + $0x40] sm:$0xff] %v6726_v1  ;;  %1665 = vst [vmem:[#allocation2 + $0x48] sm:$0xff] %v6726_v1  ;;  %5670 = vmatpush3.bf16.msra.mxu0 %v346_v5  ;;  %6516 = vmatpush3.bf16.msra.mxu1 %v346_v5  ;;  %v6530_v9 = vld [vmem:[%s6835_s12 + $0x30] sm:$0xff]   ;;  %v6531_v11 = vld [vmem:[%s6835_s12 + $0x48] sm:$0xff]   ;;  %v894_v32 = vand.u32 %v4856_v25, %v6812_v4  ;;  %vm1508_vm5 = vcmask 1046528   ;;  %s6518_s27 = smul.u32 40, %s8305_s25 }
  0x11   : > { %1666 = vst [vmem:[#allocation2 + $0x50] sm:$0xff] %v6726_v1  ;;  %1667 = vst [vmem:[#allocation2 + $0x58] sm:$0xff] %v6726_v1  ;;  %5713 = vmatprep.subr.bf16.mxu0 %v6726_v1  ;;  %5691 = vmatprep.subr.bf16.mxu1 %v6726_v1  ;;  %v6532_v12 = vld [vmem:[%s6835_s12 + $0x38] sm:$0xff]   ;;  %v6533_v13 = vld [vmem:[%s6835_s12 + $0x50] ss:$0 sps:$4 sm:$0xff]  }
  0x12   : > { %1668 = vst [vmem:[#allocation2 + $0x60] sm:$0xff] %v6726_v1  ;;  %3173 = vst [vmem:[#allocation3] sm:$0xff] %v6726_v1  ;;  %v6537_v14 = vld [vmem:[%s6835_s12] sm:$0xff]   ;;  %v6538_v15 = vld [vmem:[%s6835_s12 + $0x8] sm:$0xff]   ;;  %s8267_s30 = scalar_lea.vmem %s8303_s7, %s6518_s27 }
  0x13   : > { %3174 = vst [vmem:[#allocation3 + $0x8] sm:$0xff] %v6726_v1  ;;  %3175 = vst [vmem:[#allocation3 + $0x10] sm:$0xff] %v6726_v1  ;;  %5672 = vmatmul.mubr.msk.bf16.vlgmr.msra.gmra.mxu0 %vm325_vm3, %v6530_v9  ;;  %5684 = vmatmul.mubr.msk.bf16.vlgmr.msra.gmra.mxu1 %vm325_vm3, %v6531_v11  ;;  %v574_v16 = vshll.u32 %v6537_v14, 16  ;;  %v6534_v18 = vld [vmem:[%s6835_s12 + $0x40] sm:$0xff]   ;;  %v572_v20 = vshrl.u32 %v6537_v14, 16  ;;  %v579_v22 = vshll.u32 %v6538_v15, 16 }
  0x14   : > { %3176 = vst [vmem:[#allocation3 + $0x18] sm:$0xff] %v6726_v1  ;;  %3177 = vst [vmem:[#allocation3 + $0x20] sm:$0xff] %v6726_v1  ;;  %5714 = vmatpush3.bf16.msra.mxu0 %v626_v8  ;;  %5692 = vmatpush3.bf16.msra.mxu1 %v459_v10  ;;  %v6535_v19 = vld [vmem:[%s6835_s12] sm:$0xff]   ;;  %v6866_v24 = vld [vmem:[%s6835_s12 + $0x10] sm:$0xff]   ;;  %v583_v33 = vshrl.u32 %v6538_v15, 16 }
  0x15   : > { %3178 = vst [vmem:[#allocation3 + $0x28] sm:$0xff] %v6726_v1  ;;  %3179 = vst [vmem:[#allocation3 + $0x30] sm:$0xff] %v6726_v1  ;;  %5675 = vmatprep.mubr.msk.bf16.mxu0 %vm6728_vm2, %v6726_v1  ;;  %5687 = vmatprep.mubr.msk.bf16.mxu1 %vm6728_vm2, %v6726_v1  ;;  %v576_v21 = vrot.slane %v574_v16, 1  ;;  %v581_v27 = vrot.slane %v579_v22, 1  ;;  %v6876_v28 = vld [vmem:[%s6835_s12 + $0x18] sm:$0xff]   ;;  %v6536_v29 = vld [vmem:[%s6835_s12 + $0x8] sm:$0xff]  }
  0x16   : > { %3180 = vst [vmem:[#allocation3 + $0x38] sm:$0xff] %v6726_v1  ;;  %3181 = vst [vmem:[#allocation3 + $0x40] sm:$0xff] %v6726_v1  ;;  %5735 = vmatprep.subr.bf16.mxu1 %v6726_v1  ;;  %5757 = vmatprep.subr.bf16.mxu0 %v6726_v1  ;;  %v587_v30 = vshll.u32 %v6866_v24, 16  ;;  %v595_v34 = vshll.u32 %v6876_v28, 16  ;;  %v591_v35 = vshrl.u32 %v6866_v24, 16  ;;  %v599_v37 = vshrl.u32 %v6876_v28, 16 }
  0x17   : > { %3182 = vst [vmem:[#allocation3 + $0x48] sm:$0xff] %v6726_v1  ;;  %3183 = vst [vmem:[#allocation3 + $0x50] sm:$0xff] %v6726_v1  ;;  %v577_v26 = vor.u32 %v576_v21, %v572_v20  ;;  %v6555_v38 = vld [vmem:[%s6835_s12 + $0x60] sm:$0xff]   ;;  %v6556_v39 = vld [vmem:[%s6835_s12 + $0x68] sm:$0xff]   ;;  %v585_v40 = vor.u32 %v583_v33, %v581_v27 }
  0x18   : > { %3184 = vst [vmem:[#allocation3 + $0x58] sm:$0xff] %v6726_v1  ;;  %3185 = vst [vmem:[#allocation3 + $0x60] sm:$0xff] %v6726_v1  ;;  %v589_v36 = vrot.slane %v587_v30, 1  ;;  %v6892_v41 = vrot.slane %v595_v34, 1  ;;  %v6557_v42 = vld [vmem:[%s6835_s12 + $0x70] sm:$0xff]   ;;  %v1015_v43 = vshrl.u32 %v6555_v38, 16 }
  0x19   : > { %v582_v31 = vsel %vm570_vm4, %v577_v26, %v581_v27  ;;  %v1017_v44 = vshll.u32 %v6555_v38, 16  ;;  %v1022_v45 = vshll.u32 %v6556_v39, 16  ;;  %v1026_v46 = vshrl.u32 %v6556_v39, 16  ;;  %v1152_v47 = vld [vmem:[%s6835_s12 + $0x4] sm:$0xf]  ;;  %v6539_v48 = vld [vmem:[%s6835_s12 + $0x10] sm:$0xff]  }
  0x1a   : > { %v1030_v49 = vshll.u32 %v6557_v42, 16  ;;  %v6903_v50 = vld [vmem:[%s6835_s12 + $0x8] sm:$0xf]  ;;  %v6906_v51 = vld [vmem:[%s6835_s12 + $0xc] sm:$0xff]   ;;  %v6909_v52 = vld [vmem:[%s6835_s12 + $0x20] sm:$0x1f]   ;;  %v590_v56 = vsel %vm570_vm4, %v585_v40, %v589_v36 }
  0x1b   : > { %5676 = vmatmul.mubr.msk.bf16.gmra.mxu0 %vm325_vm3, %v6532_v12  ;;  %5688 = vmatmul.mubr.msk.bf16.gmra.mxu1 %vm325_vm3, %v6533_v13  ;;  %v1019_v53 = vrot.slane %v1017_v44, 1  ;;  %v1024_v54 = vrot.slane %v1022_v45, 1  ;;  %v4889_v55 = vcombine.low %v1152_v47, %v6903_v50  ;;  %v1197_v58 = vshll.u32 %v6906_v51, 16  ;;  %v6560_v59 = vld [vmem:[%s6835_s12 + $0x78] sm:$0xff]   ;;  %v6927_v11 = vld [vmem:[%s6835_s12 + $0x80] sm:$0x1f]  }
  0x1c   : > { %5679 = vmatprep.mubr.msk.bf16.mxu0 %vm6728_vm2, %v6726_v1  ;;  %5693 = vmatprep.mubr.msk.bf16.mxu1 %vm6728_vm2, %v6726_v1  ;;  %v1032_v57 = vrot.slane %v1030_v49, 1  ;;  %v1034_v60 = vshrl.u32 %v6557_v42, 16  ;;  %v1038_v5 = vshll.u32 %v6560_v59, 16  ;;  %v6916_v6 = vld [vmem:[%s6835_s12 + $0x14] sm:$0xff]   ;;  %v1201_v7 = vshrl.u32 %v6906_v51, 16  ;;  %v6938_v20 = vld [vmem:[%s6835_s12 + $0x1c] sm:$0xff]  }
  0x1d   : > { %v1020_v61 = vor.u32 %v1019_v53, %v1015_v43  ;;  %v1028_v62 = vor.u32 %v1026_v46, %v1024_v54  ;;  %v1190_v63 = vshrl.u32 %v4889_v55, 16  ;;  %v1192_v0 = vshll.u32 %v4889_v55, 16  ;;  %v6945_v25 = vld [vmem:[%s6835_s12 + $0x24] sm:$0x1f]   ;;  %v6565_v26 = vld [vmem:[%s6835_s12 + $0x34] sm:$0xff]  }
  0x1e   : > { %v1199_v2 = vrot.slane %v1197_v58, 1  ;;  %v1036_v3 = vor.u32 %v1034_v60, %v1032_v57  ;;  %v1042_v12 = vshrl.u32 %v6560_v59, 16  ;;  %v593_v13 = vor.u32 %v591_v35, %v589_v36  ;;  %v6541_v33 = vld [vmem:[%s6835_s12 + $0x18] sm:$0xff]   ;;  %v6567_v47 = vld [vmem:[%s6835_s12 + $0x44] sm:$0xff]  }
  0x1f   : > { %v6921_v8 = vsel %vm570_vm4, %v1020_v61, %v1024_v54  ;;  %v6924_v9 = vsel %vm570_vm4, %v1028_v62, %v1032_v57  ;;  %v1194_v10 = vrot.slane %v1192_v0, 1  ;;  %v1040_v14 = vrot.slane %v1038_v5, 1  ;;  %v1502_v55 = vld [vmem:[%s6835_s12 + $0x4] sm:$0xe]  ;;  %v6543_v0 = vld [vmem:[%s6835_s12 + $0x20] ss:$0 sps:$4 sm:$0xff]  }
  0x20   : > { %v1203_v15 = vor.u32 %v1201_v7, %v1199_v2  ;;  %v1205_v16 = vshll.u32 %v6916_v6, 16  ;;  %v603_v17 = vshll.u32 %v6909_v52, 16  ;;  %v1209_v21 = vshrl.u32 %v6916_v6, 16 }
  0x21   : > { %v6942_v22 = vsel %vm570_vm4, %v1036_v3, %v1040_v14  ;;  %v1044_v24 = vor.u32 %v1042_v12, %v1040_v14  ;;  %v1213_v30 = vshll.u32 %v6938_v20, 16  ;;  %v598_v34 = vsel %vm570_vm4, %v593_v13, %v6892_v41 }
  0x22   : > { %v1221_v38 = vshll.u32 %v6945_v25, 16  ;;  %v1365_v42 = vshrl.u32 %v6565_v26, 16  ;;  %v601_v43 = vor.u32 %v599_v37, %v6892_v41  ;;  %v1367_v45 = vshll.u32 %v6565_v26, 16  ;;  %v6545_v26 = vld [vmem:[%s6835_s12 + $0x60] sm:$0xff]  }
  0x23   : > { %5680 = vmatmul.mubr.msk.bf16.gmra.mxu0 %vm325_vm3, %v6534_v18  ;;  %5694 = vmatmul.mubr.msk.bf16.vlgmr.msra.gmra.mxu1 %vm325_vm3, %v6535_v19  ;;  %v1195_v18 = vor.u32 %v1194_v10, %v1190_v63  ;;  %v1046_v19 = vshll.u32 %v6927_v11, 16  ;;  %v1215_v40 = vrot.slane %v1213_v30, 1  ;;  %v1380_v41 = vshll.u32 %v6567_v47, 16  ;;  %v6989_v63 = vld [vmem:[%s6835_s12 + $0x54] sm:$0x1f]  }
  0x24   : > { %5715 = vmatprep.mubr.msk.bf16.mxu0 %vm6728_vm2, %v6726_v1  ;;  %5736 = vmatpush3.bf16.msra.mxu1 %v760_v23  ;;  %v1207_v23 = vrot.slane %v1205_v16, 1  ;;  %v6970_v44 = vrot.slane %v1221_v38, 1  ;;  %v1369_v28 = vrot.slane %v1367_v45, 1  ;;  %v1384_v58 = vshrl.u32 %v6567_v47, 16  ;;  %v6549_v38 = vld [vmem:[%s6835_s12 + $0x98] sm:$0xff]   ;;  %v6553_v45 = vld [vmem:[%s6835_s12 + $0xa8] sm:$0xff]  }
  0x25   : > { %5697 = vmatprep.mubr.msk.bf16.mxu1 %vm6728_vm2, %v6726_v1  ;;  %5779 = vmatprep.subr.bf16.mxu1 %v6726_v1  ;;  %v6949_v27 = vsel %vm570_vm4, %v1195_v18, %v1199_v2  ;;  %v1382_v61 = vrot.slane %v1380_v41, 1  ;;  %v607_v3 = vshrl.u32 %v6909_v52, 16  ;;  %v4921_v5 = vcombine.low %v1502_v55, %v6903_v50  ;;  %v4909_v47 = vld [vmem:[%s8297_s1 + $0xe] sm:$0x3] }
  0x26   : > { %v6960_v35 = vsel %vm570_vm4, %v1203_v15, %v1207_v23  ;;  %v1211_v36 = vor.u32 %v1209_v21, %v1207_v23  ;;  %v1370_v59 = vor.u32 %v1369_v28, %v1365_v42  ;;  %v1050_v15 = vshrl.u32 %v6927_v11, 16  ;;  %v4877_v23 = vld [vmem:[%s8297_s1 + $0xa] sm:$0x3]  ;;  %v6551_v42 = vld [vmem:[%s6835_s12 + $0xa0] sm:$0xff]  }
  0x27   : > { %v1386_v13 = vor.u32 %v1384_v58, %v1382_v61  ;;  %v1396_v16 = vshll.u32 %v6989_v63, 16  ;;  %v1510_v52 = vrot.slane %v6906_v51, 1  ;;  %v7092_v28 = vld [vmem:[#allocation2] sm:$0xff]  ;;  %v1400_v51 = vshrl.u32 %v6989_v63, 16  ;;  %v6572_v58 = vld [vmem:[%s8299_s3 + $0x70] sm:$0xff]  }
  0x28   : > { %v6975_v49 = vsel %vm570_vm4, %v1211_v36, %v1215_v40 }
  0x29   : > { %v7011_v21 = vrot.slane %v1396_v16, 1 }
  0x2b   : > { %5716 = vmatmul.mubr.msk.bf16.vlgmr.msra.gmra.mxu0 %vm325_vm3, %v582_v31  ;;  %5698 = vmatmul.mubr.msk.bf16.gmra.mxu1 %vm325_vm3, %v6536_v29  ;;  %v6951_v29 = vrot.slane %v1046_v19, 1  ;;  %v1217_v31 = vshrl.u32 %v6938_v20, 16  ;;  %v7009_v19 = vrot.slane %v4921_v5, 1  ;;  %v6575_v5 = vld [vmem:[%s8299_s3 + $0x30] sm:$0xff]  }
  0x2c   : > { %5758 = vmatpush3.bf16.msra.mxu0 %v894_v32  ;;  %5701 = vmatprep.mubr.msk.bf16.mxu1 %vm6728_vm2, %v6726_v1  ;;  %v6566_v32 = vld [vmem:[%s6835_s12 + $0x3c] sm:$0xff]  }
  0x2d   : > { %5719 = vmatprep.mubr.msk.bf16.mxu0 %vm6728_vm2, %v6726_v1  ;;  %5801 = vmatprep.subr.bf16.mxu0 %v6726_v1  ;;  %v6965_v39 = vsel %vm570_vm4, %v1044_v24, %v6951_v29  ;;  %v1372_v46 = vshll.u32 %v6566_v32, 16  ;;  %v1219_v53 = vor.u32 %v1217_v31, %v1215_v40  ;;  %v1376_v54 = vshrl.u32 %v6566_v32, 16  ;;  %v4888_v32 = vld [vmem:[%s8297_s1 + $0xc] sm:$0x3]  ;;  %v6548_v40 = vld [vmem:[%s6835_s12 + $0x70] sm:$0xff]  }
  0x2e   : > { %v1069_v31 = vand.u32 %v4877_v23, %v6812_v4  ;;  %v1244_v36 = vand.u32 %v4888_v32, %v6812_v4  ;;  %v6578_v32 = vld [vmem:[%s8299_s3 + $0x58] sm:$0xff]  }
  0x2f   : > { %v1374_v37 = vrot.slane %v1372_v46, 1  ;;  %v6986_v57 = vsel %vm570_vm4, %v1219_v53, %v6970_v44  ;;  %v6552_v46 = vld [vmem:[%s6835_s12 + $0x80] ss:$0 sps:$4 sm:$0xff]   ;;  %v1419_v53 = vand.u32 %v4909_v47, %v6812_v4 }
  0x31   : > { %v1378_v60 = vor.u32 %v1376_v54, %v1374_v37  ;;  %v6996_v10 = vsel %vm570_vm4, %v1370_v59, %v1374_v37  ;;  %v4920_v54 = vld [vmem:[%s8297_s1 + $0x10] sm:$0x3] }
  0x32   : > { %v1534_v55 = vand.u32 %v4920_v54, %v6812_v4 }
  0x33   : > { %5720 = vmatmul.mubr.msk.bf16.gmra.mxu0 %vm325_vm3, %v590_v56  ;;  %5702 = vmatmul.mubr.msk.bf16.gmra.mxu1 %vm325_vm3, %v6539_v48  ;;  %v605_v48 = vrot.slane %v603_v17, 1  ;;  %v6569_v56 = vld [vmem:[%s6835_s12 + $0x4c] sm:$0xff]   ;;  %v6999_v12 = vsel %vm570_vm4, %v1378_v60, %v1382_v61  ;;  %v1225_v17 = vshrl.u32 %v6945_v25, 16  ;;  %v6573_v61 = vld [vmem:[%s8299_s3 + $0x38] sm:$0xff]  }
  0x34   : > { %5723 = vmatprep.mubr.msk.bf16.mxu0 %vm6728_vm2, %v6726_v1  ;;  %5705 = vmatprep.mubr.msk.bf16.mxu1 %vm6728_vm2, %v6726_v1  ;;  %v1388_v62 = vshll.u32 %v6569_v56, 16  ;;  %v1392_v7 = vshrl.u32 %v6569_v56, 16 }
  0x35   : > { %v606_v2 = vsel %vm570_vm4, %v601_v43, %v605_v48  ;;  %v609_v30 = vor.u32 %v607_v3, %v605_v48  ;;  %v6550_v43 = vld [vmem:[%s6835_s12 + $0x78] sm:$0xff]   ;;  %v6554_v48 = vld [vmem:[%s6835_s12 + $0xb0] ss:$0 sps:$4 sm:$0xff]   ;;  %v1227_v4 = vor.u32 %v1225_v17, %v6970_v44 }
  0x36   : > { %v1390_v14 = vrot.slane %v1388_v62, 1  ;;  %v6571_v44 = vld [vmem:[%s8299_s3 + $0x78] sm:$0xff]  }
  0x38   : > { %v7006_v50 = vsel %vm570_vm4, %v1386_v13, %v1390_v14  ;;  %v1394_v18 = vor.u32 %v1392_v7, %v1390_v14  ;;  %v6577_v14 = vld [vmem:[%s8299_s3 + $0x28] sm:$0xff]  }
  0x3a   : > { %v7023_v24 = vsel %vm570_vm4, %v1394_v18, %v7011_v21  ;;  %v6576_v18 = vld [vmem:[%s8299_s3 + $0x60] sm:$0xff]  }
  0x3b   : > { %5724 = vmatmul.mubr.msk.bf16.gmra.mxu0 %vm325_vm3, %v598_v34  ;;  %5706 = vmatmul.mubr.msk.bf16.gmra.mxu1 %vm325_vm3, %v6541_v33  ;;  %v6547_v33 = vld [vmem:[%s6835_s12 + $0x90] sm:$0xff]   ;;  %v6546_v34 = vld [vmem:[%s6835_s12 + $0x68] sm:$0xff]  }
  0x3c   : > { %5727 = vmatprep.mubr.msk.bf16.mxu0 %vm6728_vm2, %v6726_v1  ;;  %5709 = vmatprep.mubr.msk.bf16.mxu1 %vm6728_vm2, %v6726_v1 }
  0x43   : > { %5728 = vmatmul.mubr.msk.bf16.gmra.mxu0 %vm325_vm3, %v606_v2  ;;  %5710 = vmatmul.mubr.msk.bf16.gmra.mxu1 %vm325_vm3, %v6543_v0  ;;  %v6574_v0 = vld [vmem:[%s8299_s3 + $0x68] sm:$0xff]  }
  0x44   : > { %5731 = vmatprep.mubr.msk.bf16.mxu0 %vm6728_vm2, %v6726_v1  ;;  %5737 = vmatprep.mubr.msk.bf16.mxu1 %vm6728_vm2, %v6726_v1 }
  0x4b   : > { %5732 = vmatmul.mubr.msk.bf16.gmra.mxu0 %vm325_vm3, %v609_v30  ;;  %5738 = vmatmul.mubr.msk.bf16.vlgmr.msra.gmra.mxu1 %vm325_vm3, %v6545_v26 }
  0x4c   : > { %5759 = vmatprep.mubr.msk.bf16.mxu0 %vm6728_vm2, %v6726_v1  ;;  %5780 = vmatpush3.bf16.msra.mxu1 %v1069_v31 }
  0x4d   : > { %5741 = vmatprep.mubr.msk.bf16.mxu1 %vm6728_vm2, %v6726_v1  ;;  %5823 = vmatprep.subr.bf16.mxu1 %v6726_v1 }
  0x53   : > { %5760 = vmatmul.mubr.msk.bf16.vlgmr.msra.gmra.mxu0 %vm325_vm3, %v6547_v33  ;;  %5742 = vmatmul.mubr.msk.bf16.gmra.mxu1 %vm325_vm3, %v6546_v34  ;;  %v6581_v33 = vld [vmem:[%s8299_s3 + $0x18] sm:$0xff]  }
  0x54   : > { %5802 = vmatpush3.bf16.msra.mxu0 %v1244_v36  ;;  %5745 = vmatprep.mubr.msk.bf16.mxu1 %vm6728_vm2, %v6726_v1 }
  0x55   : > { %5763 = vmatprep.mubr.msk.bf16.mxu0 %vm6728_vm2, %v6726_v1  ;;  %5845 = vmatprep.subr.bf16.mxu0 %v6726_v1 }
  0x5b   : > { %5764 = vmatmul.mubr.msk.bf16.gmra.mxu0 %vm325_vm3, %v6549_v38  ;;  %5746 = vmatmul.mubr.msk.bf16.gmra.mxu1 %vm325_vm3, %v6548_v40 }
  0x5c   : > { %5767 = vmatprep.mubr.msk.bf16.mxu0 %vm6728_vm2, %v6726_v1  ;;  %5749 = vmatprep.mubr.msk.bf16.mxu1 %vm6728_vm2, %v6726_v1 }
  0x63   : > { %5768 = vmatmul.mubr.msk.bf16.gmra.mxu0 %vm325_vm3, %v6551_v42  ;;  %5750 = vmatmul.mubr.msk.bf16.gmra.mxu1 %vm325_vm3, %v6550_v43 }
  0x64   : > { %5771 = vmatprep.mubr.msk.bf16.mxu0 %vm6728_vm2, %v6726_v1  ;;  %5753 = vmatprep.mubr.msk.bf16.mxu1 %vm6728_vm2, %v6726_v1 }
  0x6b   : > { %5772 = vmatmul.mubr.msk.bf16.gmra.mxu0 %vm325_vm3, %v6553_v45  ;;  %5754 = vmatmul.mubr.msk.bf16.gmra.mxu1 %vm325_vm3, %v6552_v46  ;;  %v6580_v45 = vld [vmem:[%s8299_s3 + $0x50] sm:$0xff]  }
  0x6c   : > { %5775 = vmatprep.mubr.msk.bf16.mxu0 %vm6728_vm2, %v6726_v1  ;;  %5781 = vmatprep.mubr.msk.bf16.mxu1 %vm6728_vm2, %v6726_v1  ;;  %v6582_v46 = vld [vmem:[%s8299_s3 + $0x10] sm:$0xff]  }
  0x73   : > { %5776 = vmatmul.mubr.msk.bf16.gmra.mxu0 %vm325_vm3, %v6554_v48  ;;  %5782 = vmatmul.mubr.msk.bf16.vlgmr.msra.gmra.mxu1 %vm325_vm3, %v6921_v8  ;;  %v1511_v8 = vsel %vm1508_vm5, %v7009_v19, %v1510_v52  ;;  %v6579_v19 = vld [vmem:[%s8299_s3 + $0x20] sm:$0xff]  }
  0x74   : > { %5803 = vmatprep.mubr.msk.bf16.mxu0 %vm6728_vm2, %v6726_v1  ;;  %5824 = vmatpush3.bf16.msra.mxu1 %v1419_v53 }
  0x75   : > { %5785 = vmatprep.mubr.msk.bf16.mxu1 %vm6728_vm2, %v6726_v1  ;;  %5867 = vmatprep.subr.bf16.mxu1 %v6726_v1  ;;  %v1052_v1 = vor.u32 %v1050_v15, %v6951_v29 }
  0x7b   : > { %5804 = vmatmul.mubr.msk.bf16.vlgmr.msra.gmra.mxu0 %vm325_vm3, %v6949_v27  ;;  %5786 = vmatmul.mubr.msk.bf16.gmra.mxu1 %vm325_vm3, %v6924_v9  ;;  %v1512_v9 = vrot.slane %v6916_v6, 1  ;;  %v1516_v27 = vrot.slane %v6945_v25, 1 }
  0x7c   : > { %5846 = vmatpush3.bf16.msra.mxu0 %v1534_v55  ;;  %5789 = vmatprep.mubr.msk.bf16.mxu1 %vm6728_vm2, %v7092_v28 }
  0x7d   : > { %5807 = vmatprep.mubr.msk.bf16.mxu0 %vm6728_vm2, %v7092_v28  ;;  %5903 = vmatprep.subr.bf16.mxu0 %v7092_v28  ;;  %v1513_v11 = vsel %vm1508_vm5, %v1510_v52, %v1512_v9 }
  0x83   : > { %5808 = vmatmul.mubr.msk.bf16.gmra.mxu0 %vm325_vm3, %v6960_v35  ;;  %5790 = vmatmul.mubr.msk.bf16.gmra.mxu1 %vm325_vm3, %v6942_v22  ;;  %v1514_v22 = vrot.slane %v6938_v20, 1  ;;  %v1402_v20 = vor.u32 %v1400_v51, %v7011_v21 }
  0x84   : > { %5811 = vmatprep.mubr.msk.bf16.mxu0 %vm6728_vm2, %v7092_v28  ;;  %5793 = vmatprep.mubr.msk.bf16.mxu1 %vm6728_vm2, %v7092_v28 }
  0x85   : > { %v1515_v6 = vsel %vm1508_vm5, %v1512_v9, %v1514_v22  ;;  %v1517_v29 = vsel %vm1508_vm5, %v1514_v22, %v1516_v27 }
  0x8b   : > { %5812 = vmatmul.mubr.msk.bf16.gmra.mxu0 %vm325_vm3, %v6975_v49  ;;  %5794 = vmatmul.mubr.msk.bf16.gmra.mxu1 %vm325_vm3, %v6965_v39 }
  0x8c   : > { %5815 = vmatprep.mubr.msk.bf16.mxu0 %vm6728_vm2, %v7092_v28  ;;  %5797 = vmatprep.mubr.msk.bf16.mxu1 %vm6728_vm2, %v7092_v28 }
  0x93   : > { %5816 = vmatmul.mubr.msk.bf16.gmra.mxu0 %vm325_vm3, %v6986_v57  ;;  %5798 = vmatmul.mubr.msk.bf16.gmra.mxu1 %vm325_vm3, %v1052_v1 }
  0x94   : > { %5819 = vmatprep.mubr.msk.bf16.mxu0 %vm6728_vm2, %v7092_v28  ;;  %5825 = vmatprep.mubr.msk.bf16.mxu1 %vm6728_vm2, %v7092_v28 }
  0x9b   : > { %5820 = vmatmul.mubr.msk.bf16.gmra.mxu0 %vm325_vm3, %v1227_v4  ;;  %5826 = vmatmul.mubr.msk.bf16.vlgmr.msra.gmra.mxu1 %vm325_vm3, %v6996_v10  ;;  %v6583_v4 = vld [vmem:[%s8299_s3 + $0x48] sm:$0xff]  }
  0x9c   : > { %5847 = vmatprep.mubr.msk.bf16.mxu0 %vm6728_vm2, %v7092_v28  ;;  %5829 = vmatprep.mubr.msk.bf16.mxu1 %vm6728_vm2, %v7092_v28 }
  0x9d   : > { %5868 = vmatpush3.bf16.msra.mxu1 %v6571_v44 }
  0x9e   : > { %5869 = vmatprep.subr.bf16.mxu1 %v7092_v28 }
  0xa1   : > { %5870 = vmatpush3.bf16.msra.mxu1 %v6572_v58 }
  0xa2   : > { %5871 = vmatprep.subr.bf16.mxu1 %v7092_v28 }
  0xa3   : > { %5848 = vmatmul.mubr.msk.bf16.vlgmr.msra.gmra.mxu0 %vm325_vm3, %v1511_v8  ;;  %5830 = vmatmul.mubr.msk.bf16.gmra.mxu1 %vm325_vm3, %v6999_v12  ;;  %v6584_v8 = vld [vmem:[%s8299_s3 + $0x8] sm:$0xff]  }
  0xa4   : > { %5851 = vmatprep.mubr.msk.bf16.mxu0 %vm6728_vm2, %v7092_v28  ;;  %5833 = vmatprep.mubr.msk.bf16.mxu1 %vm6728_vm2, %v7092_v28 }
  0xa5   : > { %5904 = vmatpush3.bf16.msra.mxu0 %v6573_v61  ;;  %5872 = vmatpush3.bf16.msra.mxu1 %v6574_v0 }
  0xa6   : > { %5905 = vmatprep.subr.bf16.mxu0 %v7092_v28  ;;  %5873 = vmatprep.subr.bf16.mxu1 %v7092_v28 }
  0xa9   : > { %5906 = vmatpush3.bf16.msra.mxu0 %v6575_v5  ;;  %5874 = vmatpush3.bf16.msra.mxu1 %v6576_v18 }
  0xaa   : > { %5907 = vmatprep.subr.bf16.mxu0 %v7092_v28  ;;  %5875 = vmatprep.subr.bf16.mxu1 %v7092_v28 }
  0xab   : > { %5852 = vmatmul.mubr.msk.bf16.gmra.mxu0 %vm325_vm3, %v1513_v11  ;;  %5834 = vmatmul.mubr.msk.bf16.gmra.mxu1 %vm325_vm3, %v7006_v50 }
  0xac   : > { %5855 = vmatprep.mubr.msk.bf16.mxu0 %vm6728_vm2, %v7092_v28  ;;  %5837 = vmatprep.mubr.msk.bf16.mxu1 %vm6728_vm2, %v7092_v28 }
  0xad   : > { %5908 = vmatpush3.bf16.msra.mxu0 %v6577_v14  ;;  %5876 = vmatpush3.bf16.msra.mxu1 %v6578_v32 }
  0xae   : > { %5909 = vmatprep.subr.bf16.mxu0 %v7092_v28  ;;  %5877 = vmatprep.subr.bf16.mxu1 %v7092_v28 }
  0xb1   : > { %5910 = vmatpush3.bf16.msra.mxu0 %v6579_v19  ;;  %5878 = vmatpush3.bf16.msra.mxu1 %v6580_v45 }
  0xb2   : > { %5911 = vmatprep.subr.bf16.mxu0 %v7092_v28  ;;  %5879 = vmatprep.subr.bf16.mxu1 %v7092_v28 }
  0xb3   : > { %5856 = vmatmul.mubr.msk.bf16.gmra.mxu0 %vm325_vm3, %v1515_v6  ;;  %5838 = vmatmul.mubr.msk.bf16.gmra.mxu1 %vm325_vm3, %v7023_v24 }
  0xb4   : > { %5859 = vmatprep.mubr.msk.bf16.mxu0 %vm6728_vm2, %v7092_v28  ;;  %5841 = vmatprep.mubr.msk.bf16.mxu1 %vm6728_vm2, %v7092_v28 }
  0xb5   : > { %5912 = vmatpush3.bf16.msra.mxu0 %v6581_v33  ;;  %5880 = vmatpush3.bf16.msra.mxu1 %v6583_v4 }
  0xb6   : > { %5913 = vmatprep.subr.bf16.mxu0 %v7092_v28  ;;  %5881 = vmatprep.subr.bf16.mxu1 %v7092_v28 }
  0xb9   : > { %5914 = vmatpush3.bf16.msra.mxu0 %v6582_v46 }
  0xba   : > { %5915 = vmatprep.subr.bf16.mxu0 %v7092_v28 }
  0xbb   : > { %5860 = vmatmul.mubr.msk.bf16.gmra.mxu0 %vm325_vm3, %v1517_v29  ;;  %5842 = vmatmul.mubr.msk.bf16.gmra.mxu1 %vm325_vm3, %v1402_v20  ;;  %v6585_v20 = vld [vmem:[%s8299_s3 + $0x40] sm:$0xff]  }
  0xbc   : > { %5863 = vmatprep.mubr.msk.bf16.mxu0 %vm6728_vm2, %v7092_v28  ;;  %5883 = vmatprep.mubr.msk.bf16.mxu1 %vm6728_vm2, %v7092_v28  ;;  %v6586_v29 = vld [vmem:[%s8299_s3] sm:$0xff]  }
  0xbd   : > { %5916 = vmatpush3.bf16.msra.mxu0 %v6584_v8  ;;  %5882 = vmatpush3.bf16.msra.mxu1 %v6585_v20 }
  0xbe   : > { %5917 = vmatprep.subr.bf16.mxu0 %v7092_v28  ;;  %5939 = vmatprep.subr.bf16.mxu1 %v7092_v28 }
  0xc1   : > { %5918 = vmatpush3.bf16.msra.mxu0 %v6586_v29 }
  0xc2   : > { %5975 = vmatprep.subr.bf16.mxu0 %v7092_v28 }
  0xc3   : > { %5864 = vmatmul.mubr.msk.bf16.gmra.mxu0 %vm325_vm3, %v1516_v27 }
  0xc4   : > { %5919 = vmatprep.mubr.msk.bf16.mxu0 %vm6728_vm2, %v7092_v28 }
  0xd3   : > { %v382_v25 = vpop.f32.mrf.mxu0  ;;  %v7179_v35 = vpop.f32.mrf.mxu1 }
  0xd5   : > { %v5673_v39 = vpop.f32.mrf.mxu0  ;;  %v5685_v49 = vpop.f32.mrf.mxu1 }
  0xd7   : > { %v385_v37 = vpop.f32.mrf.mxu0  ;;  %v7184_v41 = vpop.f32.mrf.mxu1 }
  0xd9   : > { %v5674_v56 = vpop.f32.mrf.mxu0  ;;  %v5686_v57 = vpop.f32.mrf.mxu1 }
  0xdb   : > { %v390_v59 = vpop.f32.mrf.mxu0  ;;  %v7190_v60 = vpop.f32.mrf.mxu1 }
  0xdd   : > { %v5677_v62 = vpop.f32.mrf.mxu0  ;;  %v5689_v63 = vpop.f32.mrf.mxu1 }
  0xdf   : > { %v393_v2 = vpop.f32.mrf.mxu0  ;;  %v417_v3 = vpop.f32.mrf.mxu1 }
  0xe1   : > { %v5678_v7 = vpop.f32.mrf.mxu0  ;;  %v5690_v10 = vpop.f32.mrf.mxu1 }
  0xe3   : > { %v398_v12 = vpop.f32.mrf.mxu0  ;;  %v495_v13 = vpop.f32.mrf.mxu1 }
  0xe4   : > { %v496_v15 = vadd.f32 %v495_v13, %v382_v25 }
  0xe5   : > { %v5681_v16 = vpop.f32.mrf.mxu0  ;;  %v5695_v17 = vpop.f32.mrf.mxu1 }
  0xe7   : > { %v401_v52 = vpop.f32.mrf.mxu0  ;;  %v498_v50 = vpop.f32.mrf.mxu1 }
  0xe8   : > { %v499_v21 = vadd.f32 %v498_v50, %v385_v37 }
  0xe9   : > { %v5682_v23 = vpop.f32.mrf.mxu0  ;;  %v5696_v24 = vpop.f32.mrf.mxu1 }
  0xeb   : > { %v662_v26 = vpop.f32.mrf.mxu0  ;;  %v503_v30 = vpop.f32.mrf.mxu1 }
  0xec   : > { %v7217_v31 = vadd.f32 %v662_v26, %v496_v15  ;;  %v504_v34 = vadd.f32 %v503_v30, %v390_v59 }
  0xed   : > { %v5717_v36 = vpop.f32.mrf.mxu0  ;;  %v5699_v38 = vpop.f32.mrf.mxu1 }
  0xef   : > { %v665_v40 = vpop.f32.mrf.mxu0  ;;  %v506_v42 = vpop.f32.mrf.mxu1 }
  0xf0   : > { %v7227_v43 = vadd.f32 %v665_v40, %v499_v21  ;;  %v507_v47 = vadd.f32 %v506_v42, %v393_v2 }
  0xf1   : > { %v5718_v48 = vpop.f32.mrf.mxu0  ;;  %v5700_v53 = vpop.f32.mrf.mxu1 }
  0xf3   : > { %v670_v54 = vpop.f32.mrf.mxu0  ;;  %v511_v55 = vpop.f32.mrf.mxu1 }
  0xf4   : > { %v702_v1 = vadd.f32 %v670_v54, %v504_v34  ;;  %v512_v9 = vadd.f32 %v511_v55, %v398_v12 }
  0xf5   : > { %v5721_v11 = vpop.f32.mrf.mxu0  ;;  %v5703_v22 = vpop.f32.mrf.mxu1 }
  0xf7   : > { %v673_v6 = vpop.f32.mrf.mxu0  ;;  %v514_v51 = vpop.f32.mrf.mxu1 }
  0xf8   : > { %v703_v27 = vadd.f32 %v673_v6, %v507_v47  ;;  %v515_v25 = vadd.f32 %v514_v51, %v401_v52 }
  0xf9   : > { %v5722_v39 = vpop.f32.mrf.mxu0  ;;  %v5704_v44 = vpop.f32.mrf.mxu1 }
  0xfb   : > { %v678_v49 = vpop.f32.mrf.mxu0  ;;  %v519_v37 = vpop.f32.mrf.mxu1 }
  0xfc   : > { %v704_v56 = vadd.f32 %v678_v49, %v512_v9  ;;  %v520_v57 = vadd.f32 %v519_v37, %v7179_v35 }
  0xfd   : > { %v5725_v58 = vpop.f32.mrf.mxu0  ;;  %v5707_v59 = vpop.f32.mrf.mxu1 }
  0xff   : > { %v681_v61 = vpop.f32.mrf.mxu0  ;;  %v522_v62 = vpop.f32.mrf.mxu1 }
 0x100   : > { %v705_v63 = vadd.f32 %v681_v61, %v515_v25  ;;  %v523_v0 = vadd.f32 %v522_v62, %v7184_v41 }
 0x101   : > { %v5726_v2 = vpop.f32.mrf.mxu0  ;;  %v5708_v3 = vpop.f32.mrf.mxu1 }
 0x103   : > { %v686_v5 = vpop.f32.mrf.mxu0  ;;  %v527_v7 = vpop.f32.mrf.mxu1 }
 0x104   : > { %v706_v10 = vadd.f32 %v686_v5, %v520_v57  ;;  %v528_v12 = vadd.f32 %v527_v7, %v7190_v60 }
 0x105   : > { %v5729_v13 = vpop.f32.mrf.mxu0  ;;  %v5711_v14 = vpop.f32.mrf.mxu1 }
 0x107   : > { %v689_v15 = vpop.f32.mrf.mxu0  ;;  %v530_v16 = vpop.f32.mrf.mxu1 }
 0x108   : > { %v707_v17 = vadd.f32 %v689_v15, %v523_v0 }
 0x109   : > { %v5730_v35 = vpop.f32.mrf.mxu0  ;;  %v5712_v52 = vpop.f32.mrf.mxu1 }
 0x10b   : > { %v694_v50 = vpop.f32.mrf.mxu0  ;;  %v796_v19 = vpop.f32.mrf.mxu1 }
 0x10c   : > { %v708_v18 = vadd.f32 %v694_v50, %v528_v12  ;;  %v834_v21 = vadd.f32 %v796_v19, %v7217_v31 }
 0x10d   : > { %v5733_v41 = vpop.f32.mrf.mxu0  ;;  %v5739_v23 = vpop.f32.mrf.mxu1 }
 0x10f   : > { %v697_v24 = vpop.f32.mrf.mxu0  ;;  %v799_v26 = vpop.f32.mrf.mxu1 }
 0x110   : > { %v835_v30 = vadd.f32 %v799_v26, %v7227_v43 }
 0x111   : > { %v5734_v32 = vpop.f32.mrf.mxu0  ;;  %v5740_v60 = vpop.f32.mrf.mxu1 }
 0x113   : > { %v930_v33 = vpop.f32.mrf.mxu0  ;;  %v804_v34 = vpop.f32.mrf.mxu1 }
 0x114   : > { %v7258_v36 = vadd.f32 %v930_v33, %v834_v21  ;;  %v836_v38 = vadd.f32 %v804_v34, %v702_v1 }
 0x115   : > { %v5761_v40 = vpop.f32.mrf.mxu0  ;;  %v5743_v42 = vpop.f32.mrf.mxu1 }
 0x117   : > { %v933_v45 = vpop.f32.mrf.mxu0  ;;  %v807_v46 = vpop.f32.mrf.mxu1 }
 0x118   : > { %v7260_v47 = vadd.f32 %v933_v45, %v835_v30  ;;  %v837_v31 = vadd.f32 %v807_v46, %v703_v27 }
 0x119   : > { %v5762_v48 = vpop.f32.mrf.mxu0  ;;  %v5744_v53 = vpop.f32.mrf.mxu1 }
 0x11b   : > { %v938_v54 = vpop.f32.mrf.mxu0  ;;  %v812_v55 = vpop.f32.mrf.mxu1 }
 0x11c   : > { %v7262_v4 = vadd.f32 %v938_v54, %v836_v38  ;;  %v838_v43 = vadd.f32 %v812_v55, %v704_v56 }
 0x11d   : > { %v5765_v8 = vpop.f32.mrf.mxu0  ;;  %v5747_v9 = vpop.f32.mrf.mxu1 }
 0x11f   : > { %v941_v11 = vpop.f32.mrf.mxu0  ;;  %v815_v22 = vpop.f32.mrf.mxu1 }
 0x120   : > { %v7264_v6 = vadd.f32 %v941_v11, %v837_v31  ;;  %v839_v1 = vadd.f32 %v815_v22, %v705_v63 }
 0x121   : > { %v5766_v51 = vpop.f32.mrf.mxu0  ;;  %v5748_v20 = vpop.f32.mrf.mxu1 }
 0x123   : > { %v946_v29 = vpop.f32.mrf.mxu0  ;;  %v820_v25 = vpop.f32.mrf.mxu1 }
 0x124   : > { %v7266_v39 = vadd.f32 %v946_v29, %v838_v43  ;;  %v840_v27 = vadd.f32 %v820_v25, %v706_v10 }
 0x125   : > { %v5769_v44 = vpop.f32.mrf.mxu0  ;;  %v5751_v49 = vpop.f32.mrf.mxu1 }
 0x127   : > { %v949_v37 = vpop.f32.mrf.mxu0  ;;  %v823_v57 = vpop.f32.mrf.mxu1 }
 0x128   : > { %v7268_v58 = vadd.f32 %v949_v37, %v839_v1  ;;  %v841_v56 = vadd.f32 %v823_v57, %v707_v17 }
 0x129   : > { %v5770_v59 = vpop.f32.mrf.mxu0  ;;  %v5752_v61 = vpop.f32.mrf.mxu1 }
 0x12b   : > { %v954_v62 = vpop.f32.mrf.mxu0  ;;  %v828_v0 = vpop.f32.mrf.mxu1 }
 0x12c   : > { %v7270_v2 = vadd.f32 %v954_v62, %v840_v27  ;;  %v842_v63 = vadd.f32 %v828_v0, %v708_v18 }
 0x12d   : > { %v5773_v3 = vpop.f32.mrf.mxu0  ;;  %v5755_v5 = vpop.f32.mrf.mxu1 }
 0x12f   : > { %v957_v7 = vpop.f32.mrf.mxu0  ;;  %v831_v12 = vpop.f32.mrf.mxu1 }
 0x130   : > { %v7272_v13 = vadd.f32 %v957_v7, %v841_v56 }
 0x131   : > { %v5774_v10 = vpop.f32.mrf.mxu0  ;;  %v5756_v14 = vpop.f32.mrf.mxu1 }
 0x133   : > { %v962_v15 = vpop.f32.mrf.mxu0  ;;  %v1105_v35 = vpop.f32.mrf.mxu1 }
 0x134   : > { %v7274_v16 = vadd.f32 %v962_v15, %v842_v63  ;;  %v1143_v59 = vadd.f32 %v1105_v35, %v7258_v36 }
 0x135   : > { %v5777_v17 = vpop.f32.mrf.mxu0  ;;  %v5783_v52 = vpop.f32.mrf.mxu1 }
 0x136   : > { %v7297_v52 = vld [vmem:[%s8298_s2] ss:$0 sm:$0xff] }
 0x137   : > { %v965_v50 = vpop.f32.mrf.mxu0  ;;  %v1108_v19 = vpop.f32.mrf.mxu1 }
 0x138   : > { %v1144_v5 = vadd.f32 %v1108_v19, %v7260_v47 }
 0x139   : > { %v5778_v21 = vpop.f32.mrf.mxu0  ;;  %v5784_v41 = vpop.f32.mrf.mxu1 }
 0x13b   : > { %v1280_v23 = vpop.f32.mrf.mxu0  ;;  %v1113_v18 = vpop.f32.mrf.mxu1 }
 0x13c   : > { %v1318_v0 = vadd.f32 %v1280_v23, %v1143_v59  ;;  %v1145_v36 = vadd.f32 %v1113_v18, %v7262_v4 }
 0x13d   : > { %v5805_v24 = vpop.f32.mrf.mxu0  ;;  %v5787_v26 = vpop.f32.mrf.mxu1 }
 0x13f   : > { %v1283_v30 = vpop.f32.mrf.mxu0  ;;  %v1116_v32 = vpop.f32.mrf.mxu1 }
 0x140   : > { %v1319_v14 = vadd.f32 %v1283_v30, %v1144_v5  ;;  %v1146_v30 = vadd.f32 %v1116_v32, %v7264_v6 }
 0x141   : > { %v5806_v60 = vpop.f32.mrf.mxu0  ;;  %v5788_v33 = vpop.f32.mrf.mxu1 }
 0x143   : > { %v1288_v34 = vpop.f32.mrf.mxu0  ;;  %v1121_v38 = vpop.f32.mrf.mxu1 }
 0x144   : > { %v1320_v23 = vadd.f32 %v1288_v34, %v1145_v36 }
 0x145   : > { %v5809_v40 = vpop.f32.mrf.mxu0  ;;  %v5791_v42 = vpop.f32.mrf.mxu1 }
 0x147   : > { %v1291_v45 = vpop.f32.mrf.mxu0  ;;  %v7276_v46 = vpop.f32.mrf.mxu1 }
 0x149   : > { %v5810_v31 = vpop.f32.mrf.mxu0  ;;  %v5792_v48 = vpop.f32.mrf.mxu1 }
 0x14a   : > { %v1321_v31 = vadd.f32 %v1291_v45, %v1146_v30 }
 0x14b   : > { %v1296_v53 = vpop.f32.mrf.mxu0  ;;  %v7278_v54 = vpop.f32.mrf.mxu1 }
 0x14c   : > { %v1149_v5 = vadd.f32 %v7278_v54, %v7270_v2  ;;  %v6587_v54 = vld [vmem:[%s8299_s3 + $0xb8] sm:$0xff]  }
 0x14d   : > { %v5813_v55 = vpop.f32.mrf.mxu0  ;;  %v5795_v43 = vpop.f32.mrf.mxu1 }
 0x14e   : > { %v1147_v43 = vadd.f32 %v1121_v38, %v7266_v39 }
 0x14f   : > { %v7280_v8 = vpop.f32.mrf.mxu0  ;;  %v7282_v9 = vpop.f32.mrf.mxu1 }
 0x151   : > { %v5814_v11 = vpop.f32.mrf.mxu0  ;;  %v5796_v22 = vpop.f32.mrf.mxu1 }
 0x153   : > { %v7284_v1 = vpop.f32.mrf.mxu0  ;;  %v7286_v51 = vpop.f32.mrf.mxu1 }
 0x155   : > { %v5817_v20 = vpop.f32.mrf.mxu0  ;;  %v5799_v29 = vpop.f32.mrf.mxu1 }
 0x156   : > { %v1322_v29 = vadd.f32 %v1296_v53, %v1147_v43 }
 0x157   : > { %v7288_v25 = vpop.f32.mrf.mxu0  ;;  %v1140_v27 = vpop.f32.mrf.mxu1 }
 0x159   : > { %v5818_v44 = vpop.f32.mrf.mxu0  ;;  %v5800_v49 = vpop.f32.mrf.mxu1 }
 0x15b   : > { %v7290_v37 = vpop.f32.mrf.mxu0  ;;  %v1455_v57 = vpop.f32.mrf.mxu1 }
 0x15c   : > { %v1493_v7 = vadd.f32 %v1455_v57, %v1318_v0 }
 0x15d   : > { %v5821_v56 = vpop.f32.mrf.mxu0  ;;  %v5827_v61 = vpop.f32.mrf.mxu1 }
 0x15e   : > { %v1148_v56 = vadd.f32 %v7276_v46, %v7268_v58 }
 0x15f   : > { %v1315_v62 = vpop.f32.mrf.mxu0  ;;  %v1458_v63 = vpop.f32.mrf.mxu1 }
 0x160   : > { %v1494_v35 = vadd.f32 %v1458_v63, %v1319_v14  ;;  %v1323_v61 = vadd.f32 %v7280_v8, %v1148_v56 }
 0x161   : > { %v5822_v3 = vpop.f32.mrf.mxu0  ;;  %v5828_v12 = vpop.f32.mrf.mxu1 }
 0x163   : > { %v1570_v10 = vpop.f32.mrf.mxu0  ;;  %v1463_v15 = vpop.f32.mrf.mxu1 }
 0x164   : > { %v1608_v17 = vadd.f32 %v1570_v10, %v1493_v7  ;;  %v1495_v60 = vadd.f32 %v1463_v15, %v1320_v23  ;;  %v1324_v10 = vadd.f32 %v7284_v1, %v1149_v5  ;;  %v1716_v15 = vld [vmem:[#allocation2 + $0x1] sm:$0xff] }
 0x165   : > { %v5849_v50 = vpop.f32.mrf.mxu0  ;;  %v5831_v21 = vpop.f32.mrf.mxu1  ;;  %v6592_v5 = vld [vmem:[%s8299_s3 + $0xa0] sm:$0xff]  }
 0x166   : > { %v1624_v47 = vadd.f32 %v7297_v52, %v1608_v17  ;;  %v1150_v21 = vadd.f32 %v7282_v9, %v7272_v13  ;;  %v6589_v13 = vld [vmem:[%s8299_s3 + $0xf8] sm:$0xff]  }
 0x167   : > { %v1573_v41 = vpop.f32.mrf.mxu0  ;;  %v1466_v19 = vpop.f32.mrf.mxu1 }
 0x168   : > { %v1609_v24 = vadd.f32 %v1573_v41, %v1494_v35  ;;  %v1633_v48 = vmax.f32 %v1624_v47, 0.0  ;;  %v1496_v11 = vadd.f32 %v1466_v19, %v1321_v31  ;;  %v1325_v9 = vadd.f32 %v7288_v25, %v1150_v21 }
 0x169   : > { %v5850_v26 = vpop.f32.mrf.mxu0  ;;  %v5832_v40 = vpop.f32.mrf.mxu1  ;;  %v1151_v31 = vadd.f32 %v7286_v51, %v7274_v16  ;;  %v6591_v51 = vld [vmem:[%s8299_s3 + $0xf0] sm:$0xff]  }
 0x16a   : > { %v1625_v33 = vadd.f32 %v7297_v52, %v1609_v24 }
 0x16b   : > { %v1578_v42 = vpop.f32.mrf.mxu0  ;;  %v1471_v4 = vpop.f32.mrf.mxu1  ;;  %v1326_v43 = vadd.f32 %v7290_v37, %v1151_v31 }
 0x16c   : > { %v1634_v55 = vmax.f32 %v1625_v33, 0.0  ;;  %v1610_v18 = vadd.f32 %v1578_v42, %v1495_v60  ;;  %v1497_v39 = vadd.f32 %v1471_v4, %v1322_v29 }
 0x16d   : > { %v5853_v34 = vpop.f32.mrf.mxu0  ;;  %v5835_v20 = vpop.f32.mrf.mxu1 }
 0x16e   : > { %v7304_v22 = vpack.c.bf16 %v1634_v55, %v1633_v48  ;;  %v1626_v44 = vadd.f32 %v7297_v52, %v1610_v18  ;;  %v6588_v55 = vld [vmem:[%s8299_s3 + $0xb0] sm:$0xff]  }
 0x16f   : > { %v1581_v27 = vpop.f32.mrf.mxu0  ;;  %v1474_v45 = vpop.f32.mrf.mxu1 }
 0x170   : > { %v1647_v6 = vunpack.c.l.bf16 %v7304_v22  ;;  %v1648_v32 = vunpack.c.h.bf16 %v7304_v22  ;;  %v1611_v49 = vadd.f32 %v1581_v27, %v1496_v11  ;;  %v1635_v62 = vmax.f32 %v1626_v44, 0.0 }
 0x171   : > { %v5854_v57 = vpop.f32.mrf.mxu0  ;;  %v5836_v53 = vpop.f32.mrf.mxu1  ;;  %v1498_v58 = vadd.f32 %v1474_v45, %v1323_v61 }
 0x172   : > { %1670 = vst [vmem:[#allocation2 + $0xb] sm:$0xff] %v1647_v6  ;;  %1671 = vst [vmem:[#allocation2 + $0x14] sm:$0xfe] %v1648_v32  ;;  %v1627_v38 = vadd.f32 %v7297_v52, %v1611_v49  ;;  %v6590_v32 = vld [vmem:[%s8299_s3 + $0xa8] sm:$0xff]  }
 0x173   : > { %v1586_v59 = vpop.f32.mrf.mxu0  ;;  %v1479_v63 = vpop.f32.mrf.mxu1 }
 0x174   : > { %v1636_v0 = vmax.f32 %v1627_v38, 0.0  ;;  %v1612_v3 = vadd.f32 %v1586_v59, %v1497_v39  ;;  %v1499_v1 = vadd.f32 %v1479_v63, %v1324_v10 }
 0x175   : > { %v5857_v7 = vpop.f32.mrf.mxu0  ;;  %v5839_v12 = vpop.f32.mrf.mxu1 }
 0x176   : > { %v1643_v46 = vpack.c.bf16 %v1636_v0, %v1635_v62  ;;  %v1628_v36 = vadd.f32 %v7297_v52, %v1612_v3  ;;  %v6593_v3 = vld [vmem:[%s8299_s3 + $0xe8] sm:$0xff]   ;;  %v7360_v12 = vld [vmem:[#allocation2] sm:$0xff] }
 0x177   : > { %v1589_v14 = vpop.f32.mrf.mxu0  ;;  %v1482_v8 = vpop.f32.mrf.mxu1 }
 0x178   : > { %v1649_v17 = vunpack.c.l.bf16 %v1643_v46  ;;  %v1650_v50 = vunpack.c.h.bf16 %v1643_v46  ;;  %v1613_v35 = vadd.f32 %v1589_v14, %v1498_v58  ;;  %v1637_v60 = vmax.f32 %v1628_v36, 0.0 }
 0x179   : > { %v5858_v41 = vpop.f32.mrf.mxu0  ;;  %v1717_v23 = vld [vmem:[#allocation2 + $0x9] sm:$0xff]  ;;  %v5840_v19 = vpop.f32.mrf.mxu1  ;;  %v1500_v4 = vadd.f32 %v1482_v8, %v1325_v9  ;;  %v1718_v27 = vld [vmem:[#allocation2 + $0x11] sm:$0xff] }
 0x17a   : > { %v1686_v2 = vld [vmem:[#allocation2 + $0x8] sm:$0xff]  ;;  %1672 = vst [vmem:[#allocation2 + $0x1c] sm:$0x1] %v1649_v17  ;;  %1673 = vst [vmem:[#allocation2 + $0x1d] sm:$0xfc] %v1649_v17  ;;  %v1629_v47 = vadd.f32 %v7297_v52, %v1613_v35  ;;  %v1726_v24 = vpack.c.bf16 %v1717_v23, %v1716_v15  ;;  %v1687_v49 = vld [vmem:[#allocation2 + $0x10] sm:$0xff] }
 0x17b   : > { %1674 = vst [vmem:[#allocation2 + $0x25] sm:$0x3] %v1650_v50  ;;  %1675 = vst [vmem:[#allocation2 + $0x26] sm:$0xf8] %v1650_v50  ;;  %v1695_v26 = vpack.c.bf16 %v1686_v2, %v7092_v28  ;;  %v1594_v30 = vpop.f32.mrf.mxu0  ;;  %v1487_v40 = vpop.f32.mrf.mxu1  ;;  %v6594_v50 = vld [vmem:[%s8299_s3 + $0x98] sm:$0xff]   ;;  %v6599_v9 = vld [vmem:[%s8299_s3 + $0x88] sm:$0xff]  }
 0x17c   : > { %v1638_v33 = vmax.f32 %v1629_v47, 0.0  ;;  %v1614_v42 = vadd.f32 %v1594_v30, %v1499_v1  ;;  %5884 = vmatmul.mubr.bf16.vlgmr.msra.gmra.mxu1 %v1726_v24  ;;  %v1501_v56 = vadd.f32 %v1487_v40, %v1326_v43  ;;  %v6596_v1 = vld [vmem:[%s8299_s3 + $0x90] sm:$0xff]   ;;  %v6597_v47 = vld [vmem:[%s8299_s3 + $0xd8] sm:$0xff]   ;;  %v6600_v40 = vld [vmem:[%s8299_s3 + $0xc8] sm:$0xff]  }
 0x17d   : > { %5920 = vmatmul.mubr.bf16.vlgmr.msra.gmra.mxu0 %v1695_v26  ;;  %5940 = vmatpush3.bf16.msra.mxu1 %v6587_v54  ;;  %v5861_v48 = vpop.f32.mrf.mxu0  ;;  %v5843_v18 = vpop.f32.mrf.mxu1  ;;  %v6598_v26 = vld [vmem:[%s8299_s3 + $0xd0] sm:$0xff]  }
 0x17e   : > { %5887 = vmatprep.mubr.msk.bf16.mxu1 %vm6728_vm2, %v7092_v28  ;;  %v1644_v25 = vpack.c.bf16 %v1638_v33, %v1637_v60  ;;  %5941 = vmatprep.subr.bf16.mxu1 %v7092_v28  ;;  %v1630_v20 = vadd.f32 %v7297_v52, %v1614_v42  ;;  %v6601_v42 = vld [vmem:[%s8299_s3 + $0x80] sm:$0xff]  }
 0x17f   : > { %5923 = vmatprep.mubr.msk.bf16.mxu0 %vm6728_vm2, %v7092_v28  ;;  %v1597_v16 = vpop.f32.mrf.mxu0  ;;  %5976 = vmatpush3.bf16.msra.mxu0 %v6589_v13  ;;  %v1490_v44 = vpop.f32.mrf.mxu1 }
 0x180   : > { %v1651_v34 = vunpack.c.l.bf16 %v1644_v25  ;;  %v1652_v11 = vunpack.c.h.bf16 %v1644_v25  ;;  %v1615_v29 = vadd.f32 %v1597_v16, %v1500_v4  ;;  %5977 = vmatprep.subr.bf16.mxu0 %v7092_v28  ;;  %v1639_v62 = vmax.f32 %v1630_v20, 0.0  ;;  %v6602_v25 = vld [vmem:[%s8299_s3 + $0xc0] sm:$0xff]  }
 0x181   : > { %v5862_v37 = vpop.f32.mrf.mxu0  ;;  %5942 = vmatpush3.bf16.msra.mxu1 %v6588_v55  ;;  %v1719_v45 = vld [vmem:[#allocation2 + $0x19] sm:$0xff]  ;;  %v5844_v59 = vpop.f32.mrf.mxu1  ;;  %v1990_v16 = vld [vmem:[#allocation2 + $0x2] sm:$0xff] }
 0x182   : > { %v1688_v57 = vld [vmem:[#allocation2 + $0x18] sm:$0xff]  ;;  %1676 = vst [vmem:[#allocation2 + $0x2e] ss:$5 sps:$4 sm:$0xf7] %v1651_v34   ;;  %v1631_v39 = vadd.f32 %v7297_v52, %v1615_v29  ;;  %v1727_v38 = vpack.c.bf16 %v1719_v45, %v1718_v27  ;;  %5943 = vmatprep.subr.bf16.mxu1 %v7092_v28  ;;  %v1720_v17 = vld [vmem:[#allocation2 + $0x21] sm:$0xff]  ;;  %v6607_v45 = vld [vmem:[%s8299_s3 + $0x170] sm:$0xff]  }
 0x183   : > { %1678 = vst [vmem:[#allocation2 + $0x37] ss:$5 sps:$4 sm:$0xef] %v1652_v11   ;;  %v1696_v53 = vpack.c.bf16 %v1688_v57, %v1687_v49  ;;  %v1602_v61 = vpop.f32.mrf.mxu0  ;;  %5978 = vmatpush3.bf16.msra.mxu0 %v6591_v51  ;;  %v1689_v8 = vld [vmem:[#allocation2 + $0x20] sm:$0xff]  ;;  %v1991_v51 = vld [vmem:[#allocation2 + $0xa] sm:$0xff]  ;;  %v2154_v34 = vld [vmem:[#allocation2 + $0x12] sm:$0xff] }
 0x184   : > { %v1640_v0 = vmax.f32 %v1631_v39, 0.0  ;;  %v1616_v63 = vadd.f32 %v1602_v61, %v1501_v56  ;;  %5888 = vmatmul.mubr.bf16.gmra.mxu1 %v1727_v38  ;;  %5979 = vmatprep.subr.bf16.mxu0 %v7360_v12  ;;  %v6603_v11 = vld [vmem:[%s8299_s3 + $0x138] sm:$0xff]   ;;  %v2000_v20 = vpack.c.bf16 %v1991_v51, %v1990_v16  ;;  %v2163_v29 = vpack.c.bf16 %v2154_v34, %v1991_v51  ;;  %v2156_v37 = vld [vmem:[#allocation2 + $0x22] sm:$0xff]  ;;  %v6628_v16 = vld [vmem:[%s8299_s3 + $0x190] sm:$0xff]  }
 0x185   : > { %5924 = vmatmul.mubr.bf16.gmra.mxu0 %v1696_v53  ;;  %5944 = vmatpush3.bf16.msra.mxu1 %v6590_v32  ;;  %v5865_v7 = vpop.f32.mrf.mxu0  ;;  %v6605_v27 = vld [vmem:[%s8299_s3 + $0x178] sm:$0xff]   ;;  %v6604_v32 = vld [vmem:[%s8299_s3 + $0x130] sm:$0xff]   ;;  %v6606_v49 = vld [vmem:[%s8299_s3 + $0x128] sm:$0xff]  }
 0x186   : > { %5891 = vmatprep.mubr.msk.bf16.mxu1 %vm6728_vm2, %v7092_v28  ;;  %v1645_v58 = vpack.c.bf16 %v1640_v0, %v1639_v62  ;;  %v1632_v46 = vadd.f32 %v7297_v52, %v1616_v63  ;;  %5945 = vmatprep.subr.bf16.mxu1 %v7360_v12  ;;  %v6595_v52 = vld [vmem:[%s8299_s3 + $0xe0] sm:$0xff]   ;;  %v6609_v39 = vld [vmem:[%s8299_s3 + $0x168] sm:$0xff]   ;;  %v6610_v61 = vld [vmem:[%s8299_s3 + $0x118] sm:$0xff]  }
 0x187   : > { %5927 = vmatprep.mubr.msk.bf16.mxu0 %vm6728_vm2, %v7360_v12  ;;  %v1605_v10 = vpop.f32.mrf.mxu0  ;;  %5980 = vmatpush3.bf16.msra.mxu0 %v6593_v3  ;;  %v1993_v44 = vld [vmem:[#allocation2 + $0x1a] sm:$0xff]  ;;  %v6612_v3 = vld [vmem:[%s8299_s3 + $0x110] sm:$0xff]  }
 0x188   : > { %v1653_v14 = vunpack.c.l.bf16 %v1645_v58  ;;  %v1654_v28 = vunpack.c.h.bf16 %v1645_v58  ;;  %v1641_v15 = vmax.f32 %v1632_v46, 0.0  ;;  %5981 = vmatprep.subr.bf16.mxu0 %v7360_v12  ;;  %v2001_v57 = vpack.c.bf16 %v1993_v44, %v2154_v34  ;;  %v6608_v38 = vld [vmem:[%s8299_s3 + $0x120] sm:$0xff]   ;;  %v6614_v46 = vld [vmem:[%s8299_s3 + $0x150] sm:$0xff]   ;;  %v6615_v10 = vld [vmem:[%s8299_s3 + $0x108] sm:$0xff]  }
 0x189   : > { %5946 = vmatpush3.bf16.msra.mxu1 %v6592_v5  ;;  %v1721_v36 = vld [vmem:[#allocation2 + $0x29] sm:$0xff]  ;;  %v5866_v21 = vpop.f32.mrf.mxu0  ;;  %v2164_v56 = vpack.c.bf16 %v2156_v37, %v1993_v44  ;;  %v6611_v62 = vld [vmem:[%s8299_s3 + $0x160] sm:$0xff]   ;;  %v6613_v5 = vld [vmem:[%s8299_s3 + $0x158] sm:$0xff]  }
 0x18a   : > { %v1690_v35 = vld [vmem:[#allocation2 + $0x28] sm:$0xff]  ;;  %1680 = vst [vmem:[#allocation2 + $0x40] sm:$0x1f] %v1653_v14  ;;  %1681 = vst [vmem:[#allocation2 + $0x41] sm:$0xc0] %v1653_v14  ;;  %v1646_v41 = vpack.c.bf16 %v1641_v15, %v1641_v15  ;;  %v1728_v23 = vpack.c.bf16 %v1721_v36, %v1720_v17  ;;  %5947 = vmatprep.subr.bf16.mxu1 %v7360_v12  ;;  %v1691_v19 = vld [vmem:[#allocation2 + $0x30] sm:$0xff] }
 0x18b   : > { %1682 = vst [vmem:[#allocation2 + $0x49] sm:$0x3f] %v1654_v28  ;;  %1683 = vst [vmem:[#allocation2 + $0x4a] sm:$0x80] %v1654_v28  ;;  %v1697_v2 = vpack.c.bf16 %v1690_v35, %v1689_v8  ;;  %5982 = vmatpush3.bf16.msra.mxu0 %v6595_v52  ;;  %v1692_v24 = vld [vmem:[#allocation2 + $0x38] sm:$0xff]  ;;  %v1995_v53 = vld [vmem:[#allocation2 + $0x2a] sm:$0xff] }
 0x18c   : > { %v1655_v54 = vunpack.c.l.bf16 %v1646_v41  ;;  %5892 = vmatmul.mubr.bf16.gmra.mxu1 %v1728_v23  ;;  %5983 = vmatprep.subr.bf16.mxu0 %v7360_v12  ;;  %v1722_v30 = vld [vmem:[#allocation2 + $0x31] sm:$0xff]  ;;  %v1698_v33 = vpack.c.bf16 %v1692_v24, %v1691_v19  ;;  %v2002_v0 = vpack.c.bf16 %v1995_v53, %v2156_v37  ;;  %v6616_v15 = vld [vmem:[%s8299_s3 + $0x148] sm:$0xff]   ;;  %v6617_v17 = vld [vmem:[%s8299_s3 + $0x100] sm:$0xff]  }
 0x18d   : > { %5928 = vmatmul.mubr.bf16.gmra.mxu0 %v1697_v2  ;;  %5948 = vmatpush3.bf16.msra.mxu1 %v6594_v50  ;;  %v2158_v59 = vld [vmem:[#allocation2 + $0x32] sm:$0xff]  ;;  %v6618_v36 = vld [vmem:[%s8299_s3 + $0x140] sm:$0xff]  }
 0x18e   : > { %1684 = vst [vmem:[#allocation2 + $0x52] sm:$0x7f] %v1655_v54  ;;  %5895 = vmatprep.mubr.msk.bf16.mxu1 %vm6728_vm2, %v7360_v12  ;;  %5931 = vmatprep.mubr.msk.bf16.mxu0 %vm6728_vm2, %v7360_v12  ;;  %v2165_v63 = vpack.c.bf16 %v2158_v59, %v1995_v53  ;;  %v2317_v21 = vld [vmem:[#allocation2 + $0x13] sm:$0xff]  ;;  %v2318_v22 = vld [vmem:[#allocation2 + $0x1b] sm:$0xff]  ;;  %v2319_v24 = vld [vmem:[#allocation2 + $0x23] sm:$0xff] }
 0x18f   : > { %5949 = vmatprep.subr.bf16.mxu1 %v7360_v12  ;;  %5984 = vmatpush3.bf16.msra.mxu0 %v6597_v47  ;;  %v2479_v41 = vld [vmem:[#allocation2 + $0xc] sm:$0xff]  ;;  %v7500_v23 = vld [vmem:[#allocation2 + $0x14] sm:$0xff]  ;;  %v2326_v54 = vpack.c.bf16 %v2317_v21, %v1647_v6  ;;  %v6634_v53 = vld [vmem:[%s8299_s3 + $0x1c0] sm:$0xff]  }
 0x190   : > { %5985 = vmatprep.subr.bf16.mxu0 %v7360_v12  ;;  %v6619_v2 = vld [vmem:[%s8299_s3 + $0x1b8] sm:$0xff]   ;;  %v6620_v19 = vld [vmem:[%s8299_s3 + $0x1b0] sm:$0xff]  }
 0x191   : > { %v1723_v13 = vld [vmem:[#allocation2 + $0x39] sm:$0xff]  ;;  %5950 = vmatpush3.bf16.msra.mxu1 %v6596_v1  ;;  %v1724_v31 = vld [vmem:[#allocation2 + $0x41] sm:$0xff]  ;;  %v2489_v1 = vpack.c.bf16 %v7500_v23, %v2479_v41  ;;  %v6623_v6 = vld [vmem:[%s8299_s3 + $0x1f0] sm:$0xff]  }
 0x192   : > { %v1729_v60 = vpack.c.bf16 %v1723_v13, %v1722_v30  ;;  %5951 = vmatprep.subr.bf16.mxu1 %v7360_v12  ;;  %v1725_v48 = vld [vmem:[#allocation2 + $0x49] sm:$0xff]  ;;  %v1693_v55 = vld [vmem:[#allocation2 + $0x40] sm:$0xff]  ;;  %v6621_v47 = vld [vmem:[%s8299_s3 + $0x1f8] sm:$0xff]  }
 0x193   : > { %5986 = vmatpush3.bf16.msra.mxu0 %v6598_v26  ;;  %v1694_v4 = vld [vmem:[#allocation2 + $0x48] sm:$0xff]  ;;  %v1730_v18 = vpack.c.bf16 %v1725_v48, %v1724_v31  ;;  %v1997_v7 = vld [vmem:[#allocation2 + $0x3a] sm:$0xff] }
 0x194   : > { %5896 = vmatmul.mubr.bf16.gmra.mxu1 %v1729_v60  ;;  %5987 = vmatprep.subr.bf16.mxu0 %v7360_v12  ;;  %v1699_v43 = vpack.c.bf16 %v1694_v4, %v1693_v55  ;;  %v2160_v58 = vld [vmem:[#allocation2 + $0x42] sm:$0xff]  ;;  %v2003_v14 = vpack.c.bf16 %v1997_v7, %v2158_v59  ;;  %v1999_v50 = vld [vmem:[#allocation2 + $0x4a] sm:$0xff]  ;;  %v2321_v31 = vld [vmem:[#allocation2 + $0x33] sm:$0xff] }
 0x195   : > { %5932 = vmatmul.mubr.bf16.gmra.mxu0 %v1698_v33  ;;  %5952 = vmatpush3.bf16.msra.mxu1 %v6599_v9  ;;  %v2166_v28 = vpack.c.bf16 %v2160_v58, %v1997_v7  ;;  %v2162_v52 = vld [vmem:[#allocation2 + $0x52] sm:$0xff]  ;;  %v2004_v8 = vpack.c.bf16 %v1999_v50, %v2160_v58  ;;  %v7522_v26 = vld [vmem:[#allocation2 + $0x1c] sm:$0xff]  ;;  %v7524_v30 = vld [vmem:[#allocation2 + $0x24] sm:$0xff]  ;;  %v2327_v9 = vpack.c.bf16 %v2319_v24, %v2318_v22 }
 0x196   : > { %5899 = vmatprep.mubr.msk.bf16.mxu1 %vm6728_vm2, %v7360_v12  ;;  %5935 = vmatprep.mubr.msk.bf16.mxu0 %vm6728_vm2, %v7360_v12  ;;  %v2167_v35 = vpack.c.bf16 %v2162_v52, %v1999_v50  ;;  %v6622_v13 = vld [vmem:[%s8299_s3 + $0x1a8] sm:$0xff]   ;;  %v2490_v60 = vpack.c.bf16 %v7524_v30, %v7522_v26  ;;  %v7546_v55 = vld [vmem:[#allocation2 + $0x34] sm:$0xff]  ;;  %v2814_v22 = vld [vmem:[#allocation2 + $0x5d] sm:$0xff] }
 0x197   : > { %5953 = vmatprep.subr.bf16.mxu1 %v7360_v12  ;;  %5988 = vmatpush3.bf16.msra.mxu0 %v6600_v40  ;;  %v6625_v33 = vld [vmem:[%s8299_s3 + $0x1e8] sm:$0xff]   ;;  %v6624_v40 = vld [vmem:[%s8299_s3 + $0x1a0] sm:$0xff]   ;;  %v6626_v4 = vld [vmem:[%s8299_s3 + $0x198] sm:$0xff]  }
 0x198   : > { %5989 = vmatprep.subr.bf16.mxu0 %v7360_v12  ;;  %v7544_v48 = vld [vmem:[#allocation2 + $0x2c] sm:$0xff]  ;;  %v6629_v51 = vld [vmem:[%s8299_s3 + $0x1d8] sm:$0xff]  }
 0x199   : > { %5954 = vmatpush3.bf16.msra.mxu1 %v6601_v42  ;;  %v2320_v42 = vld [vmem:[#allocation2 + $0x2b] sm:$0xff]  ;;  %v2322_v34 = vld [vmem:[#allocation2 + $0x3b] sm:$0xff] }
 0x19a   : > { %6011 = vmatprep.subr.bf16.mxu1 %v7360_v12  ;;  %v6636_v7 = vld [vmem:[%s8299_s3 + $0x230] sm:$0xff]   ;;  %v6639_v52 = vld [vmem:[%s8299_s3 + $0x218] sm:$0xff]   ;;  %v2811_v41 = vld [vmem:[#allocation2 + $0x45] sm:$0xff] }
 0x19b   : > { %5990 = vmatpush3.bf16.msra.mxu0 %v6602_v25  ;;  %v6627_v25 = vld [vmem:[%s8299_s3 + $0x1e0] sm:$0xff]   ;;  %v2808_v58 = vld [vmem:[#allocation2 + $0x2d] sm:$0xff]  ;;  %v2809_v50 = vld [vmem:[#allocation2 + $0x35] sm:$0xff] }
 0x19c   : > { %5900 = vmatmul.mubr.bf16.gmra.mxu1 %v1730_v18  ;;  %6047 = vmatprep.subr.bf16.mxu0 %v7360_v12  ;;  %v2328_v18 = vpack.c.bf16 %v2321_v31, %v2320_v42  ;;  %v2812_v21 = vld [vmem:[#allocation2 + $0x4d] sm:$0xff]  ;;  %v2972_v42 = vld [vmem:[#allocation2 + $0x36] sm:$0xff] }
 0x19d   : > { %5936 = vmatmul.mubr.bf16.gmra.mxu0 %v1699_v43  ;;  %5955 = vmatprep.mubr.msk.bf16.mxu1 %vm6728_vm2, %v7360_v12  ;;  %v2491_v43 = vpack.c.bf16 %v7546_v55, %v7544_v48 }
 0x19e   : > { %5991 = vmatprep.mubr.msk.bf16.mxu0 %vm6728_vm2, %v7360_v12 }
 0x1a4   : > { %5956 = vmatmul.mubr.bf16.vlgmr.msra.gmra.mxu1 %v2000_v20  ;;  %v7569_v20 = vld [vmem:[#allocation2 + $0x3c] sm:$0xff] }
 0x1a5   : > { %5992 = vmatmul.mubr.bf16.vlgmr.msra.gmra.mxu0 %v2163_v29  ;;  %6012 = vmatpush3.bf16.msra.mxu1 %v6603_v11  ;;  %v2323_v11 = vld [vmem:[#allocation2 + $0x43] sm:$0xff] }
 0x1a6   : > { %5959 = vmatprep.mubr.msk.bf16.mxu1 %vm6728_vm2, %v7360_v12  ;;  %6013 = vmatprep.subr.bf16.mxu1 %v7360_v12  ;;  %v7571_v29 = vld [vmem:[#allocation2 + $0x44] sm:$0xff]  ;;  %v2329_v44 = vpack.c.bf16 %v2323_v11, %v2322_v34 }
 0x1a7   : > { %5995 = vmatprep.mubr.msk.bf16.mxu0 %vm6728_vm2, %v7360_v12  ;;  %6048 = vmatpush3.bf16.msra.mxu0 %v6605_v27  ;;  %v6630_v27 = vld [vmem:[%s8299_s3 + $0x1d0] sm:$0xff]   ;;  %v2492_v37 = vpack.c.bf16 %v7571_v29, %v7569_v20 }
 0x1a8   : > { %6049 = vmatprep.subr.bf16.mxu0 %v7360_v12 }
 0x1a9   : > { %6014 = vmatpush3.bf16.msra.mxu1 %v6604_v32  ;;  %v6631_v32 = vld [vmem:[%s8299_s3 + $0x188] sm:$0xff]  }
 0x1aa   : > { %6015 = vmatprep.subr.bf16.mxu1 %v7360_v12 }
 0x1ab   : > { %6050 = vmatpush3.bf16.msra.mxu0 %v6607_v45  ;;  %v6632_v45 = vld [vmem:[%s8299_s3 + $0x1c8] sm:$0xff]  }
 0x1ac   : > { %5960 = vmatmul.mubr.bf16.gmra.mxu1 %v2001_v57  ;;  %6051 = vmatprep.subr.bf16.mxu0 %v7360_v12  ;;  %v2324_v57 = vld [vmem:[#allocation2 + $0x4b] sm:$0xff] }
 0x1ad   : > { %5996 = vmatmul.mubr.bf16.gmra.mxu0 %v2164_v56  ;;  %6016 = vmatpush3.bf16.msra.mxu1 %v6606_v49  ;;  %v6633_v49 = vld [vmem:[%s8299_s3 + $0x180] sm:$0xff]   ;;  %v2325_v56 = vld [vmem:[#allocation2 + $0x53] sm:$0xff] }
 0x1ae   : > { %5963 = vmatprep.mubr.msk.bf16.mxu1 %vm6728_vm2, %v7360_v12  ;;  %6017 = vmatprep.subr.bf16.mxu1 %v7360_v12  ;;  %v2330_v59 = vpack.c.bf16 %v2325_v56, %v2324_v57 }
 0x1af   : > { %5999 = vmatprep.mubr.msk.bf16.mxu0 %vm6728_vm2, %v7360_v12  ;;  %6052 = vmatpush3.bf16.msra.mxu0 %v6609_v39  ;;  %v7595_v39 = vld [vmem:[#allocation2 + $0x4c] sm:$0xff] }
 0x1b0   : > { %6053 = vmatprep.subr.bf16.mxu0 %v7360_v12 }
 0x1b1   : > { %6018 = vmatpush3.bf16.msra.mxu1 %v6608_v38  ;;  %v7597_v38 = vld [vmem:[#allocation2 + $0x54] sm:$0xff] }
 0x1b2   : > { %6019 = vmatprep.subr.bf16.mxu1 %v7360_v12 }
 0x1b3   : > { %6054 = vmatpush3.bf16.msra.mxu0 %v6611_v62  ;;  %v2805_v62 = vld [vmem:[#allocation2 + $0x15] sm:$0xff] }
 0x1b4   : > { %5964 = vmatmul.mubr.bf16.gmra.mxu1 %v2002_v0  ;;  %6055 = vmatprep.subr.bf16.mxu0 %v7360_v12  ;;  %v2806_v0 = vld [vmem:[#allocation2 + $0x1d] sm:$0xff] }
 0x1b5   : > { %6000 = vmatmul.mubr.bf16.gmra.mxu0 %v2165_v63  ;;  %6020 = vmatpush3.bf16.msra.mxu1 %v6610_v61  ;;  %v2493_v61 = vpack.c.bf16 %v7597_v38, %v7595_v39  ;;  %v6635_v63 = vld [vmem:[%s8299_s3 + $0x238] sm:$0xff]  }
 0x1b6   : > { %5967 = vmatprep.mubr.msk.bf16.mxu1 %vm6728_vm2, %v7360_v12  ;;  %6003 = vmatprep.mubr.msk.bf16.mxu0 %vm6728_vm2, %v7360_v12 }
 0x1b7   : > { %6021 = vmatprep.subr.bf16.mxu1 %v7360_v12  ;;  %6056 = vmatpush3.bf16.msra.mxu0 %v6613_v5  ;;  %v2815_v5 = vpack.c.bf16 %v2806_v0, %v2805_v62 }
 0x1b8   : > { %6057 = vmatprep.subr.bf16.mxu0 %v7360_v12 }
 0x1b9   : > { %6022 = vmatpush3.bf16.msra.mxu1 %v6612_v3  ;;  %v2652_v3 = vpack.c.bf16 %v7522_v26, %v7500_v23  ;;  %v6641_v23 = vld [vmem:[%s8299_s3 + $0x208] sm:$0xff]   ;;  %v2968_v26 = vld [vmem:[#allocation2 + $0x16] sm:$0xff] }
 0x1ba   : > { %6023 = vmatprep.subr.bf16.mxu1 %v7360_v12 }
 0x1bb   : > { %6058 = vmatpush3.bf16.msra.mxu0 %v6614_v46  ;;  %v2807_v46 = vld [vmem:[#allocation2 + $0x25] sm:$0xff] }
 0x1bc   : > { %5968 = vmatmul.mubr.bf16.gmra.mxu1 %v2003_v14  ;;  %6059 = vmatprep.subr.bf16.mxu0 %v7360_v12  ;;  %v2653_v14 = vpack.c.bf16 %v7544_v48, %v7524_v30  ;;  %v2969_v30 = vld [vmem:[#allocation2 + $0x1e] sm:$0xff]  ;;  %v2975_v48 = vld [vmem:[#allocation2 + $0x4e] sm:$0xff] }
 0x1bd   : > { %6004 = vmatmul.mubr.bf16.gmra.mxu0 %v2166_v28  ;;  %6024 = vmatpush3.bf16.msra.mxu1 %v6615_v10  ;;  %v6637_v10 = vld [vmem:[%s8299_s3 + $0x228] sm:$0xff]   ;;  %v2816_v28 = vpack.c.bf16 %v2808_v58, %v2807_v46  ;;  %v6643_v58 = vld [vmem:[%s8301_s5 + $0x78] sm:$0xff]  }
 0x1be   : > { %5971 = vmatprep.mubr.msk.bf16.mxu1 %vm6728_vm2, %v7360_v12  ;;  %6007 = vmatprep.mubr.msk.bf16.mxu0 %vm6728_vm2, %v7360_v12 }
 0x1bf   : > { %6025 = vmatprep.subr.bf16.mxu1 %v7360_v12  ;;  %6060 = vmatpush3.bf16.msra.mxu0 %v6616_v15  ;;  %v6638_v15 = vld [vmem:[%s8299_s3 + $0x220] sm:$0xff]  }
 0x1c0   : > { %6061 = vmatprep.subr.bf16.mxu0 %v7360_v12 }
 0x1c1   : > { %6026 = vmatpush3.bf16.msra.mxu1 %v6617_v17  ;;  %v2810_v17 = vld [vmem:[#allocation2 + $0x3d] sm:$0xff] }
 0x1c2   : > { %6083 = vmatprep.subr.bf16.mxu1 %v7360_v12 }
 0x1c3   : > { %6062 = vmatpush3.bf16.msra.mxu0 %v6618_v36  ;;  %v2654_v36 = vpack.c.bf16 %v7569_v20, %v7546_v55  ;;  %v2974_v55 = vld [vmem:[#allocation2 + $0x46] sm:$0xff] }
 0x1c4   : > { %5972 = vmatmul.mubr.bf16.gmra.mxu1 %v2004_v8  ;;  %6119 = vmatprep.subr.bf16.mxu0 %v7360_v12  ;;  %v2817_v8 = vpack.c.bf16 %v2810_v17, %v2809_v50  ;;  %v6644_v17 = vld [vmem:[%s8301_s5 + $0x70] sm:$0xff]  }
 0x1c5   : > { %6008 = vmatmul.mubr.bf16.gmra.mxu0 %v2167_v35  ;;  %6027 = vmatprep.mubr.msk.bf16.mxu1 %vm6728_vm2, %v7360_v12  ;;  %v6640_v35 = vld [vmem:[%s8299_s3 + $0x210] sm:$0xff]  }
 0x1c6   : > { %6063 = vmatprep.mubr.msk.bf16.mxu0 %vm6728_vm2, %v7360_v12 }
 0x1cc   : > { %6028 = vmatmul.mubr.bf16.vlgmr.msra.gmra.mxu1 %v2326_v54  ;;  %v2818_v54 = vpack.c.bf16 %v2812_v21, %v2811_v41  ;;  %v6645_v21 = vld [vmem:[%s8301_s5 + $0x38] sm:$0xff]   ;;  %v6646_v41 = vld [vmem:[%s8301_s5 + $0x68] sm:$0xff]  }
 0x1cd   : > { %6064 = vmatmul.mubr.bf16.vlgmr.msra.gmra.mxu0 %v2489_v1  ;;  %6084 = vmatpush3.bf16.msra.mxu1 %v6619_v2  ;;  %v2655_v2 = vpack.c.bf16 %v7595_v39, %v7571_v29  ;;  %v6642_v1 = vld [vmem:[%s8299_s3 + $0x200] sm:$0xff]  }
 0x1ce   : > { %6031 = vmatprep.mubr.msk.bf16.mxu1 %vm6728_vm2, %v7360_v12  ;;  %6085 = vmatprep.subr.bf16.mxu1 %v7360_v12 }
 0x1cf   : > { %6067 = vmatprep.mubr.msk.bf16.mxu0 %vm6728_vm2, %v7360_v12  ;;  %6120 = vmatpush3.bf16.msra.mxu0 %v6621_v47  ;;  %v2651_v47 = vld [vmem:[#allocation2 + $0x5c] sm:$0xff] }
 0x1d0   : > { %6121 = vmatprep.subr.bf16.mxu0 %v7360_v12 }
 0x1d1   : > { %6086 = vmatpush3.bf16.msra.mxu1 %v6620_v19  ;;  %v2813_v19 = vld [vmem:[#allocation2 + $0x55] sm:$0xff] }
 0x1d2   : > { %6087 = vmatprep.subr.bf16.mxu1 %v7360_v12  ;;  %v2819_v24 = vpack.c.bf16 %v2814_v22, %v2813_v19  ;;  %v6647_v19 = vld [vmem:[%s8301_s5 + $0x30] sm:$0xff]  }
 0x1d3   : > { %6122 = vmatpush3.bf16.msra.mxu0 %v6623_v6  ;;  %v2656_v6 = vpack.c.bf16 %v2651_v47, %v7597_v38 }
 0x1d4   : > { %6032 = vmatmul.mubr.bf16.gmra.mxu1 %v2327_v9  ;;  %6123 = vmatprep.subr.bf16.mxu0 %v7360_v12  ;;  %v2971_v9 = vld [vmem:[#allocation2 + $0x2e] sm:$0xff] }
 0x1d5   : > { %6068 = vmatmul.mubr.bf16.gmra.mxu0 %v2490_v60  ;;  %6088 = vmatpush3.bf16.msra.mxu1 %v6622_v13  ;;  %v2978_v13 = vpack.c.bf16 %v2969_v30, %v2968_v26  ;;  %v2970_v60 = vld [vmem:[#allocation2 + $0x26] sm:$0xff] }
 0x1d6   : > { %6035 = vmatprep.mubr.msk.bf16.mxu1 %vm6728_vm2, %v7360_v12  ;;  %6089 = vmatprep.subr.bf16.mxu1 %v7360_v12 }
 0x1d7   : > { %6071 = vmatprep.mubr.msk.bf16.mxu0 %vm6728_vm2, %v7360_v12  ;;  %6124 = vmatpush3.bf16.msra.mxu0 %v6625_v33  ;;  %v2979_v33 = vpack.c.bf16 %v2971_v9, %v2970_v60 }
 0x1d8   : > { %6125 = vmatprep.subr.bf16.mxu0 %v7360_v12 }
 0x1d9   : > { %6090 = vmatpush3.bf16.msra.mxu1 %v6624_v40  ;;  %v2973_v40 = vld [vmem:[#allocation2 + $0x3e] sm:$0xff] }
 0x1da   : > { %6091 = vmatprep.subr.bf16.mxu1 %v7360_v12  ;;  %v2980_v31 = vpack.c.bf16 %v2973_v40, %v2972_v42  ;;  %v6649_v40 = vld [vmem:[%s8301_s5 + $0x28] sm:$0xff]  }
 0x1db   : > { %6126 = vmatpush3.bf16.msra.mxu0 %v6627_v25  ;;  %v2976_v25 = vld [vmem:[#allocation2 + $0x56] sm:$0xff] }
 0x1dc   : > { %6036 = vmatmul.mubr.bf16.gmra.mxu1 %v2328_v18  ;;  %6127 = vmatprep.subr.bf16.mxu0 %v7360_v12  ;;  %v2977_v18 = vld [vmem:[#allocation2 + $0x5e] sm:$0xff] }
 0x1dd   : > { %6072 = vmatmul.mubr.bf16.gmra.mxu0 %v2491_v43  ;;  %6092 = vmatpush3.bf16.msra.mxu1 %v6626_v4  ;;  %v2981_v4 = vpack.c.bf16 %v2975_v48, %v2974_v55  ;;  %v2982_v43 = vpack.c.bf16 %v2977_v18, %v2976_v25 }
 0x1de   : > { %6039 = vmatprep.mubr.msk.bf16.mxu1 %vm6728_vm2, %v7360_v12  ;;  %6075 = vmatprep.mubr.msk.bf16.mxu0 %vm6728_vm2, %v7360_v12 }
 0x1df   : > { %6093 = vmatprep.subr.bf16.mxu1 %v7360_v12  ;;  %6128 = vmatpush3.bf16.msra.mxu0 %v6629_v51 }
 0x1e0   : > { %6129 = vmatprep.subr.bf16.mxu0 %v7360_v12 }
 0x1e1   : > { %6094 = vmatpush3.bf16.msra.mxu1 %v6628_v16 }
 0x1e2   : > { %6095 = vmatprep.subr.bf16.mxu1 %v7360_v12 }
 0x1e3   : > { %6130 = vmatpush3.bf16.msra.mxu0 %v6630_v27 }
 0x1e4   : > { %6040 = vmatmul.mubr.bf16.gmra.mxu1 %v2329_v44  ;;  %6131 = vmatprep.subr.bf16.mxu0 %v7360_v12 }
 0x1e5   : > { %6076 = vmatmul.mubr.bf16.gmra.mxu0 %v2492_v37  ;;  %6096 = vmatpush3.bf16.msra.mxu1 %v6631_v32 }
 0x1e6   : > { %6043 = vmatprep.mubr.msk.bf16.mxu1 %vm6728_vm2, %v7360_v12  ;;  %6079 = vmatprep.mubr.msk.bf16.mxu0 %vm6728_vm2, %v7360_v12 }
 0x1e7   : > { %6097 = vmatprep.subr.bf16.mxu1 %v7360_v12  ;;  %6132 = vmatpush3.bf16.msra.mxu0 %v6632_v45 }
 0x1e8   : > { %6133 = vmatprep.subr.bf16.mxu0 %v7360_v12 }
 0x1e9   : > { %6098 = vmatpush3.bf16.msra.mxu1 %v6633_v49 }
 0x1ea   : > { %6155 = vmatprep.subr.bf16.mxu1 %v7360_v12 }
 0x1eb   : > { %6134 = vmatpush3.bf16.msra.mxu0 %v6634_v53 }
 0x1ec   : > { %6044 = vmatmul.mubr.bf16.gmra.mxu1 %v2330_v59  ;;  %6191 = vmatprep.subr.bf16.mxu0 %v7360_v12 }
 0x1ed   : > { %6080 = vmatmul.mubr.bf16.gmra.mxu0 %v2493_v61  ;;  %6099 = vmatprep.mubr.msk.bf16.mxu1 %vm6728_vm2, %v7360_v12 }
 0x1ee   : > { %6135 = vmatprep.mubr.msk.bf16.mxu0 %vm6728_vm2, %v7360_v12 }
 0x1f4   : > { %6100 = vmatmul.mubr.bf16.vlgmr.msra.gmra.mxu1 %v2652_v3 }
 0x1f5   : > { %6136 = vmatmul.mubr.bf16.vlgmr.msra.gmra.mxu0 %v2815_v5  ;;  %6156 = vmatpush3.bf16.msra.mxu1 %v6635_v63 }
 0x1f6   : > { %6103 = vmatprep.mubr.msk.bf16.mxu1 %vm6728_vm2, %v7360_v12  ;;  %6157 = vmatprep.subr.bf16.mxu1 %v7360_v12 }
 0x1f7   : > { %6139 = vmatprep.mubr.msk.bf16.mxu0 %vm6728_vm2, %v7360_v12  ;;  %6192 = vmatpush3.bf16.msra.mxu0 %v6643_v58  ;;  %v6655_v58 = vld [vmem:[%s8301_s5 + $0x48] sm:$0xff]  }
 0x1f8   : > { %6193 = vmatprep.subr.bf16.mxu0 %v7360_v12 }
 0x1f9   : > { %6158 = vmatpush3.bf16.msra.mxu1 %v6636_v7 }
 0x1fa   : > { %6159 = vmatprep.subr.bf16.mxu1 %v7360_v12 }
 0x1fb   : > { %6194 = vmatpush3.bf16.msra.mxu0 %v6644_v17 }
 0x1fc   : > { %6104 = vmatmul.mubr.bf16.gmra.mxu1 %v2653_v14  ;;  %6195 = vmatprep.subr.bf16.mxu0 %v7360_v12 }
 0x1fd   : > { %6140 = vmatmul.mubr.bf16.gmra.mxu0 %v2816_v28  ;;  %6160 = vmatpush3.bf16.msra.mxu1 %v6637_v10 }
 0x1fe   : > { %6107 = vmatprep.mubr.msk.bf16.mxu1 %vm6728_vm2, %v7360_v12  ;;  %6161 = vmatprep.subr.bf16.mxu1 %v7360_v12 }
 0x1ff   : > { %6143 = vmatprep.mubr.msk.bf16.mxu0 %vm6728_vm2, %v7360_v12  ;;  %6196 = vmatpush3.bf16.msra.mxu0 %v6646_v41 }
 0x200   : > { %6197 = vmatprep.subr.bf16.mxu0 %v7360_v12 }
 0x201   : > { %6162 = vmatpush3.bf16.msra.mxu1 %v6638_v15 }
 0x202   : > { %6163 = vmatprep.subr.bf16.mxu1 %v7360_v12 }
 0x204   : > { %6108 = vmatmul.mubr.bf16.gmra.mxu1 %v2654_v36 }
 0x205   : > { %6144 = vmatmul.mubr.bf16.gmra.mxu0 %v2817_v8  ;;  %6164 = vmatpush3.bf16.msra.mxu1 %v6639_v52 }
 0x206   : > { %6111 = vmatprep.mubr.msk.bf16.mxu1 %vm6728_vm2, %v7360_v12  ;;  %6147 = vmatprep.mubr.msk.bf16.mxu0 %vm6728_vm2, %v7360_v12 }
 0x207   : > { %6165 = vmatprep.subr.bf16.mxu1 %v7360_v12 }
 0x209   : > { %6166 = vmatpush3.bf16.msra.mxu1 %v6640_v35 }
 0x20a   : > { %6167 = vmatprep.subr.bf16.mxu1 %v7360_v12 }
 0x20c   : > { %6112 = vmatmul.mubr.bf16.gmra.mxu1 %v2655_v2 }
 0x20d   : > { %6148 = vmatmul.mubr.bf16.gmra.mxu0 %v2818_v54  ;;  %6168 = vmatpush3.bf16.msra.mxu1 %v6641_v23 }
 0x20e   : > { %6115 = vmatprep.mubr.msk.bf16.mxu1 %vm6728_vm2, %v7360_v12  ;;  %6151 = vmatprep.mubr.msk.bf16.mxu0 %vm6728_vm2, %v7360_v12 }
 0x20f   : > { %6169 = vmatprep.subr.bf16.mxu1 %v7360_v12 }
 0x211   : > { %6170 = vmatpush3.bf16.msra.mxu1 %v6642_v1 }
 0x212   : > { %6227 = vmatprep.subr.bf16.mxu1 %v7360_v12 }
 0x214   : > { %6116 = vmatmul.mubr.bf16.gmra.mxu1 %v2656_v6 }
 0x215   : > { %6152 = vmatmul.mubr.bf16.gmra.mxu0 %v2819_v24  ;;  %6171 = vmatprep.mubr.msk.bf16.mxu1 %vm6728_vm2, %v7360_v12 }
 0x216   : > { %6207 = vmatprep.mubr.msk.bf16.mxu0 %vm6728_vm2, %v7360_v12 }
 0x21c   : > { %6172 = vmatmul.mubr.bf16.vlgmr.msra.gmra.mxu1 %v2978_v13 }
 0x21d   : > { %6175 = vmatprep.mubr.msk.bf16.mxu1 %vm6728_vm2, %v7360_v12  ;;  %6228 = vmatpush3.bf16.msra.mxu1 %v6645_v21 }
 0x21e   : > { %6229 = vmatprep.subr.bf16.mxu1 %v7360_v12 }
 0x221   : > { %6230 = vmatpush3.bf16.msra.mxu1 %v6647_v19 }
 0x222   : > { %6231 = vmatprep.subr.bf16.mxu1 %v7360_v12 }
 0x224   : > { %6176 = vmatmul.mubr.bf16.gmra.mxu1 %v2979_v33  ;;  %v6648_v33 = vld [vmem:[%s8301_s5 + $0x60] sm:$0xff]  }
 0x225   : > { %6179 = vmatprep.mubr.msk.bf16.mxu1 %vm6728_vm2, %v7360_v12  ;;  %6198 = vmatpush3.bf16.msra.mxu0 %v6648_v33 }
 0x226   : > { %6232 = vmatpush3.bf16.msra.mxu1 %v6649_v40  ;;  %6199 = vmatprep.subr.bf16.mxu0 %v7360_v12 }
 0x227   : > { %6233 = vmatprep.subr.bf16.mxu1 %v7360_v12 }
 0x22c   : > { %6180 = vmatmul.mubr.bf16.gmra.mxu1 %v2980_v31 }
 0x22d   : > { %6183 = vmatprep.mubr.msk.bf16.mxu1 %vm6728_vm2, %v7360_v12 }
 0x234   : > { %6184 = vmatmul.mubr.bf16.gmra.mxu1 %v2981_v4 }
 0x235   : > { %6187 = vmatprep.mubr.msk.bf16.mxu1 %vm6728_vm2, %v7360_v12 }
 0x23c   : > { %v1830_v16 = vpop.f32.mrf.mxu1  ;;  %6188 = vmatmul.mubr.bf16.gmra.mxu1 %v2982_v43 }
 0x23d   : > { %v1951_v51 = vpop.f32.mrf.mxu0  ;;  %6243 = vmatprep.mubr.msk.bf16.mxu1 %vm6728_vm2, %v7360_v12 }
 0x23e   : > { %v7682_v34 = vadd.f32 %v1951_v51, %v1830_v16  ;;  %v5885_v11 = vpop.f32.mrf.mxu1  ;;  %v6651_v16 = vld [vmem:[%s8301_s5 + $0x20] sm:$0xff]  }
 0x23f   : > { %v5921_v20 = vpop.f32.mrf.mxu0  ;;  %6234 = vmatpush3.bf16.msra.mxu1 %v6651_v16 }
 0x240   : > { %v1833_v29 = vpop.f32.mrf.mxu1  ;;  %6235 = vmatprep.subr.bf16.mxu1 %v7360_v12 }
 0x241   : > { %v1954_v27 = vpop.f32.mrf.mxu0 }
 0x242   : > { %v7686_v32 = vadd.f32 %v1954_v27, %v1833_v29  ;;  %v5886_v44 = vpop.f32.mrf.mxu1 }
 0x243   : > { %v5922_v37 = vpop.f32.mrf.mxu0 }
 0x244   : > { %v1838_v45 = vpop.f32.mrf.mxu1  ;;  %v6653_v37 = vld [vmem:[%s8301_s5 + $0x18] sm:$0xff]  }
 0x245   : > { %v1959_v49 = vpop.f32.mrf.mxu0  ;;  %6236 = vmatpush3.bf16.msra.mxu1 %v6653_v37 }
 0x246   : > { %v7688_v57 = vadd.f32 %v1959_v49, %v1838_v45  ;;  %v5889_v56 = vpop.f32.mrf.mxu1  ;;  %6237 = vmatprep.subr.bf16.mxu1 %v7360_v12 }
 0x247   : > { %v5925_v39 = vpop.f32.mrf.mxu0 }
 0x248   : > { %v1841_v38 = vpop.f32.mrf.mxu1 }
 0x249   : > { %v1962_v53 = vpop.f32.mrf.mxu0 }
 0x24a   : > { %v7690_v59 = vadd.f32 %v1962_v53, %v1841_v38  ;;  %v5890_v61 = vpop.f32.mrf.mxu1 }
 0x24b   : > { %v5926_v62 = vpop.f32.mrf.mxu0  ;;  %v6654_v61 = vld [vmem:[%s8301_s5 + $0x10] sm:$0xff]  }
 0x24c   : > { %v1846_v0 = vpop.f32.mrf.mxu1  ;;  %6238 = vmatpush3.bf16.msra.mxu1 %v6654_v61 }
 0x24d   : > { %v1967_v63 = vpop.f32.mrf.mxu0  ;;  %6239 = vmatprep.subr.bf16.mxu1 %v7360_v12 }
 0x24e   : > { %v7692_v3 = vadd.f32 %v1967_v63, %v1846_v0  ;;  %v5893_v5 = vpop.f32.mrf.mxu1 }
 0x24f   : > { %v5929_v7 = vpop.f32.mrf.mxu0 }
 0x250   : > { %v1849_v46 = vpop.f32.mrf.mxu1 }
 0x251   : > { %v1970_v10 = vpop.f32.mrf.mxu0 }
 0x252   : > { %v7697_v14 = vadd.f32 %v1970_v10, %v1849_v46  ;;  %v5894_v28 = vpop.f32.mrf.mxu1  ;;  %v6656_v46 = vld [vmem:[%s8301_s5 + $0x8] sm:$0xff]  }
 0x253   : > { %v5930_v15 = vpop.f32.mrf.mxu0  ;;  %6240 = vmatpush3.bf16.msra.mxu1 %v6656_v46 }
 0x254   : > { %v1854_v50 = vpop.f32.mrf.mxu1  ;;  %6241 = vmatprep.subr.bf16.mxu1 %v7360_v12 }
 0x255   : > { %v1975_v52 = vpop.f32.mrf.mxu0 }
 0x256   : > { %v7703_v36 = vadd.f32 %v1975_v52, %v1854_v50  ;;  %v5897_v8 = vpop.f32.mrf.mxu1  ;;  %v6657_v52 = vld [vmem:[%s8301_s5 + $0x40] sm:$0xff]  }
 0x257   : > { %v5933_v35 = vpop.f32.mrf.mxu0  ;;  %v6658_v8 = vld [vmem:[%s8301_s5] sm:$0xff]  }
 0x258   : > { %v1857_v23 = vpop.f32.mrf.mxu1  ;;  %6242 = vmatpush3.bf16.msra.mxu1 %v6658_v8 }
 0x259   : > { %v1978_v2 = vpop.f32.mrf.mxu0  ;;  %6299 = vmatprep.subr.bf16.mxu1 %v7360_v12 }
 0x25a   : > { %v7712_v54 = vadd.f32 %v1978_v2, %v1857_v23  ;;  %v5898_v1 = vpop.f32.mrf.mxu1 }
 0x25b   : > { %v5934_v47 = vpop.f32.mrf.mxu0 }
 0x25c   : > { %v1862_v22 = vpop.f32.mrf.mxu1 }
 0x25d   : > { %v1983_v6 = vpop.f32.mrf.mxu0 }
 0x25e   : > { %v7719_v24 = vadd.f32 %v1983_v6, %v1862_v22  ;;  %v5901_v26 = vpop.f32.mrf.mxu1 }
 0x25f   : > { %v5937_v30 = vpop.f32.mrf.mxu0 }
 0x260   : > { %v1865_v13 = vpop.f32.mrf.mxu1 }
 0x261   : > { %v1986_v9 = vpop.f32.mrf.mxu0 }
 0x262   : > { %v7722_v60 = vadd.f32 %v1986_v9, %v1865_v13  ;;  %v5902_v42 = vpop.f32.mrf.mxu1 }
 0x263   : > { %v5938_v31 = vpop.f32.mrf.mxu0 }
 0x264   : > { %v2104_v48 = vpop.f32.mrf.mxu1 }
 0x265   : > { %v2267_v55 = vpop.f32.mrf.mxu0  ;;  %v2143_v4 = vadd.f32 %v2104_v48, %v7682_v34  ;;  %v6650_v34 = vld [vmem:[%s8301_s5 + $0x58] sm:$0xff]  }
 0x266   : > { %v5957_v25 = vpop.f32.mrf.mxu1  ;;  %6200 = vmatpush3.bf16.msra.mxu0 %v6650_v34 }
 0x267   : > { %v5993_v18 = vpop.f32.mrf.mxu0  ;;  %v7733_v43 = vadd.f32 %v2267_v55, %v2143_v4  ;;  %6201 = vmatprep.subr.bf16.mxu0 %v7360_v12 }
 0x268   : > { %v2107_v51 = vpop.f32.mrf.mxu1 }
 0x269   : > { %v2270_v11 = vpop.f32.mrf.mxu0  ;;  %v2144_v20 = vadd.f32 %v2107_v51, %v7686_v32  ;;  %v6652_v32 = vld [vmem:[%s8301_s5 + $0x50] sm:$0xff]  }
 0x26a   : > { %v5958_v29 = vpop.f32.mrf.mxu1  ;;  %6202 = vmatpush3.bf16.msra.mxu0 %v6652_v32 }
 0x26b   : > { %v5994_v27 = vpop.f32.mrf.mxu0  ;;  %v7740_v44 = vadd.f32 %v2270_v11, %v2144_v20  ;;  %6203 = vmatprep.subr.bf16.mxu0 %v7360_v12 }
 0x26c   : > { %v2112_v45 = vpop.f32.mrf.mxu1 }
 0x26d   : > { %v2275_v49 = vpop.f32.mrf.mxu0  ;;  %v2145_v56 = vadd.f32 %v2112_v45, %v7688_v57 }
 0x26e   : > { %v5961_v39 = vpop.f32.mrf.mxu1  ;;  %6204 = vmatpush3.bf16.msra.mxu0 %v6655_v58 }
 0x26f   : > { %v5997_v38 = vpop.f32.mrf.mxu0  ;;  %v7754_v53 = vadd.f32 %v2275_v49, %v2145_v56  ;;  %6205 = vmatprep.subr.bf16.mxu0 %v7360_v12 }
 0x270   : > { %v2115_v62 = vpop.f32.mrf.mxu1 }
 0x271   : > { %v2278_v57 = vpop.f32.mrf.mxu0  ;;  %v2146_v0 = vadd.f32 %v2115_v62, %v7690_v59 }
 0x272   : > { %v5962_v63 = vpop.f32.mrf.mxu1  ;;  %6206 = vmatpush3.bf16.msra.mxu0 %v6657_v52 }
 0x273   : > { %v5998_v5 = vpop.f32.mrf.mxu0  ;;  %v7762_v7 = vadd.f32 %v2278_v57, %v2146_v0  ;;  %6263 = vmatprep.subr.bf16.mxu0 %v7360_v12 }
 0x274   : > { %v2120_v10 = vpop.f32.mrf.mxu1 }
 0x275   : > { %v2283_v59 = vpop.f32.mrf.mxu0  ;;  %v2147_v28 = vadd.f32 %v2120_v10, %v7692_v3 }
 0x276   : > { %v5965_v15 = vpop.f32.mrf.mxu1 }
 0x277   : > { %v6001_v17 = vpop.f32.mrf.mxu0  ;;  %v7773_v50 = vadd.f32 %v2283_v59, %v2147_v28 }
 0x278   : > { %v2123_v35 = vpop.f32.mrf.mxu1 }
 0x279   : > { %v2286_v3 = vpop.f32.mrf.mxu0  ;;  %v2148_v21 = vadd.f32 %v2123_v35, %v7697_v14 }
 0x27a   : > { %v5966_v41 = vpop.f32.mrf.mxu1 }
 0x27b   : > { %v6002_v23 = vpop.f32.mrf.mxu0  ;;  %v2311_v2 = vadd.f32 %v2286_v3, %v2148_v21 }
 0x27c   : > { %v2128_v1 = vpop.f32.mrf.mxu1 }
 0x27d   : > { %v2291_v47 = vpop.f32.mrf.mxu0  ;;  %v2149_v19 = vadd.f32 %v2128_v1, %v7703_v36 }
 0x27e   : > { %v5969_v22 = vpop.f32.mrf.mxu1 }
 0x27f   : > { %v6005_v6 = vpop.f32.mrf.mxu0  ;;  %v2312_v26 = vadd.f32 %v2291_v47, %v2149_v19 }
 0x280   : > { %v2131_v30 = vpop.f32.mrf.mxu1 }
 0x281   : > { %v2294_v13 = vpop.f32.mrf.mxu0  ;;  %v2150_v14 = vadd.f32 %v2131_v30, %v7712_v54 }
 0x282   : > { %v5970_v9 = vpop.f32.mrf.mxu1 }
 0x283   : > { %v6006_v33 = vpop.f32.mrf.mxu0  ;;  %v2313_v40 = vadd.f32 %v2294_v13, %v2150_v14 }
 0x284   : > { %v2136_v42 = vpop.f32.mrf.mxu1 }
 0x285   : > { %v2299_v31 = vpop.f32.mrf.mxu0  ;;  %v2151_v48 = vadd.f32 %v2136_v42, %v7719_v24 }
 0x286   : > { %v5973_v12 = vpop.f32.mrf.mxu1 }
 0x287   : > { %v6009_v55 = vpop.f32.mrf.mxu0  ;;  %v2314_v4 = vadd.f32 %v2299_v31, %v2151_v48 }
 0x288   : > { %v2139_v25 = vpop.f32.mrf.mxu1 }
 0x289   : > { %v2302_v18 = vpop.f32.mrf.mxu0  ;;  %v2152_v36 = vadd.f32 %v2139_v25, %v7722_v60 }
 0x28a   : > { %v5974_v16 = vpop.f32.mrf.mxu1 }
 0x28b   : > { %v6010_v51 = vpop.f32.mrf.mxu0  ;;  %v2315_v11 = vadd.f32 %v2302_v18, %v2152_v36 }
 0x28c   : > { %v2430_v20 = vpop.f32.mrf.mxu1 }
 0x28d   : > { %v2593_v29 = vpop.f32.mrf.mxu0  ;;  %v2469_v54 = vadd.f32 %v2430_v20, %v7733_v43 }
 0x28e   : > { %v6029_v27 = vpop.f32.mrf.mxu1 }
 0x28f   : > { %v6065_v34 = vpop.f32.mrf.mxu0  ;;  %v7789_v37 = vadd.f32 %v2593_v29, %v2469_v54 }
 0x290   : > { %v2433_v45 = vpop.f32.mrf.mxu1 }
 0x291   : > { %v2596_v24 = vpop.f32.mrf.mxu0  ;;  %v2470_v49 = vadd.f32 %v2433_v45, %v7740_v44 }
 0x292   : > { %v6030_v56 = vpop.f32.mrf.mxu1 }
 0x293   : > { %v6066_v32 = vpop.f32.mrf.mxu0  ;;  %v7792_v39 = vadd.f32 %v2596_v24, %v2470_v49 }
 0x294   : > { %v2438_v60 = vpop.f32.mrf.mxu1 }
 0x295   : > { %v2601_v38 = vpop.f32.mrf.mxu0  ;;  %v2471_v61 = vadd.f32 %v2438_v60, %v7754_v53 }
 0x296   : > { %v6033_v62 = vpop.f32.mrf.mxu1 }
 0x297   : > { %v6069_v57 = vpop.f32.mrf.mxu0  ;;  %v7795_v0 = vadd.f32 %v2601_v38, %v2471_v61 }
 0x298   : > { %v2441_v43 = vpop.f32.mrf.mxu1 }
 0x299   : > { %v2604_v63 = vpop.f32.mrf.mxu0  ;;  %v2472_v5 = vadd.f32 %v2441_v43, %v7762_v7 }
 0x29a   : > { %v6034_v58 = vpop.f32.mrf.mxu1 }
 0x29b   : > { %v6070_v46 = vpop.f32.mrf.mxu0  ;;  %v7798_v10 = vadd.f32 %v2604_v63, %v2472_v5 }
 0x29c   : > { %v2446_v44 = vpop.f32.mrf.mxu1 }
 0x29d   : > { %v2609_v59 = vpop.f32.mrf.mxu0  ;;  %v2473_v28 = vadd.f32 %v2446_v44, %v7773_v50 }
 0x29e   : > { %v6037_v15 = vpop.f32.mrf.mxu1 }
 0x29f   : > { %v6073_v17 = vpop.f32.mrf.mxu0  ;;  %v7801_v52 = vadd.f32 %v2609_v59, %v2473_v28 }
 0x2a0   : > { %v2449_v53 = vpop.f32.mrf.mxu1 }
 0x2a1   : > { %v2612_v8 = vpop.f32.mrf.mxu0  ;;  %v2474_v35 = vadd.f32 %v2449_v53, %v2311_v2 }
 0x2a2   : > { %v6038_v3 = vpop.f32.mrf.mxu1 }
 0x2a3   : > { %v6074_v21 = vpop.f32.mrf.mxu0  ;;  %v7803_v41 = vadd.f32 %v2612_v8, %v2474_v35 }
 0x2a4   : > { %v2454_v7 = vpop.f32.mrf.mxu1 }
 0x2a5   : > { %v2617_v23 = vpop.f32.mrf.mxu0  ;;  %v2475_v1 = vadd.f32 %v2454_v7, %v2312_v26 }
 0x2a6   : > { %v6041_v47 = vpop.f32.mrf.mxu1 }
 0x2a7   : > { %v6077_v19 = vpop.f32.mrf.mxu0  ;;  %v7805_v22 = vadd.f32 %v2617_v23, %v2475_v1 }
 0x2a8   : > { %v2457_v6 = vpop.f32.mrf.mxu1 }
 0x2a9   : > { %v2620_v50 = vpop.f32.mrf.mxu0  ;;  %v2476_v30 = vadd.f32 %v2457_v6, %v2313_v40 }
 0x2aa   : > { %v6042_v13 = vpop.f32.mrf.mxu1 }
 0x2ab   : > { %v6078_v14 = vpop.f32.mrf.mxu0  ;;  %v7807_v9 = vadd.f32 %v2620_v50, %v2476_v30 }
 0x2ac   : > { %v2462_v33 = vpop.f32.mrf.mxu1 }
 0x2ad   : > { %v2625_v2 = vpop.f32.mrf.mxu0  ;;  %v2477_v42 = vadd.f32 %v2462_v33, %v2314_v4 }
 0x2ae   : > { %v6045_v31 = vpop.f32.mrf.mxu1 }
 0x2af   : > { %v6081_v48 = vpop.f32.mrf.mxu0  ;;  %v7809_v12 = vadd.f32 %v2625_v2, %v2477_v42  ;;  %v7832_v2 = vld [vmem:[%s8300_s4] ss:$0 sm:$0xff] }
 0x2b0   : > { %v2465_v55 = vpop.f32.mrf.mxu1 }
 0x2b1   : > { %v2628_v26 = vpop.f32.mrf.mxu0  ;;  %v2478_v25 = vadd.f32 %v2465_v55, %v2315_v11 }
 0x2b2   : > { %v6046_v18 = vpop.f32.mrf.mxu1 }
 0x2b3   : > { %v6082_v36 = vpop.f32.mrf.mxu0  ;;  %v7811_v16 = vadd.f32 %v2628_v26, %v2478_v25 }
 0x2b4   : > { %v2756_v51 = vpop.f32.mrf.mxu1 }
 0x2b5   : > { %v2919_v40 = vpop.f32.mrf.mxu0  ;;  %v2795_v1 = vadd.f32 %v2756_v51, %v7789_v37 }
 0x2b6   : > { %v6101_v20 = vpop.f32.mrf.mxu1 }
 0x2b7   : > { %v6137_v29 = vpop.f32.mrf.mxu0  ;;  %v2958_v30 = vadd.f32 %v2919_v40, %v2795_v1 }
 0x2b8   : > { %v2759_v54 = vpop.f32.mrf.mxu1 }
 0x2b9   : > { %v2922_v27 = vpop.f32.mrf.mxu0  ;;  %v2796_v13 = vadd.f32 %v2759_v54, %v7792_v39 }
 0x2ba   : > { %v6102_v34 = vpop.f32.mrf.mxu1 }
 0x2bb   : > { %v6138_v45 = vpop.f32.mrf.mxu0  ;;  %v2959_v31 = vadd.f32 %v2922_v27, %v2796_v13 }
 0x2bc   : > { %v2764_v4 = vpop.f32.mrf.mxu1 }
 0x2bd   : > { %v2927_v24 = vpop.f32.mrf.mxu0  ;;  %v2797_v37 = vadd.f32 %v2764_v4, %v7795_v0 }
 0x2be   : > { %v6105_v49 = vpop.f32.mrf.mxu1 }
 0x2bf   : > { %v6141_v56 = vpop.f32.mrf.mxu0  ;;  %v2960_v18 = vadd.f32 %v2927_v24, %v2797_v37  ;;  %v6660_v37 = vld [vmem:[%s8301_s5 + $0xb0] sm:$0xff]  }
 0x2c0   : > { %v2767_v32 = vpop.f32.mrf.mxu1 }
 0x2c1   : > { %v2930_v60 = vpop.f32.mrf.mxu0  ;;  %v2798_v36 = vadd.f32 %v2767_v32, %v7798_v10 }
 0x2c2   : > { %v6106_v38 = vpop.f32.mrf.mxu1 }
 0x2c3   : > { %v6142_v11 = vpop.f32.mrf.mxu0  ;;  %v2961_v34 = vadd.f32 %v2930_v60, %v2798_v36 }
 0x2c4   : > { %v2772_v61 = vpop.f32.mrf.mxu1 }
 0x2c5   : > { %v2935_v62 = vpop.f32.mrf.mxu0  ;;  %v2799_v27 = vadd.f32 %v2772_v61, %v7801_v52 }
 0x2c6   : > { %v6109_v57 = vpop.f32.mrf.mxu1 }
 0x2c7   : > { %v6145_v43 = vpop.f32.mrf.mxu0  ;;  %v2962_v32 = vadd.f32 %v2935_v62, %v2799_v27 }
 0x2c8   : > { %v2775_v63 = vpop.f32.mrf.mxu1 }
 0x2c9   : > { %v2938_v5 = vpop.f32.mrf.mxu0  ;;  %v2800_v38 = vadd.f32 %v2775_v63, %v7803_v41 }
 0x2ca   : > { %v6110_v58 = vpop.f32.mrf.mxu1 }
 0x2cb   : > { %v6146_v46 = vpop.f32.mrf.mxu0 }
 0x2cc   : > { %v2780_v44 = vpop.f32.mrf.mxu1  ;;  %v2963_v46 = vadd.f32 %v2938_v5, %v2800_v38 }
 0x2cd   : > { %v7813_v59 = vpop.f32.mrf.mxu0  ;;  %v2801_v43 = vadd.f32 %v2780_v44, %v7805_v22 }
 0x2ce   : > { %v6113_v28 = vpop.f32.mrf.mxu1 }
 0x2cf   : > { %v6149_v15 = vpop.f32.mrf.mxu0 }
 0x2d0   : > { %v7815_v17 = vpop.f32.mrf.mxu1 }
 0x2d1   : > { %v7817_v53 = vpop.f32.mrf.mxu0  ;;  %v2802_v22 = vadd.f32 %v7815_v17, %v7807_v9 }
 0x2d2   : > { %v6114_v8 = vpop.f32.mrf.mxu1 }
 0x2d3   : > { %v6150_v35 = vpop.f32.mrf.mxu0  ;;  %v3232_v8 = vld [vmem:[#allocation3 + $0x1] sm:$0xff] }
 0x2d4   : > { %v7819_v3 = vpop.f32.mrf.mxu1 }
 0x2d5   : > { %v7821_v21 = vpop.f32.mrf.mxu0  ;;  %v2803_v9 = vadd.f32 %v7819_v3, %v7809_v12  ;;  %v6663_v12 = vld [vmem:[%s8301_s5 + $0xf0] sm:$0xff]  }
 0x2d6   : > { %v6117_v7 = vpop.f32.mrf.mxu1 }
 0x2d7   : > { %v6153_v23 = vpop.f32.mrf.mxu0  ;;  %v2964_v7 = vadd.f32 %v7813_v59, %v2801_v43 }
 0x2d8   : > { %v7824_v47 = vpop.f32.mrf.mxu1 }
 0x2d9   : > { %v7826_v19 = vpop.f32.mrf.mxu0 }
 0x2da   : > { %v6118_v6 = vpop.f32.mrf.mxu1 }
 0x2db   : > { %v6154_v50 = vpop.f32.mrf.mxu0 }
 0x2dc   : > { %v3082_v14 = vpop.f32.mrf.mxu1  ;;  %v6659_v50 = vld [vmem:[%s8301_s5 + $0xb8] sm:$0xff]  }
 0x2dd   : > { %v3121_v33 = vadd.f32 %v3082_v14, %v2958_v30  ;;  %v7857_v30 = vld [vmem:[#allocation2] sm:$0xff]  ;;  %v6661_v14 = vld [vmem:[%s8301_s5 + $0xf8] sm:$0xff]  }
 0x2de   : > { %v6173_v42 = vpop.f32.mrf.mxu1 }
 0x2df   : > { %v3138_v55 = vadd.f32 %v7832_v2, %v3121_v33 }
 0x2e0   : > { %v3085_v48 = vpop.f32.mrf.mxu1 }
 0x2e1   : > { %v3122_v26 = vadd.f32 %v3085_v48, %v2959_v31  ;;  %v3148_v40 = vmax.f32 %v3138_v55, 0.0  ;;  %v2965_v48 = vadd.f32 %v7817_v53, %v2802_v22 }
 0x2e2   : > { %v6174_v25 = vpop.f32.mrf.mxu1 }
 0x2e3   : > { %v3139_v39 = vadd.f32 %v7832_v2, %v3122_v26 }
 0x2e4   : > { %v3090_v51 = vpop.f32.mrf.mxu1 }
 0x2e5   : > { %v3149_v20 = vmax.f32 %v3139_v39, 0.0  ;;  %v3123_v29 = vadd.f32 %v3090_v51, %v2960_v18  ;;  %v6662_v39 = vld [vmem:[%s8301_s5 + $0xa8] sm:$0xff]   ;;  %v2966_v51 = vadd.f32 %v7821_v21, %v2803_v9 }
 0x2e6   : > { %v6177_v54 = vpop.f32.mrf.mxu1  ;;  %v6672_v9 = vld [vmem:[%s8301_s5 + $0xc8] sm:$0xff]  }
 0x2e7   : > { %v7839_v45 = vpack.c.bf16 %v3149_v20, %v3148_v40  ;;  %v3140_v24 = vadd.f32 %v7832_v2, %v3123_v29 }
 0x2e8   : > { %v3093_v0 = vpop.f32.mrf.mxu1 }
 0x2e9   : > { %v3163_v4 = vunpack.c.l.bf16 %v7839_v45  ;;  %v3164_v49 = vunpack.c.h.bf16 %v7839_v45  ;;  %v3124_v10 = vadd.f32 %v3093_v0, %v2961_v34  ;;  %v3150_v11 = vmax.f32 %v3140_v24, 0.0  ;;  %v6695_v45 = vld [vmem:[%s8301_s5 + $0x1f0] sm:$0xff]  }
 0x2ea   : > { %v6178_v56 = vpop.f32.mrf.mxu1  ;;  %v2804_v34 = vadd.f32 %v7824_v47, %v7811_v16  ;;  %v6665_v16 = vld [vmem:[%s8301_s5 + $0xe8] sm:$0xff]  }
 0x2eb   : > { %3187 = vst [vmem:[#allocation3 + $0xb] sm:$0xff] %v3163_v4  ;;  %3188 = vst [vmem:[#allocation3 + $0x13] sm:$0xfc] %v3164_v49  ;;  %v3141_v52 = vadd.f32 %v7832_v2, %v3124_v10 }
 0x2ec   : > { %v3098_v60 = vpop.f32.mrf.mxu1  ;;  %v2967_v38 = vadd.f32 %v7826_v19, %v2804_v34  ;;  %v6666_v19 = vld [vmem:[%s8301_s5 + $0x98] sm:$0xff]   ;;  %v6676_v34 = vld [vmem:[%s8301_s5 + $0x130] sm:$0xff]  }
 0x2ed   : > { %v3151_v61 = vmax.f32 %v3141_v52, 0.0  ;;  %v3125_v57 = vadd.f32 %v3098_v60, %v2962_v32  ;;  %v6664_v32 = vld [vmem:[%s8301_s5 + $0xa0] sm:$0xff]  }
 0x2ee   : > { %v6181_v58 = vpop.f32.mrf.mxu1 }
 0x2ef   : > { %v3159_v28 = vpack.c.bf16 %v3151_v61, %v3150_v11  ;;  %v3142_v41 = vadd.f32 %v7832_v2, %v3125_v57 }
 0x2f0   : > { %v3101_v15 = vpop.f32.mrf.mxu1 }
 0x2f1   : > { %v3165_v62 = vunpack.c.l.bf16 %v3159_v28  ;;  %v3166_v35 = vunpack.c.h.bf16 %v3159_v28  ;;  %v3126_v63 = vadd.f32 %v3101_v15, %v2963_v46  ;;  %v3152_v33 = vmax.f32 %v3142_v41, 0.0  ;;  %v6667_v46 = vld [vmem:[%s8301_s5 + $0xe0] sm:$0xff]  }
 0x2f2   : > { %v6182_v23 = vpop.f32.mrf.mxu1  ;;  %v3233_v1 = vld [vmem:[#allocation3 + $0x9] sm:$0xff]  ;;  %v3234_v36 = vld [vmem:[#allocation3 + $0x11] sm:$0xff] }
 0x2f3   : > { %v3202_v6 = vld [vmem:[#allocation3 + $0x8] sm:$0xff]  ;;  %3189 = vst [vmem:[#allocation3 + $0x1b] sm:$0xf3] %v3165_v62   ;;  %3191 = vst [vmem:[#allocation3 + $0x23] sm:$0xcf] %v3166_v35   ;;  %v3143_v5 = vadd.f32 %v7832_v2, %v3126_v63  ;;  %v3242_v44 = vpack.c.bf16 %v3233_v1, %v3232_v8  ;;  %v3203_v29 = vld [vmem:[#allocation3 + $0x10] sm:$0xff] }
 0x2f4   : > { %v3211_v13 = vpack.c.bf16 %v3202_v6, %v7857_v30  ;;  %v3106_v59 = vpop.f32.mrf.mxu1  ;;  %v6668_v1 = vld [vmem:[%s8301_s5 + $0x90] sm:$0xff]   ;;  %v6669_v6 = vld [vmem:[%s8301_s5 + $0xd8] sm:$0xff]  }
 0x2f5   : > { %v3153_v42 = vmax.f32 %v3143_v5, 0.0  ;;  %v3127_v31 = vadd.f32 %v3106_v59, %v2964_v7  ;;  %6208 = vmatmul.mubr.bf16.vlgmr.msra.gmra.mxu0 %v3242_v44  ;;  %v6670_v44 = vld [vmem:[%s8301_s5 + $0xd0] sm:$0xff]  }
 0x2f6   : > { %6244 = vmatmul.mubr.bf16.vlgmr.msra.gmra.mxu1 %v3211_v13  ;;  %6264 = vmatpush3.bf16.msra.mxu0 %v6659_v50  ;;  %v6185_v17 = vpop.f32.mrf.mxu1  ;;  %v6671_v13 = vld [vmem:[%s8301_s5 + $0x88] sm:$0xff]  }
 0x2f7   : > { %6211 = vmatprep.mubr.msk.bf16.mxu0 %vm6728_vm2, %v7857_v30  ;;  %v7871_v55 = vpack.c.bf16 %v3153_v42, %v3152_v33  ;;  %6265 = vmatprep.subr.bf16.mxu0 %v7857_v30  ;;  %v3144_v18 = vadd.f32 %v7832_v2, %v3127_v31  ;;  %v6673_v17 = vld [vmem:[%s8301_s5 + $0x80] sm:$0xff]  }
 0x2f8   : > { %6247 = vmatprep.mubr.msk.bf16.mxu1 %vm6728_vm2, %v7857_v30  ;;  %v3109_v26 = vpop.f32.mrf.mxu1  ;;  %6300 = vmatpush3.bf16.msra.mxu1 %v6661_v14 }
 0x2f9   : > { %v3167_v3 = vunpack.c.l.bf16 %v7871_v55  ;;  %v3168_v25 = vunpack.c.h.bf16 %v7871_v55  ;;  %v3128_v53 = vadd.f32 %v3109_v26, %v2965_v48  ;;  %6301 = vmatprep.subr.bf16.mxu1 %v7857_v30  ;;  %v3154_v21 = vmax.f32 %v3144_v18, 0.0  ;;  %v6674_v48 = vld [vmem:[%s8301_s5 + $0xc0] sm:$0xff]  }
 0x2fa   : > { %v6186_v40 = vpop.f32.mrf.mxu1  ;;  %6266 = vmatpush3.bf16.msra.mxu0 %v6660_v37  ;;  %v3235_v20 = vld [vmem:[#allocation3 + $0x19] sm:$0xff]  ;;  %v3236_v58 = vld [vmem:[#allocation3 + $0x21] sm:$0xff] }
 0x2fb   : > { %v3204_v54 = vld [vmem:[#allocation3 + $0x18] sm:$0xff]  ;;  %3193 = vst [vmem:[#allocation3 + $0x2b] sm:$0x3f] %v3167_v3  ;;  %3194 = vst [vmem:[#allocation3 + $0x33] sm:$0xff] %v3168_v25  ;;  %v3145_v27 = vadd.f32 %v7832_v2, %v3128_v53  ;;  %v3243_v0 = vpack.c.bf16 %v3235_v20, %v3234_v36  ;;  %6267 = vmatprep.subr.bf16.mxu0 %v7857_v30  ;;  %v3205_v8 = vld [vmem:[#allocation3 + $0x20] sm:$0xff] }
 0x2fc   : > { %v3212_v49 = vpack.c.bf16 %v3204_v54, %v3203_v29  ;;  %v3114_v24 = vpop.f32.mrf.mxu1  ;;  %6302 = vmatpush3.bf16.msra.mxu1 %v6663_v12  ;;  %v3506_v36 = vld [vmem:[#allocation3 + $0x2] sm:$0xff] }
 0x2fd   : > { %v3155_v10 = vmax.f32 %v3145_v27, 0.0  ;;  %v3129_v56 = vadd.f32 %v3114_v24, %v2966_v51  ;;  %6212 = vmatmul.mubr.bf16.gmra.mxu0 %v3243_v0  ;;  %6303 = vmatprep.subr.bf16.mxu1 %v7857_v30  ;;  %v3670_v51 = vld [vmem:[#allocation3 + $0x12] sm:$0xff]  ;;  %v6675_v40 = vld [vmem:[%s8301_s5 + $0x138] sm:$0xff]   ;;  %v3509_v27 = vld [vmem:[#allocation3 + $0x1a] sm:$0xff] }
 0x2fe   : > { %6248 = vmatmul.mubr.bf16.gmra.mxu1 %v3212_v49  ;;  %v6189_v47 = vpop.f32.mrf.mxu1  ;;  %6268 = vmatpush3.bf16.msra.mxu0 %v6662_v39  ;;  %v3507_v39 = vld [vmem:[#allocation3 + $0xa] sm:$0xff]  ;;  %v3672_v0 = vld [vmem:[#allocation3 + $0x22] sm:$0xff]  ;;  %v6678_v24 = vld [vmem:[%s8301_s5 + $0x128] sm:$0xff]  }
 0x2ff   : > { %6215 = vmatprep.mubr.msk.bf16.mxu0 %vm6728_vm2, %v7857_v30  ;;  %v3161_v52 = vpack.c.bf16 %v3155_v10, %v3154_v21  ;;  %6269 = vmatprep.subr.bf16.mxu0 %v7857_v30  ;;  %v3146_v57 = vadd.f32 %v7832_v2, %v3129_v56  ;;  %v3516_v20 = vpack.c.bf16 %v3507_v39, %v3506_v36  ;;  %v6677_v54 = vld [vmem:[%s8301_s5 + $0x178] sm:$0xff]   ;;  %v6679_v49 = vld [vmem:[%s8301_s5 + $0x170] sm:$0xff]   ;;  %v6681_v56 = vld [vmem:[%s8301_s5 + $0x168] sm:$0xff]  }
 0x300   : > { %6251 = vmatprep.mubr.msk.bf16.mxu1 %vm6728_vm2, %v7857_v30  ;;  %v3117_v60 = vpop.f32.mrf.mxu1  ;;  %6304 = vmatpush3.bf16.msra.mxu1 %v6665_v16  ;;  %v3679_v29 = vpack.c.bf16 %v3670_v51, %v3507_v39  ;;  %v3517_v21 = vpack.c.bf16 %v3509_v27, %v3670_v51  ;;  %v3680_v10 = vpack.c.bf16 %v3672_v0, %v3509_v27  ;;  %v6680_v16 = vld [vmem:[%s8301_s5 + $0x120] sm:$0xff]   ;;  %v6700_v39 = vld [vmem:[%s8301_s5 + $0x190] sm:$0xff]   ;;  %v6701_v51 = vld [vmem:[%s8301_s5 + $0x1d8] sm:$0xff]  }
 0x301   : > { %v3169_v11 = vunpack.c.l.bf16 %v3161_v52  ;;  %v3170_v61 = vunpack.c.h.bf16 %v3161_v52  ;;  %v3130_v43 = vadd.f32 %v3117_v60, %v2967_v38  ;;  %6305 = vmatprep.subr.bf16.mxu1 %v7857_v30  ;;  %v3156_v7 = vmax.f32 %v3146_v57, 0.0  ;;  %v6682_v38 = vld [vmem:[%s8301_s5 + $0x118] sm:$0xff]   ;;  %v6683_v52 = vld [vmem:[%s8301_s5 + $0x160] sm:$0xff]  }
 0x302   : > { %v6190_v28 = vpop.f32.mrf.mxu1  ;;  %6270 = vmatpush3.bf16.msra.mxu0 %v6664_v32  ;;  %v3237_v15 = vld [vmem:[#allocation3 + $0x29] sm:$0xff]  ;;  %v3238_v5 = vld [vmem:[#allocation3 + $0x31] sm:$0xff] }
 0x303   : > { %v3206_v62 = vld [vmem:[#allocation3 + $0x28] sm:$0xff]  ;;  %3195 = vst [vmem:[#allocation3 + $0x3b] sm:$0xfc] %v3169_v11  ;;  %3196 = vst [vmem:[#allocation3 + $0x43] sm:$0xf3] %v3170_v61   ;;  %v3147_v35 = vadd.f32 %v7832_v2, %v3130_v43  ;;  %v3244_v41 = vpack.c.bf16 %v3237_v15, %v3236_v58  ;;  %6271 = vmatprep.subr.bf16.mxu0 %v7857_v30  ;;  %v3207_v14 = vld [vmem:[#allocation3 + $0x30] sm:$0xff] }
 0x304   : > { %v3213_v63 = vpack.c.bf16 %v3206_v62, %v3205_v8  ;;  %6306 = vmatpush3.bf16.msra.mxu1 %v6667_v46  ;;  %v3511_v47 = vld [vmem:[#allocation3 + $0x2a] sm:$0xff]  ;;  %v3674_v32 = vld [vmem:[#allocation3 + $0x32] sm:$0xff]  ;;  %v6684_v61 = vld [vmem:[%s8301_s5 + $0x110] sm:$0xff]  }
 0x305   : > { %v3157_v23 = vmax.f32 %v3147_v35, 0.0  ;;  %6216 = vmatmul.mubr.bf16.gmra.mxu0 %v3244_v41  ;;  %6307 = vmatprep.subr.bf16.mxu1 %v7857_v30  ;;  %v3518_v60 = vpack.c.bf16 %v3511_v47, %v3672_v0  ;;  %v3681_v11 = vpack.c.bf16 %v3674_v32, %v3511_v47  ;;  %v6685_v57 = vld [vmem:[%s8301_s5 + $0x158] sm:$0xff]   ;;  %v6687_v46 = vld [vmem:[%s8301_s5 + $0x108] sm:$0xff]   ;;  %v6689_v62 = vld [vmem:[%s8301_s5 + $0x100] sm:$0xff]  }
 0x306   : > { %6252 = vmatmul.mubr.bf16.gmra.mxu1 %v3213_v63  ;;  %6272 = vmatpush3.bf16.msra.mxu0 %v6666_v19  ;;  %v6686_v19 = vld [vmem:[%s8301_s5 + $0x150] sm:$0xff]   ;;  %v6688_v8 = vld [vmem:[%s8301_s5 + $0x148] sm:$0xff]   ;;  %v6690_v63 = vld [vmem:[%s8301_s5 + $0x140] sm:$0xff]  }
 0x307   : > { %v3162_v50 = vpack.c.bf16 %v3157_v23, %v3156_v7  ;;  %6219 = vmatprep.mubr.msk.bf16.mxu0 %vm6728_vm2, %v7857_v30  ;;  %6255 = vmatprep.mubr.msk.bf16.mxu1 %vm6728_vm2, %v7857_v30  ;;  %v6704_v0 = vld [vmem:[%s8301_s5 + $0x1c8] sm:$0xff]  }
 0x308   : > { %6273 = vmatprep.subr.bf16.mxu0 %v7857_v30  ;;  %6308 = vmatpush3.bf16.msra.mxu1 %v6669_v6  ;;  %v8042_v6 = vld [vmem:[#allocation3 + $0x14] sm:$0xff] }
 0x309   : > { %v3171_v2 = vunpack.c.l.bf16 %v3162_v50  ;;  %v3172_v22 = vunpack.c.h.bf16 %v3162_v50  ;;  %6309 = vmatprep.subr.bf16.mxu1 %v7857_v30  ;;  %v3995_v50 = vld [vmem:[#allocation3 + $0xc] sm:$0xff] }
 0x30a   : > { %v3239_v59 = vld [vmem:[#allocation3 + $0x39] sm:$0xff]  ;;  %6274 = vmatpush3.bf16.msra.mxu0 %v6668_v1  ;;  %v3240_v37 = vld [vmem:[#allocation3 + $0x41] sm:$0xff] }
 0x30b   : > { %v3208_v33 = vld [vmem:[#allocation3 + $0x38] sm:$0xff]  ;;  %3198 = vst [vmem:[#allocation3 + $0x4b] sm:$0xcf] %v3171_v2   ;;  %3200 = vst [vmem:[#allocation3 + $0x53] sm:$0x3f] %v3172_v22  ;;  %v3245_v42 = vpack.c.bf16 %v3239_v59, %v3238_v5  ;;  %6275 = vmatprep.subr.bf16.mxu0 %v7857_v30  ;;  %v3209_v12 = vld [vmem:[#allocation3 + $0x40] sm:$0xff]  ;;  %v4005_v5 = vpack.c.bf16 %v8042_v6, %v3995_v50 }
 0x30c   : > { %v3214_v31 = vpack.c.bf16 %v3208_v33, %v3207_v14  ;;  %6310 = vmatpush3.bf16.msra.mxu1 %v6670_v44  ;;  %v3513_v43 = vld [vmem:[#allocation3 + $0x3a] sm:$0xff]  ;;  %v3676_v58 = vld [vmem:[#allocation3 + $0x42] sm:$0xff] }
 0x30d   : > { %6220 = vmatmul.mubr.bf16.gmra.mxu0 %v3245_v42  ;;  %6311 = vmatprep.subr.bf16.mxu1 %v7857_v30  ;;  %v3519_v28 = vpack.c.bf16 %v3513_v43, %v3674_v32  ;;  %v3682_v15 = vpack.c.bf16 %v3676_v58, %v3513_v43  ;;  %v3833_v1 = vld [vmem:[#allocation3 + $0x13] sm:$0xff]  ;;  %v6691_v2 = vld [vmem:[%s8301_s5 + $0x1b8] sm:$0xff]   ;;  %v8067_v33 = vld [vmem:[#allocation3 + $0x1c] sm:$0xff] }
 0x30e   : > { %6256 = vmatmul.mubr.bf16.gmra.mxu1 %v3214_v31  ;;  %6276 = vmatpush3.bf16.msra.mxu0 %v6671_v13  ;;  %v3842_v22 = vpack.c.bf16 %v3833_v1, %v3163_v4  ;;  %v6693_v44 = vld [vmem:[%s8301_s5 + $0x1f8] sm:$0xff]   ;;  %v6692_v13 = vld [vmem:[%s8301_s5 + $0x1b0] sm:$0xff]   ;;  %v6694_v42 = vld [vmem:[%s8301_s5 + $0x1a8] sm:$0xff]  }
 0x30f   : > { %6223 = vmatprep.mubr.msk.bf16.mxu0 %vm6728_vm2, %v7857_v30  ;;  %6259 = vmatprep.mubr.msk.bf16.mxu1 %vm6728_vm2, %v7857_v30  ;;  %v3834_v4 = vld [vmem:[#allocation3 + $0x1b] sm:$0xff]  ;;  %v3835_v59 = vld [vmem:[#allocation3 + $0x23] sm:$0xff] }
 0x310   : > { %6277 = vmatprep.subr.bf16.mxu0 %v7857_v30  ;;  %6312 = vmatpush3.bf16.msra.mxu1 %v6672_v9  ;;  %v8064_v14 = vld [vmem:[#allocation3 + $0x24] sm:$0xff]  ;;  %v3843_v31 = vpack.c.bf16 %v3835_v59, %v3834_v4  ;;  %v3838_v55 = vld [vmem:[#allocation3 + $0x3b] sm:$0xff] }
 0x311   : > { %6313 = vmatprep.subr.bf16.mxu1 %v7857_v30  ;;  %v4006_v9 = vpack.c.bf16 %v8064_v14, %v8067_v33  ;;  %v4323_v43 = vld [vmem:[#allocation3 + $0x25] sm:$0xff]  ;;  %v4484_v59 = vld [vmem:[#allocation3 + $0x16] sm:$0xff] }
 0x312   : > { %v3241_v26 = vld [vmem:[#allocation3 + $0x49] sm:$0xff]  ;;  %6278 = vmatpush3.bf16.msra.mxu0 %v6673_v17  ;;  %v3678_v41 = vld [vmem:[#allocation3 + $0x52] sm:$0xff] }
 0x313   : > { %v3210_v3 = vld [vmem:[#allocation3 + $0x48] sm:$0xff]  ;;  %v3246_v18 = vpack.c.bf16 %v3241_v26, %v3240_v37  ;;  %6335 = vmatprep.subr.bf16.mxu0 %v7857_v30  ;;  %v6697_v17 = vld [vmem:[%s8301_s5 + $0x1e8] sm:$0xff]   ;;  %v6696_v37 = vld [vmem:[%s8301_s5 + $0x1a0] sm:$0xff]  }
 0x314   : > { %v3215_v53 = vpack.c.bf16 %v3210_v3, %v3209_v12  ;;  %6314 = vmatpush3.bf16.msra.mxu1 %v6674_v48  ;;  %v3515_v35 = vld [vmem:[#allocation3 + $0x4a] sm:$0xff]  ;;  %v8088_v12 = vld [vmem:[#allocation3 + $0x34] sm:$0xff] }
 0x315   : > { %6224 = vmatmul.mubr.bf16.gmra.mxu0 %v3246_v18  ;;  %6371 = vmatprep.subr.bf16.mxu1 %v7857_v30  ;;  %v3520_v7 = vpack.c.bf16 %v3515_v35, %v3676_v58  ;;  %v3683_v23 = vpack.c.bf16 %v3678_v41, %v3515_v35  ;;  %v3836_v48 = vld [vmem:[#allocation3 + $0x2b] sm:$0xff] }
 0x316   : > { %6260 = vmatmul.mubr.bf16.gmra.mxu1 %v3215_v53  ;;  %6279 = vmatprep.mubr.msk.bf16.mxu0 %vm6728_vm2, %v7857_v30  ;;  %v8086_v26 = vld [vmem:[#allocation3 + $0x2c] sm:$0xff]  ;;  %v3844_v53 = vpack.c.bf16 %v3168_v25, %v3836_v48  ;;  %v3839_v25 = vld [vmem:[#allocation3 + $0x43] sm:$0xff] }
 0x317   : > { %6315 = vmatprep.mubr.msk.bf16.mxu1 %vm6728_vm2, %v7857_v30  ;;  %v6698_v3 = vld [vmem:[%s8301_s5 + $0x198] sm:$0xff]   ;;  %v6699_v18 = vld [vmem:[%s8301_s5 + $0x1e0] sm:$0xff]   ;;  %v4007_v36 = vpack.c.bf16 %v8088_v12, %v8086_v26 }
 0x318   : > { %v4324_v58 = vld [vmem:[#allocation3 + $0x2d] sm:$0xff] }
 0x319   : > { %v6711_v35 = vld [vmem:[%s8301_s5 + $0x218] sm:$0xff]  }
 0x31a   : > { %v4328_v1 = vld [vmem:[#allocation3 + $0x4d] sm:$0xff] }
 0x31d   : > { %6280 = vmatmul.mubr.bf16.vlgmr.msra.gmra.mxu0 %v3516_v20  ;;  %v8117_v20 = vld [vmem:[#allocation3 + $0x3c] sm:$0xff] }
 0x31e   : > { %6316 = vmatmul.mubr.bf16.vlgmr.msra.gmra.mxu1 %v3679_v29  ;;  %6336 = vmatpush3.bf16.msra.mxu0 %v6675_v40  ;;  %v8113_v40 = vld [vmem:[#allocation3 + $0x44] sm:$0xff]  ;;  %v4170_v41 = vpack.c.bf16 %v8117_v20, %v8088_v12  ;;  %v4491_v12 = vld [vmem:[#allocation3 + $0x4e] sm:$0xff] }
 0x31f   : > { %6283 = vmatprep.mubr.msk.bf16.mxu0 %vm6728_vm2, %v7857_v30  ;;  %6337 = vmatprep.subr.bf16.mxu0 %v7857_v30  ;;  %v6702_v29 = vld [vmem:[%s8301_s5 + $0x1d0] sm:$0xff]   ;;  %v4008_v27 = vpack.c.bf16 %v8113_v40, %v8117_v20 }
 0x320   : > { %6319 = vmatprep.mubr.msk.bf16.mxu1 %vm6728_vm2, %v7857_v30  ;;  %6372 = vmatpush3.bf16.msra.mxu1 %v6677_v54  ;;  %v6703_v54 = vld [vmem:[%s8301_s5 + $0x188] sm:$0xff]  }
 0x321   : > { %6373 = vmatprep.subr.bf16.mxu1 %v7857_v30 }
 0x322   : > { %6338 = vmatpush3.bf16.msra.mxu0 %v6676_v34  ;;  %v3845_v34 = vpack.c.bf16 %v3839_v25, %v3838_v55 }
 0x323   : > { %6339 = vmatprep.subr.bf16.mxu0 %v7857_v30 }
 0x324   : > { %6374 = vmatpush3.bf16.msra.mxu1 %v6679_v49  ;;  %v6705_v49 = vld [vmem:[%s8301_s5 + $0x180] sm:$0xff]  }
 0x325   : > { %6284 = vmatmul.mubr.bf16.gmra.mxu0 %v3517_v21  ;;  %6375 = vmatprep.subr.bf16.mxu1 %v7857_v30  ;;  %v3841_v21 = vld [vmem:[#allocation3 + $0x53] sm:$0xff] }
 0x326   : > { %6320 = vmatmul.mubr.bf16.gmra.mxu1 %v3680_v10  ;;  %6340 = vmatpush3.bf16.msra.mxu0 %v6678_v24  ;;  %v3840_v24 = vld [vmem:[#allocation3 + $0x4b] sm:$0xff] }
 0x327   : > { %6287 = vmatprep.mubr.msk.bf16.mxu0 %vm6728_vm2, %v7857_v30  ;;  %6341 = vmatprep.subr.bf16.mxu0 %v7857_v30  ;;  %v8139_v10 = vld [vmem:[#allocation3 + $0x4c] sm:$0xff]  ;;  %v3846_v47 = vpack.c.bf16 %v3841_v21, %v3840_v24 }
 0x328   : > { %6323 = vmatprep.mubr.msk.bf16.mxu1 %vm6728_vm2, %v7857_v30  ;;  %6376 = vmatpush3.bf16.msra.mxu1 %v6681_v56  ;;  %v8141_v56 = vld [vmem:[#allocation3 + $0x54] sm:$0xff]  ;;  %v4171_v50 = vpack.c.bf16 %v8139_v10, %v8113_v40 }
 0x329   : > { %6377 = vmatprep.subr.bf16.mxu1 %v7857_v30  ;;  %v4009_v32 = vpack.c.bf16 %v8141_v56, %v8139_v10 }
 0x32a   : > { %6342 = vmatpush3.bf16.msra.mxu0 %v6680_v16  ;;  %v6706_v16 = vld [vmem:[%s8301_s5 + $0x1c0] sm:$0xff]  }
 0x32b   : > { %6343 = vmatprep.subr.bf16.mxu0 %v7857_v30 }
 0x32c   : > { %6378 = vmatpush3.bf16.msra.mxu1 %v6683_v52  ;;  %v4322_v52 = vld [vmem:[#allocation3 + $0x1d] sm:$0xff] }
 0x32d   : > { %6288 = vmatmul.mubr.bf16.gmra.mxu0 %v3518_v60  ;;  %6379 = vmatprep.subr.bf16.mxu1 %v7857_v30  ;;  %v6707_v60 = vld [vmem:[%s8301_s5 + $0x238] sm:$0xff]  }
 0x32e   : > { %6324 = vmatmul.mubr.bf16.gmra.mxu1 %v3681_v11  ;;  %6344 = vmatpush3.bf16.msra.mxu0 %v6682_v38  ;;  %v4321_v38 = vld [vmem:[#allocation3 + $0x15] sm:$0xff]  ;;  %v4168_v11 = vpack.c.bf16 %v8067_v33, %v8042_v6 }
 0x32f   : > { %6291 = vmatprep.mubr.msk.bf16.mxu0 %vm6728_vm2, %v7857_v30  ;;  %6327 = vmatprep.mubr.msk.bf16.mxu1 %vm6728_vm2, %v7857_v30  ;;  %v6713_v6 = vld [vmem:[%s8301_s5 + $0x208] sm:$0xff]  }
 0x330   : > { %6345 = vmatprep.subr.bf16.mxu0 %v7857_v30  ;;  %6380 = vmatpush3.bf16.msra.mxu1 %v6685_v57  ;;  %v6708_v57 = vld [vmem:[%s8301_s5 + $0x230] sm:$0xff]  }
 0x331   : > { %6381 = vmatprep.subr.bf16.mxu1 %v7857_v30 }
 0x332   : > { %6346 = vmatpush3.bf16.msra.mxu0 %v6684_v61  ;;  %v4331_v61 = vpack.c.bf16 %v4322_v52, %v4321_v38 }
 0x333   : > { %6347 = vmatprep.subr.bf16.mxu0 %v7857_v30 }
 0x334   : > { %6382 = vmatpush3.bf16.msra.mxu1 %v6686_v19  ;;  %v6709_v19 = vld [vmem:[%s8301_s5 + $0x228] sm:$0xff]  }
 0x335   : > { %6292 = vmatmul.mubr.bf16.gmra.mxu0 %v3519_v28  ;;  %6383 = vmatprep.subr.bf16.mxu1 %v7857_v30  ;;  %v4332_v28 = vpack.c.bf16 %v4324_v58, %v4323_v43 }
 0x336   : > { %6328 = vmatmul.mubr.bf16.gmra.mxu1 %v3682_v15  ;;  %6348 = vmatpush3.bf16.msra.mxu0 %v6687_v46  ;;  %v4169_v46 = vpack.c.bf16 %v8086_v26, %v8064_v14  ;;  %v6710_v15 = vld [vmem:[%s8301_s5 + $0x220] sm:$0xff]   ;;  %v4485_v14 = vld [vmem:[#allocation3 + $0x1e] sm:$0xff]  ;;  %v4490_v26 = vld [vmem:[#allocation3 + $0x46] sm:$0xff] }
 0x337   : > { %6295 = vmatprep.mubr.msk.bf16.mxu0 %vm6728_vm2, %v7857_v30  ;;  %6331 = vmatprep.mubr.msk.bf16.mxu1 %vm6728_vm2, %v7857_v30  ;;  %v4494_v33 = vpack.c.bf16 %v4485_v14, %v4484_v59 }
 0x338   : > { %6349 = vmatprep.subr.bf16.mxu0 %v7857_v30  ;;  %6384 = vmatpush3.bf16.msra.mxu1 %v6688_v8  ;;  %v4326_v8 = vld [vmem:[#allocation3 + $0x3d] sm:$0xff] }
 0x339   : > { %6385 = vmatprep.subr.bf16.mxu1 %v7857_v30 }
 0x33a   : > { %6350 = vmatpush3.bf16.msra.mxu0 %v6689_v62  ;;  %v4325_v62 = vld [vmem:[#allocation3 + $0x35] sm:$0xff] }
 0x33b   : > { %6407 = vmatprep.subr.bf16.mxu0 %v7857_v30 }
 0x33c   : > { %6386 = vmatpush3.bf16.msra.mxu1 %v6690_v63  ;;  %v4333_v63 = vpack.c.bf16 %v4326_v8, %v4325_v62 }
 0x33d   : > { %6296 = vmatmul.mubr.bf16.gmra.mxu0 %v3520_v7  ;;  %6443 = vmatprep.subr.bf16.mxu1 %v7857_v30  ;;  %v6712_v7 = vld [vmem:[%s8301_s5 + $0x210] sm:$0xff]  }
 0x33e   : > { %6332 = vmatmul.mubr.bf16.gmra.mxu1 %v3683_v23  ;;  %6351 = vmatprep.mubr.msk.bf16.mxu0 %vm6728_vm2, %v7857_v30  ;;  %v4327_v23 = vld [vmem:[#allocation3 + $0x45] sm:$0xff] }
 0x33f   : > { %6387 = vmatprep.mubr.msk.bf16.mxu1 %vm6728_vm2, %v7857_v30 }
 0x345   : > { %6352 = vmatmul.mubr.bf16.vlgmr.msra.gmra.mxu0 %v3842_v22  ;;  %v6714_v22 = vld [vmem:[%s8301_s5 + $0x200] sm:$0xff]  }
 0x346   : > { %6388 = vmatmul.mubr.bf16.vlgmr.msra.gmra.mxu1 %v4005_v5  ;;  %6408 = vmatpush3.bf16.msra.mxu0 %v6691_v2  ;;  %v4334_v2 = vpack.c.bf16 %v4328_v1, %v4327_v23  ;;  %v4167_v5 = vld [vmem:[#allocation3 + $0x5c] sm:$0xff] }
 0x347   : > { %6355 = vmatprep.mubr.msk.bf16.mxu0 %vm6728_vm2, %v7857_v30  ;;  %6409 = vmatprep.subr.bf16.mxu0 %v7857_v30 }
 0x348   : > { %6391 = vmatprep.mubr.msk.bf16.mxu1 %vm6728_vm2, %v7857_v30  ;;  %6444 = vmatpush3.bf16.msra.mxu1 %v6693_v44  ;;  %v4329_v44 = vld [vmem:[#allocation3 + $0x55] sm:$0xff] }
 0x349   : > { %6445 = vmatprep.subr.bf16.mxu1 %v7857_v30 }
 0x34a   : > { %6410 = vmatpush3.bf16.msra.mxu0 %v6692_v13  ;;  %v4330_v13 = vld [vmem:[#allocation3 + $0x5d] sm:$0xff] }
 0x34b   : > { %6411 = vmatprep.subr.bf16.mxu0 %v7857_v30  ;;  %v4335_v4 = vpack.c.bf16 %v4330_v13, %v4329_v44 }
 0x34c   : > { %6446 = vmatpush3.bf16.msra.mxu1 %v6695_v45  ;;  %v4172_v45 = vpack.c.bf16 %v4167_v5, %v8141_v56 }
 0x34d   : > { %6356 = vmatmul.mubr.bf16.gmra.mxu0 %v3843_v31  ;;  %6447 = vmatprep.subr.bf16.mxu1 %v7857_v30  ;;  %v4487_v31 = vld [vmem:[#allocation3 + $0x2e] sm:$0xff] }
 0x34e   : > { %6392 = vmatmul.mubr.bf16.gmra.mxu1 %v4006_v9  ;;  %6412 = vmatpush3.bf16.msra.mxu0 %v6694_v42  ;;  %v4486_v42 = vld [vmem:[#allocation3 + $0x26] sm:$0xff] }
 0x34f   : > { %6359 = vmatprep.mubr.msk.bf16.mxu0 %vm6728_vm2, %v7857_v30  ;;  %6413 = vmatprep.subr.bf16.mxu0 %v7857_v30  ;;  %v4495_v9 = vpack.c.bf16 %v4487_v31, %v4486_v42 }
 0x350   : > { %6395 = vmatprep.mubr.msk.bf16.mxu1 %vm6728_vm2, %v7857_v30  ;;  %6448 = vmatpush3.bf16.msra.mxu1 %v6697_v17  ;;  %v4488_v17 = vld [vmem:[#allocation3 + $0x36] sm:$0xff] }
 0x351   : > { %6449 = vmatprep.subr.bf16.mxu1 %v7857_v30 }
 0x352   : > { %6414 = vmatpush3.bf16.msra.mxu0 %v6696_v37  ;;  %v4489_v37 = vld [vmem:[#allocation3 + $0x3e] sm:$0xff] }
 0x353   : > { %6415 = vmatprep.subr.bf16.mxu0 %v7857_v30  ;;  %v4496_v48 = vpack.c.bf16 %v4489_v37, %v4488_v17 }
 0x354   : > { %6450 = vmatpush3.bf16.msra.mxu1 %v6699_v18  ;;  %v4492_v18 = vld [vmem:[#allocation3 + $0x56] sm:$0xff] }
 0x355   : > { %6360 = vmatmul.mubr.bf16.gmra.mxu0 %v3844_v53  ;;  %6451 = vmatprep.subr.bf16.mxu1 %v7857_v30  ;;  %v4493_v53 = vld [vmem:[#allocation3 + $0x5e] sm:$0xff] }
 0x356   : > { %6396 = vmatmul.mubr.bf16.gmra.mxu1 %v4007_v36  ;;  %6416 = vmatpush3.bf16.msra.mxu0 %v6698_v3  ;;  %v4497_v3 = vpack.c.bf16 %v4491_v12, %v4490_v26  ;;  %v4498_v36 = vpack.c.bf16 %v4493_v53, %v4492_v18 }
 0x357   : > { %6363 = vmatprep.mubr.msk.bf16.mxu0 %vm6728_vm2, %v7857_v30  ;;  %6399 = vmatprep.mubr.msk.bf16.mxu1 %vm6728_vm2, %v7857_v30 }
 0x358   : > { %6417 = vmatprep.subr.bf16.mxu0 %v7857_v30  ;;  %6452 = vmatpush3.bf16.msra.mxu1 %v6701_v51 }
 0x359   : > { %6453 = vmatprep.subr.bf16.mxu1 %v7857_v30 }
 0x35a   : > { %6418 = vmatpush3.bf16.msra.mxu0 %v6700_v39 }
 0x35b   : > { %6419 = vmatprep.subr.bf16.mxu0 %v7857_v30 }
 0x35c   : > { %6454 = vmatpush3.bf16.msra.mxu1 %v6702_v29 }
 0x35d   : > { %6364 = vmatmul.mubr.bf16.gmra.mxu0 %v3845_v34  ;;  %6455 = vmatprep.subr.bf16.mxu1 %v7857_v30 }
 0x35e   : > { %6400 = vmatmul.mubr.bf16.gmra.mxu1 %v4008_v27  ;;  %6420 = vmatpush3.bf16.msra.mxu0 %v6703_v54 }
 0x35f   : > { %6367 = vmatprep.mubr.msk.bf16.mxu0 %vm6728_vm2, %v7857_v30  ;;  %6403 = vmatprep.mubr.msk.bf16.mxu1 %vm6728_vm2, %v7857_v30 }
 0x360   : > { %6421 = vmatprep.subr.bf16.mxu0 %v7857_v30  ;;  %6456 = vmatpush3.bf16.msra.mxu1 %v6704_v0 }
 0x361   : > { %6457 = vmatprep.subr.bf16.mxu1 %v7857_v30 }
 0x362   : > { %6422 = vmatpush3.bf16.msra.mxu0 %v6705_v49 }
 0x363   : > { %6479 = vmatprep.subr.bf16.mxu0 %v7857_v30 }
 0x364   : > { %6458 = vmatpush3.bf16.msra.mxu1 %v6706_v16 }
 0x365   : > { %6368 = vmatmul.mubr.bf16.gmra.mxu0 %v3846_v47 }
 0x366   : > { %6404 = vmatmul.mubr.bf16.gmra.mxu1 %v4009_v32  ;;  %6423 = vmatprep.mubr.msk.bf16.mxu0 %vm6728_vm2, %v7857_v30 }
 0x367   : > { %6459 = vmatprep.mubr.msk.bf16.mxu1 %vm6728_vm2, %v7857_v30 }
 0x36d   : > { %6424 = vmatmul.mubr.bf16.vlgmr.msra.gmra.mxu0 %v4168_v11 }
 0x36e   : > { %6460 = vmatmul.mubr.bf16.vlgmr.msra.gmra.mxu1 %v4331_v61  ;;  %6480 = vmatpush3.bf16.msra.mxu0 %v6707_v60 }
 0x36f   : > { %6427 = vmatprep.mubr.msk.bf16.mxu0 %vm6728_vm2, %v7857_v30  ;;  %6481 = vmatprep.subr.bf16.mxu0 %v7857_v30 }
 0x370   : > { %6463 = vmatprep.mubr.msk.bf16.mxu1 %vm6728_vm2, %v7857_v30 }
 0x372   : > { %6482 = vmatpush3.bf16.msra.mxu0 %v6708_v57 }
 0x373   : > { %6483 = vmatprep.subr.bf16.mxu0 %v7857_v30 }
 0x375   : > { %6428 = vmatmul.mubr.bf16.gmra.mxu0 %v4169_v46 }
 0x376   : > { %6464 = vmatmul.mubr.bf16.gmra.mxu1 %v4332_v28  ;;  %6484 = vmatpush3.bf16.msra.mxu0 %v6709_v19 }
 0x377   : > { %6431 = vmatprep.mubr.msk.bf16.mxu0 %vm6728_vm2, %v7857_v30  ;;  %6485 = vmatprep.subr.bf16.mxu0 %v7857_v30 }
 0x378   : > { %6467 = vmatprep.mubr.msk.bf16.mxu1 %vm6728_vm2, %v7857_v30 }
 0x37a   : > { %6486 = vmatpush3.bf16.msra.mxu0 %v6710_v15 }
 0x37b   : > { %6487 = vmatprep.subr.bf16.mxu0 %v7857_v30 }
 0x37d   : > { %6432 = vmatmul.mubr.bf16.gmra.mxu0 %v4170_v41 }
 0x37e   : > { %6468 = vmatmul.mubr.bf16.gmra.mxu1 %v4333_v63  ;;  %6488 = vmatpush3.bf16.msra.mxu0 %v6711_v35 }
 0x37f   : > { %6435 = vmatprep.mubr.msk.bf16.mxu0 %vm6728_vm2, %v7857_v30  ;;  %6471 = vmatprep.mubr.msk.bf16.mxu1 %vm6728_vm2, %v7857_v30 }
 0x380   : > { %6489 = vmatprep.subr.bf16.mxu0 %v7857_v30 }
 0x382   : > { %6490 = vmatpush3.bf16.msra.mxu0 %v6712_v7 }
 0x383   : > { %6491 = vmatprep.subr.bf16.mxu0 %v7857_v30 }
 0x385   : > { %6436 = vmatmul.mubr.bf16.gmra.mxu0 %v4171_v50 }
 0x386   : > { %6472 = vmatmul.mubr.bf16.gmra.mxu1 %v4334_v2  ;;  %6492 = vmatpush3.bf16.msra.mxu0 %v6713_v6 }
 0x387   : > { %6439 = vmatprep.mubr.msk.bf16.mxu0 %vm6728_vm2, %v7857_v30  ;;  %6475 = vmatprep.mubr.msk.bf16.mxu1 %vm6728_vm2, %v7857_v30 }
 0x388   : > { %6493 = vmatprep.subr.bf16.mxu0 %v7857_v30 }
 0x38a   : > { %6494 = vmatpush3.bf16.msra.mxu0 %v6714_v22 }
 0x38d   : > { %6440 = vmatmul.mubr.bf16.gmra.mxu0 %v4172_v45 }
 0x38e   : > { %6476 = vmatmul.mubr.bf16.gmra.mxu1 %v4335_v4  ;;  %6495 = vmatprep.mubr.msk.bf16.mxu0 %vm6728_vm2, %v7857_v30 }
 0x395   : > { %6496 = vmatmul.mubr.bf16.vlgmr.msra.gmra.mxu0 %v4494_v33 }
 0x396   : > { %6499 = vmatprep.mubr.msk.bf16.mxu0 %vm6728_vm2, %v7857_v30 }
 0x39d   : > { %6500 = vmatmul.mubr.bf16.gmra.mxu0 %v4495_v9 }
 0x39e   : > { %6503 = vmatprep.mubr.msk.bf16.mxu0 %vm6728_vm2, %v7857_v30 }
 0x3a5   : > { %6504 = vmatmul.mubr.bf16.gmra.mxu0 %v4496_v48 }
 0x3a6   : > { %6507 = vmatprep.mubr.msk.bf16.mxu0 %vm6728_vm2, %v7857_v30 }
 0x3ad   : > { %6508 = vmatmul.mubr.bf16.gmra.mxu0 %v4497_v3 }
 0x3ae   : > { %6511 = vmatprep.mubr.msk.bf16.mxu0 %vm6728_vm2, %v7857_v30 }
 0x3b5   : > { %v3346_v39 = vpop.f32.mrf.mxu0  ;;  %6512 = vmatmul.mubr.bf16.gmra.mxu0 %v4498_v36 }
 0x3b6   : > { %v3467_v51 = vpop.f32.mrf.mxu1 }
 0x3b7   : > { %v3468_v55 = vadd.f32 %v3467_v51, %v3346_v39  ;;  %v6209_v25 = vpop.f32.mrf.mxu0 }
 0x3b8   : > { %v6245_v40 = vpop.f32.mrf.mxu1 }
 0x3b9   : > { %v3349_v20 = vpop.f32.mrf.mxu0 }
 0x3ba   : > { %v3470_v29 = vpop.f32.mrf.mxu1 }
 0x3bb   : > { %v3471_v54 = vadd.f32 %v3470_v29, %v3349_v20  ;;  %v6210_v34 = vpop.f32.mrf.mxu0 }
 0x3bc   : > { %v6246_v27 = vpop.f32.mrf.mxu1 }
 0x3bd   : > { %v3354_v0 = vpop.f32.mrf.mxu0 }
 0x3be   : > { %v3475_v49 = vpop.f32.mrf.mxu1 }
 0x3bf   : > { %v3476_v24 = vadd.f32 %v3475_v49, %v3354_v0  ;;  %v6213_v21 = vpop.f32.mrf.mxu0 }
 0x3c0   : > { %v6249_v10 = vpop.f32.mrf.mxu1 }
 0x3c1   : > { %v3357_v30 = vpop.f32.mrf.mxu0 }
 0x3c2   : > { %v3478_v56 = vpop.f32.mrf.mxu1 }
 0x3c3   : > { %v3479_v16 = vadd.f32 %v3478_v56, %v3357_v30  ;;  %v6214_v47 = vpop.f32.mrf.mxu0 }
 0x3c4   : > { %v6250_v32 = vpop.f32.mrf.mxu1 }
 0x3c5   : > { %v3362_v38 = vpop.f32.mrf.mxu0 }
 0x3c6   : > { %v3483_v52 = vpop.f32.mrf.mxu1 }
 0x3c7   : > { %v3484_v60 = vadd.f32 %v3483_v52, %v3362_v38  ;;  %v6217_v11 = vpop.f32.mrf.mxu0 }
 0x3c8   : > { %v6253_v61 = vpop.f32.mrf.mxu1 }
 0x3c9   : > { %v3365_v57 = vpop.f32.mrf.mxu0 }
 0x3ca   : > { %v3486_v43 = vpop.f32.mrf.mxu1 }
 0x3cb   : > { %v3487_v58 = vadd.f32 %v3486_v43, %v3365_v57  ;;  %v6218_v19 = vpop.f32.mrf.mxu0 }
 0x3cc   : > { %v6254_v46 = vpop.f32.mrf.mxu1 }
 0x3cd   : > { %v3370_v28 = vpop.f32.mrf.mxu0 }
 0x3ce   : > { %v3491_v15 = vpop.f32.mrf.mxu1 }
 0x3cf   : > { %v3492_v8 = vadd.f32 %v3491_v15, %v3370_v28  ;;  %v6221_v62 = vpop.f32.mrf.mxu0 }
 0x3d0   : > { %v6257_v35 = vpop.f32.mrf.mxu1 }
 0x3d1   : > { %v3373_v41 = vpop.f32.mrf.mxu0 }
 0x3d2   : > { %v3494_v63 = vpop.f32.mrf.mxu1 }
 0x3d3   : > { %v3495_v7 = vadd.f32 %v3494_v63, %v3373_v41  ;;  %v6222_v23 = vpop.f32.mrf.mxu0 }
 0x3d4   : > { %v6258_v1 = vpop.f32.mrf.mxu1 }
 0x3d5   : > { %v3378_v6 = vpop.f32.mrf.mxu0 }
 0x3d6   : > { %v3499_v50 = vpop.f32.mrf.mxu1 }
 0x3d7   : > { %v3500_v2 = vadd.f32 %v3499_v50, %v3378_v6  ;;  %v6225_v22 = vpop.f32.mrf.mxu0 }
 0x3d8   : > { %v6261_v5 = vpop.f32.mrf.mxu1 }
 0x3d9   : > { %v3381_v44 = vpop.f32.mrf.mxu0 }
 0x3da   : > { %v3502_v13 = vpop.f32.mrf.mxu1 }
 0x3db   : > { %v3503_v45 = vadd.f32 %v3502_v13, %v3381_v44  ;;  %v6226_v4 = vpop.f32.mrf.mxu0 }
 0x3dc   : > { %v6262_v59 = vpop.f32.mrf.mxu1 }
 0x3dd   : > { %v3620_v14 = vpop.f32.mrf.mxu0 }
 0x3de   : > { %v3783_v33 = vpop.f32.mrf.mxu1  ;;  %v3659_v42 = vadd.f32 %v3620_v14, %v3468_v55 }
 0x3df   : > { %v6281_v31 = vpop.f32.mrf.mxu0 }
 0x3e0   : > { %v6317_v9 = vpop.f32.mrf.mxu1  ;;  %v3822_v17 = vadd.f32 %v3783_v33, %v3659_v42 }
 0x3e1   : > { %v3623_v37 = vpop.f32.mrf.mxu0 }
 0x3e2   : > { %v3786_v48 = vpop.f32.mrf.mxu1  ;;  %v3660_v26 = vadd.f32 %v3623_v37, %v3471_v54 }
 0x3e3   : > { %v6282_v12 = vpop.f32.mrf.mxu0 }
 0x3e4   : > { %v6318_v3 = vpop.f32.mrf.mxu1  ;;  %v3823_v18 = vadd.f32 %v3786_v48, %v3660_v26 }
 0x3e5   : > { %v3628_v53 = vpop.f32.mrf.mxu0 }
 0x3e6   : > { %v3791_v36 = vpop.f32.mrf.mxu1  ;;  %v3661_v39 = vadd.f32 %v3628_v53, %v3476_v24 }
 0x3e7   : > { %v6285_v51 = vpop.f32.mrf.mxu0 }
 0x3e8   : > { %v6321_v25 = vpop.f32.mrf.mxu1  ;;  %v3824_v40 = vadd.f32 %v3791_v36, %v3661_v39 }
 0x3e9   : > { %v3631_v20 = vpop.f32.mrf.mxu0 }
 0x3ea   : > { %v3794_v29 = vpop.f32.mrf.mxu1  ;;  %v3662_v34 = vadd.f32 %v3631_v20, %v3479_v16 }
 0x3eb   : > { %v6286_v27 = vpop.f32.mrf.mxu0 }
 0x3ec   : > { %v6322_v55 = vpop.f32.mrf.mxu1  ;;  %v3825_v0 = vadd.f32 %v3794_v29, %v3662_v34 }
 0x3ed   : > { %v3636_v49 = vpop.f32.mrf.mxu0 }
 0x3ee   : > { %v3799_v21 = vpop.f32.mrf.mxu1  ;;  %v3663_v10 = vadd.f32 %v3636_v49, %v3484_v60 }
 0x3ef   : > { %v6289_v30 = vpop.f32.mrf.mxu0 }
 0x3f0   : > { %v6325_v54 = vpop.f32.mrf.mxu1  ;;  %v3826_v56 = vadd.f32 %v3799_v21, %v3663_v10 }
 0x3f1   : > { %v3639_v47 = vpop.f32.mrf.mxu0 }
 0x3f2   : > { %v3802_v32 = vpop.f32.mrf.mxu1  ;;  %v3664_v38 = vadd.f32 %v3639_v47, %v3487_v58 }
 0x3f3   : > { %v6290_v52 = vpop.f32.mrf.mxu0 }
 0x3f4   : > { %v6326_v24 = vpop.f32.mrf.mxu1  ;;  %v3827_v11 = vadd.f32 %v3802_v32, %v3664_v38 }
 0x3f5   : > { %v3644_v61 = vpop.f32.mrf.mxu0 }
 0x3f6   : > { %v3807_v57 = vpop.f32.mrf.mxu1  ;;  %v3665_v43 = vadd.f32 %v3644_v61, %v3492_v8 }
 0x3f7   : > { %v6293_v19 = vpop.f32.mrf.mxu0 }
 0x3f8   : > { %v6329_v16 = vpop.f32.mrf.mxu1  ;;  %v3828_v46 = vadd.f32 %v3807_v57, %v3665_v43 }
 0x3f9   : > { %v3647_v28 = vpop.f32.mrf.mxu0 }
 0x3fa   : > { %v3810_v15 = vpop.f32.mrf.mxu1  ;;  %v3666_v62 = vadd.f32 %v3647_v28, %v3495_v7 }
 0x3fb   : > { %v6294_v35 = vpop.f32.mrf.mxu0 }
 0x3fc   : > { %v6330_v60 = vpop.f32.mrf.mxu1  ;;  %v3829_v41 = vadd.f32 %v3810_v15, %v3666_v62 }
 0x3fd   : > { %v3652_v63 = vpop.f32.mrf.mxu0 }
 0x3fe   : > { %v3815_v23 = vpop.f32.mrf.mxu1  ;;  %v3667_v1 = vadd.f32 %v3652_v63, %v3500_v2 }
 0x3ff   : > { %v6297_v6 = vpop.f32.mrf.mxu0 }
 0x400   : > { %v6333_v58 = vpop.f32.mrf.mxu1  ;;  %v3830_v50 = vadd.f32 %v3815_v23, %v3667_v1 }
 0x401   : > { %v3655_v22 = vpop.f32.mrf.mxu0 }
 0x402   : > { %v3818_v5 = vpop.f32.mrf.mxu1  ;;  %v3668_v44 = vadd.f32 %v3655_v22, %v3503_v45 }
 0x403   : > { %v6298_v13 = vpop.f32.mrf.mxu0 }
 0x404   : > { %v6334_v8 = vpop.f32.mrf.mxu1  ;;  %v3831_v4 = vadd.f32 %v3818_v5, %v3668_v44 }
 0x405   : > { %v3946_v59 = vpop.f32.mrf.mxu0 }
 0x406   : > { %v4109_v14 = vpop.f32.mrf.mxu1  ;;  %v3985_v33 = vadd.f32 %v3946_v59, %v3822_v17 }
 0x407   : > { %v6353_v42 = vpop.f32.mrf.mxu0 }
 0x408   : > { %v6389_v7 = vpop.f32.mrf.mxu1  ;;  %v8222_v31 = vadd.f32 %v4109_v14, %v3985_v33 }
 0x409   : > { %v3949_v9 = vpop.f32.mrf.mxu0 }
 0x40a   : > { %v4112_v37 = vpop.f32.mrf.mxu1  ;;  %v3986_v48 = vadd.f32 %v3949_v9, %v3823_v18 }
 0x40b   : > { %v6354_v2 = vpop.f32.mrf.mxu0 }
 0x40c   : > { %v6390_v26 = vpop.f32.mrf.mxu1  ;;  %v8224_v12 = vadd.f32 %v4112_v37, %v3986_v48 }
 0x40d   : > { %v3954_v3 = vpop.f32.mrf.mxu0 }
 0x40e   : > { %v4117_v53 = vpop.f32.mrf.mxu1  ;;  %v3987_v45 = vadd.f32 %v3954_v3, %v3824_v40 }
 0x40f   : > { %v6357_v36 = vpop.f32.mrf.mxu0 }
 0x410   : > { %v6393_v39 = vpop.f32.mrf.mxu1  ;;  %v8226_v51 = vadd.f32 %v4117_v53, %v3987_v45 }
 0x411   : > { %v3957_v25 = vpop.f32.mrf.mxu0 }
 0x412   : > { %v4120_v17 = vpop.f32.mrf.mxu1  ;;  %v3988_v20 = vadd.f32 %v3957_v25, %v3825_v0 }
 0x413   : > { %v6358_v29 = vpop.f32.mrf.mxu0 }
 0x414   : > { %v6394_v34 = vpop.f32.mrf.mxu1  ;;  %v8228_v27 = vadd.f32 %v4120_v17, %v3988_v20 }
 0x415   : > { %v3962_v55 = vpop.f32.mrf.mxu0 }
 0x416   : > { %v4125_v18 = vpop.f32.mrf.mxu1  ;;  %v3989_v49 = vadd.f32 %v3962_v55, %v3826_v56 }
 0x417   : > { %v6361_v21 = vpop.f32.mrf.mxu0 }
 0x418   : > { %v6397_v10 = vpop.f32.mrf.mxu1  ;;  %v8230_v30 = vadd.f32 %v4125_v18, %v3989_v49 }
 0x419   : > { %v3965_v54 = vpop.f32.mrf.mxu0 }
 0x41a   : > { %v4128_v40 = vpop.f32.mrf.mxu1  ;;  %v3990_v47 = vadd.f32 %v3965_v54, %v3827_v11 }
 0x41b   : > { %v6362_v32 = vpop.f32.mrf.mxu0 }
 0x41c   : > { %v6398_v38 = vpop.f32.mrf.mxu1  ;;  %v8232_v52 = vadd.f32 %v4128_v40, %v3990_v47 }
 0x41d   : > { %v3970_v24 = vpop.f32.mrf.mxu0 }
 0x41e   : > { %v4133_v0 = vpop.f32.mrf.mxu1  ;;  %v3991_v61 = vadd.f32 %v3970_v24, %v3828_v46 }
 0x41f   : > { %v6365_v57 = vpop.f32.mrf.mxu0 }
 0x420   : > { %v6401_v43 = vpop.f32.mrf.mxu1  ;;  %v8234_v19 = vadd.f32 %v4133_v0, %v3991_v61 }
 0x421   : > { %v3973_v16 = vpop.f32.mrf.mxu0 }
 0x422   : > { %v4136_v56 = vpop.f32.mrf.mxu1  ;;  %v3992_v28 = vadd.f32 %v3973_v16, %v3829_v41 }
 0x423   : > { %v6366_v15 = vpop.f32.mrf.mxu0 }
 0x424   : > { %v6402_v62 = vpop.f32.mrf.mxu1  ;;  %v8236_v35 = vadd.f32 %v4136_v56, %v3992_v28 }
 0x425   : > { %v3978_v60 = vpop.f32.mrf.mxu0 }
 0x426   : > { %v4141_v11 = vpop.f32.mrf.mxu1  ;;  %v3993_v63 = vadd.f32 %v3978_v60, %v3830_v50 }
 0x427   : > { %v6369_v23 = vpop.f32.mrf.mxu0 }
 0x428   : > { %v6405_v1 = vpop.f32.mrf.mxu1  ;;  %v8238_v6 = vadd.f32 %v4141_v11, %v3993_v63  ;;  %v8257_v11 = vld [vmem:[%s8302_s6] ss:$0 sm:$0xff] }
 0x429   : > { %v3981_v58 = vpop.f32.mrf.mxu0 }
 0x42a   : > { %v4144_v46 = vpop.f32.mrf.mxu1  ;;  %v3994_v22 = vadd.f32 %v3981_v58, %v3831_v4 }
 0x42b   : > { %v6370_v5 = vpop.f32.mrf.mxu0 }
 0x42c   : > { %v6406_v44 = vpop.f32.mrf.mxu1  ;;  %v8240_v13 = vadd.f32 %v4144_v46, %v3994_v22 }
 0x42d   : > { %v4272_v8 = vpop.f32.mrf.mxu0 }
 0x42e   : > { %v4435_v41 = vpop.f32.mrf.mxu1  ;;  %v4311_v61 = vadd.f32 %v4272_v8, %v8222_v31 }
 0x42f   : > { %v6425_v59 = vpop.f32.mrf.mxu0 }
 0x430   : > { %v6461_v14 = vpop.f32.mrf.mxu1  ;;  %v4474_v28 = vadd.f32 %v4435_v41, %v4311_v61 }
 0x431   : > { %v4275_v33 = vpop.f32.mrf.mxu0 }
 0x432   : > { %v4438_v42 = vpop.f32.mrf.mxu1  ;;  %v4312_v15 = vadd.f32 %v4275_v33, %v8224_v12 }
 0x433   : > { %v6426_v7 = vpop.f32.mrf.mxu0 }
 0x434   : > { %v6462_v9 = vpop.f32.mrf.mxu1  ;;  %v4475_v23 = vadd.f32 %v4438_v42, %v4312_v15 }
 0x435   : > { %v4280_v50 = vpop.f32.mrf.mxu0 }
 0x436   : > { %v4443_v37 = vpop.f32.mrf.mxu1  ;;  %v4313_v31 = vadd.f32 %v4280_v50, %v8226_v51 }
 0x437   : > { %v6429_v48 = vpop.f32.mrf.mxu0 }
 0x438   : > { %v6465_v2 = vpop.f32.mrf.mxu1  ;;  %v4476_v5 = vadd.f32 %v4443_v37, %v4313_v31 }
 0x439   : > { %v4283_v26 = vpop.f32.mrf.mxu0 }
 0x43a   : > { %v4446_v3 = vpop.f32.mrf.mxu1  ;;  %v4314_v12 = vadd.f32 %v4283_v26, %v8228_v27 }
 0x43b   : > { %v6430_v53 = vpop.f32.mrf.mxu0 }
 0x43c   : > { %v6466_v4 = vpop.f32.mrf.mxu1  ;;  %v4477_v33 = vadd.f32 %v4446_v3, %v4314_v12 }
 0x43d   : > { %v4288_v45 = vpop.f32.mrf.mxu0 }
 0x43e   : > { %v4451_v36 = vpop.f32.mrf.mxu1  ;;  %v4315_v42 = vadd.f32 %v4288_v45, %v8230_v30 }
 0x43f   : > { %v6433_v39 = vpop.f32.mrf.mxu0 }
 0x440   : > { %v6469_v25 = vpop.f32.mrf.mxu1  ;;  %v4478_v48 = vadd.f32 %v4451_v36, %v4315_v42 }
 0x441   : > { %v4291_v17 = vpop.f32.mrf.mxu0 }
 0x442   : > { %v4454_v20 = vpop.f32.mrf.mxu1  ;;  %v4316_v2 = vadd.f32 %v4291_v17, %v8232_v52 }
 0x443   : > { %v6434_v29 = vpop.f32.mrf.mxu0 }
 0x444   : > { %v6470_v34 = vpop.f32.mrf.mxu1  ;;  %v4479_v29 = vadd.f32 %v4454_v20, %v4316_v2 }
 0x445   : > { %v4296_v55 = vpop.f32.mrf.mxu0 }
 0x446   : > { %v4459_v18 = vpop.f32.mrf.mxu1  ;;  %v4317_v30 = vadd.f32 %v4296_v55, %v8234_v19 }
 0x447   : > { %v6437_v49 = vpop.f32.mrf.mxu0 }
 0x448   : > { %v6473_v21 = vpop.f32.mrf.mxu1 }
 0x449   : > { %v4299_v10 = vpop.f32.mrf.mxu0 }
 0x44a   : > { %v8242_v54 = vpop.f32.mrf.mxu1  ;;  %v4318_v52 = vadd.f32 %v4299_v10, %v8236_v35 }
 0x44b   : > { %v6438_v40 = vpop.f32.mrf.mxu0 }
 0x44c   : > { %v6474_v47 = vpop.f32.mrf.mxu1  ;;  %v4480_v40 = vadd.f32 %v4459_v18, %v4317_v30  ;;  %v4481_v19 = vadd.f32 %v8242_v54, %v4318_v52 }
 0x44d   : > { %v8244_v32 = vpop.f32.mrf.mxu0 }
 0x44e   : > { %v8246_v38 = vpop.f32.mrf.mxu1  ;;  %v4319_v55 = vadd.f32 %v8244_v32, %v8238_v6 }
 0x44f   : > { %v6441_v24 = vpop.f32.mrf.mxu0 }
 0x450   : > { %v6477_v0 = vpop.f32.mrf.mxu1  ;;  %v4482_v10 = vadd.f32 %v8246_v38, %v4319_v55 }
 0x451   : > { %v8249_v57 = vpop.f32.mrf.mxu0 }
 0x452   : > { %v8251_v43 = vpop.f32.mrf.mxu1  ;;  %v4320_v15 = vadd.f32 %v8249_v57, %v8240_v13 }
 0x453   : > { %v6442_v16 = vpop.f32.mrf.mxu0 }
 0x454   : > { %v6478_v56 = vpop.f32.mrf.mxu1 }
 0x455   : > { %v4598_v62 = vpop.f32.mrf.mxu0 }
 0x456   : > { %v4637_v60 = vadd.f32 %v4598_v62, %v4474_v28 }
 0x457   : > { %v6497_v63 = vpop.f32.mrf.mxu0 }
 0x458   : > { %v4654_v58 = vadd.f32 %v8257_v11, %v4637_v60 }
 0x459   : > { %v4601_v1 = vpop.f32.mrf.mxu0 }
 0x45a   : > { %v4638_v46 = vadd.f32 %v4601_v1, %v4475_v23  ;;  %v4664_v41 = vmax.f32 %v4654_v58, 0.0  ;;  %v4483_v23 = vadd.f32 %v8251_v43, %v4320_v15 }
 0x45b   : > { %v6498_v22 = vpop.f32.mrf.mxu0 }
 0x45c   : > { %v4655_v44 = vadd.f32 %v8257_v11, %v4638_v46 }
 0x45d   : > { %v4606_v8 = vpop.f32.mrf.mxu0 }
 0x45e   : > { %v4665_v59 = vmax.f32 %v4655_v44, 0.0  ;;  %v4639_v14 = vadd.f32 %v4606_v8, %v4476_v5 }
 0x45f   : > { %v6501_v51 = vpop.f32.mrf.mxu0 }
 0x460   : > { %v5355_v7 = vpack.c.bf16 %v4665_v59, %v4664_v41  ;;  %v4656_v27 = vadd.f32 %v8257_v11, %v4639_v14 }
 0x461   : > { %v4609_v9 = vpop.f32.mrf.mxu0 }
 0x462   : > { %5356 = vst [vmem:[%s8267_s30] sm:$0xff] %v5355_v7   ;;  %v4640_v50 = vadd.f32 %v4609_v9, %v4477_v33  ;;  %v4666_v4 = vmax.f32 %v4656_v27, 0.0 }
 0x463   : > { %v6502_v37 = vpop.f32.mrf.mxu0 }
 0x464   : > { %v4657_v26 = vadd.f32 %v8257_v11, %v4640_v50 }
 0x465   : > { %v4614_v53 = vpop.f32.mrf.mxu0 }
 0x466   : > { %v4667_v39 = vmax.f32 %v4657_v26, 0.0  ;;  %v4641_v25 = vadd.f32 %v4614_v53, %v4478_v48 }
 0x467   : > { %v6505_v3 = vpop.f32.mrf.mxu0 }
 0x468   : > { %v5360_v45 = vpack.c.bf16 %v4667_v39, %v4666_v4  ;;  %v4658_v49 = vadd.f32 %v8257_v11, %v4641_v25 }
 0x469   : > { %v4617_v34 = vpop.f32.mrf.mxu0 }
 0x46a   : > { %5377 = vst [vmem:[%s8267_s30 + $0x8] sm:$0xff] %v5360_v45   ;;  %v4642_v21 = vadd.f32 %v4617_v34, %v4479_v29  ;;  %v4668_v24 = vmax.f32 %v4658_v49, 0.0 }
 0x46b   : > { %v6506_v36 = vpop.f32.mrf.mxu0 }
 0x46c   : > { %v4659_v17 = vadd.f32 %v8257_v11, %v4642_v21 }
 0x46d   : > { %v4622_v47 = vpop.f32.mrf.mxu0 }
 0x46e   : > { %v4669_v0 = vmax.f32 %v4659_v17, 0.0  ;;  %v4643_v61 = vadd.f32 %v4622_v47, %v4480_v40 }
 0x46f   : > { %v6509_v20 = vpop.f32.mrf.mxu0 }
 0x470   : > { %v5365_v16 = vpack.c.bf16 %v4669_v0, %v4668_v24  ;;  %v4660_v18 = vadd.f32 %v8257_v11, %v4643_v61 }
 0x471   : > { %v4625_v56 = vpop.f32.mrf.mxu0 }
 0x472   : > { %5378 = vst [vmem:[%s8267_s30 + $0x10] sm:$0xff] %v5365_v16   ;;  %v4644_v28 = vadd.f32 %v4625_v56, %v4481_v19  ;;  %v4670_v54 = vmax.f32 %v4660_v18, 0.0 }
 0x473   : > { %v6510_v35 = vpop.f32.mrf.mxu0 }
 0x474   : > { %v4661_v62 = vadd.f32 %v8257_v11, %v4644_v28 }
 0x475   : > { %v4630_v60 = vpop.f32.mrf.mxu0 }
 0x476   : > { %v4671_v63 = vmax.f32 %v4661_v62, 0.0  ;;  %v4645_v6 = vadd.f32 %v4630_v60, %v4482_v10 }
 0x477   : > { %v6513_v32 = vpop.f32.mrf.mxu0 }
 0x478   : > { %v5370_v31 = vpack.c.bf16 %v4671_v63, %v4670_v54  ;;  %v4662_v58 = vadd.f32 %v8257_v11, %v4645_v6 }
 0x479   : > { %v4633_v1 = vpop.f32.mrf.mxu0 }
 0x47a   : > { %5379 = vst [vmem:[%s8267_s30 + $0x18] sm:$0xff] %v5370_v31   ;;  %v4646_v46 = vadd.f32 %v4633_v1, %v4483_v23  ;;  %v4672_v13 = vmax.f32 %v4662_v58, 0.0 }
 0x47b   : > { %v6514_v38 = vpop.f32.mrf.mxu0 }
 0x47c   : > { %v4663_v22 = vadd.f32 %v8257_v11, %v4646_v46 }
 0x47e   : > { %v4673_v57 = vmax.f32 %v4663_v22, 0.0 }
 0x480   : > { %v5375_v5 = vpack.c.bf16 %v4673_v57, %v4672_v13 }
 0x482   : > { %5380 = vst [vmem:[%s8267_s30 + $0x20] sm:$0xff] %v5375_v5  }
 0x483 PF: > { %s17_s24 = sadd.s32 1, %s6724_s24  }
 0x484   : > { %p14_p4 = scmp.ge.s32.totalorder %s17_s24, 4  }
 0x486   :  { %16 = sbr.rel (!%p14_p4) target bundleno = 1 (0x1), region = 105 }

</bundles_post_ra>
